<compile_context>
chip_gen: v6e
topology: v6e:2x2x1
jax: 0.10.0
libtpu: 0.0.40
codegen_flags: <defaults>
</compile_context>

<pallas_src>
import functools

import jax
import jax.numpy as jnp
from jax.experimental import pallas as pl
from jax.experimental.pallas import tpu as pltpu


def _ppem_fused_kernel(x_ref, w1_ref, b1_ref, w2_ref, b2_ref, o_ref,
                       xext_ref, hext_ref, *, H, W):
    """Fused conv1(3->64) + ReLU + conv2(64->3) for one batch element.

    x_ref  : (1, 3, H*W)   flattened NCHW input block
    w1_ref : (9, 64, 3)    conv1 weights, tap-major (kh*3+kw, Cout, Cin)
    b1_ref : (64, 1)
    w2_ref : (9, 3, 64)    conv2 weights, tap-major
    b2_ref : (3, 1)
    o_ref  : (1, 3, H*W)   flattened NCHW output block
    xext_ref : (3,  H*W + 2*(W+1))  VMEM scratch, zero-margined flat input
    hext_ref : (64, H*W + 2*(W+1))  VMEM scratch, zero-margined intermediate
    """
    f32 = jnp.float32
    L = H * W
    margin = W + 1

    # Column masks: a tap shifted by +/-1 in width reads the wrong row at the
    # image borders in flat coordinates; zeroing those contributions is
    # exactly the conv's zero padding.
    col = jax.lax.broadcasted_iota(jnp.int32, (1, L), 1) % W
    mask_l = (col != 0).astype(f32)        # taps with kw == 0
    mask_r = (col != (W - 1)).astype(f32)  # taps with kw == 2

    def conv3x3(ext_ref, w_ref):
        cout = w_ref.shape[1]
        acc = jnp.zeros((cout, L), f32)
        for kh in range(3):
            for kw in range(3):
                t = kh * 3 + kw
                start = margin + (kh - 1) * W + (kw - 1)
                operand = ext_ref[:, start:start + L]           # (Cin, L)
                if kw == 0:
                    operand = operand * mask_l
                elif kw == 2:
                    operand = operand * mask_r
                acc += jnp.dot(w_ref[t], operand,
                               preferred_element_type=f32)      # MXU, f32 acc
        return acc

    # Stage the input with zero margins ("same" padding done in VMEM).
    xext_ref[...] = jnp.zeros_like(xext_ref)
    xext_ref[:, margin:margin + L] = x_ref[0].astype(f32)

    # conv1 + bias + ReLU.
    h = conv3x3(xext_ref, w1_ref)
    h = jnp.maximum(h + b1_ref[...], 0.0)

    # The 64-channel intermediate stays in VMEM (never written to HBM).
    hext_ref[...] = jnp.zeros_like(hext_ref)
    hext_ref[:, margin:margin + L] = h

    # conv2 + bias.
    y = conv3x3(hext_ref, w2_ref) + b2_ref[...]
    o_ref[0] = y.astype(o_ref.dtype)


def ppem_forward_impl(x_nchw, params):
    """PPEM forward. Input/output are NCHW (like the PyTorch module)."""
    N, C, H, W = x_nchw.shape
    assert C == 3
    L = H * W
    Lext = L + 2 * (W + 1)

    x_flat = x_nchw.reshape(N, C, L)                      # free: contiguous
    # Tap-major weight layout: (kh*3+kw, Cout, Cin) from OIHW.
    w1k = jnp.transpose(params["w1"], (2, 3, 0, 1)).reshape(9, 64, 3)
    w2k = jnp.transpose(params["w2"], (2, 3, 0, 1)).reshape(9, 3, 64)
    b1 = params["b1"].reshape(64, 1)
    b2 = params["b2"].reshape(3, 1)

    kernel = functools.partial(_ppem_fused_kernel, H=H, W=W)
    out_flat = pl.pallas_call(
        kernel,
        out_shape=jax.ShapeDtypeStruct((N, 3, L), x_nchw.dtype),
        grid=(N,),
        in_specs=[
            pl.BlockSpec((1, 3, L), lambda n: (n, 0, 0)),
            pl.BlockSpec((9, 64, 3), lambda n: (0, 0, 0)),
            pl.BlockSpec((64, 1), lambda n: (0, 0)),
            pl.BlockSpec((9, 3, 64), lambda n: (0, 0, 0)),
            pl.BlockSpec((3, 1), lambda n: (0, 0)),
        ],
        out_specs=pl.BlockSpec((1, 3, L), lambda n: (n, 0, 0)),
        scratch_shapes=[
            pltpu.VMEM((3, Lext), jnp.float32),
            pltpu.VMEM((64, Lext), jnp.float32),
        ],
        compiler_params=pltpu.CompilerParams(
            dimension_semantics=("parallel",),
            vmem_limit_bytes=32 * 1024 * 1024),
    )(x_flat, w1k, b1, w2k, b2)
    return out_flat.reshape(N, 3, H, W)


ppem_forward = jax.jit(ppem_forward_impl)


def init_ppem_params(key):
    """Deterministic synthetic parameters (OIHW, like the PyTorch module)."""
    k1, k2, k3, k4 = jax.random.split(key, 4)
    w1 = jax.random.normal(k1, (64, 3, 3, 3), jnp.float32) * 0.1
    b1 = jax.random.normal(k2, (64,), jnp.float32) * 0.1
    w2 = jax.random.normal(k3, (3, 64, 3, 3), jnp.float32) * 0.1
    b2 = jax.random.normal(k4, (3,), jnp.float32) * 0.1
    return {"w1": w1, "b1": b1, "w2": w2, "b2": b2}


def _reference_forward(x_nchw, params):
    """Pure-JAX reference (lax conv) for a correctness check."""
    dn = ("NCHW", "OIHW", "NCHW")
    h = jax.lax.conv_general_dilated(x_nchw, params["w1"], (1, 1), "SAME",
                                     dimension_numbers=dn)
    h = jnp.maximum(h + params["b1"][None, :, None, None], 0.0)
    y = jax.lax.conv_general_dilated(h, params["w2"], (1, 1), "SAME",
                                     dimension_numbers=dn)
    return y + params["b2"][None, :, None, None]


if __name__ == "__main__":
    key = jax.random.PRNGKey(0)
    kx, kp = jax.random.split(key)
    x = jax.random.normal(kx, (2, 3, 16, 16), jnp.float32)   # NCHW, like PyTorch
    params = init_ppem_params(kp)

    out = ppem_forward(x, params)
    jax.block_until_ready(out)

    ref = _reference_forward(x, params)
    assert out.shape == (2, 3, 16, 16)
    assert jnp.allclose(out, ref, atol=1e-4, rtol=1e-4)

    print("KERNEL_OK")
</pallas_src>

<mosaic_0001>
module attributes {stable_mosaic.version = 11 : i64} {
  func.func @_ppem_fused_kernel(%arg0: i32, %arg1: memref<1x3x256xf32, #tpu.memory_space<vmem>>, %arg2: memref<9x64x3xf32, #tpu.memory_space<vmem>>, %arg3: memref<64x1xf32, #tpu.memory_space<vmem>>, %arg4: memref<9x3x64xf32, #tpu.memory_space<vmem>>, %arg5: memref<3x1xf32, #tpu.memory_space<vmem>>, %arg6: memref<1x3x256xf32, #tpu.memory_space<vmem>>, %arg7: memref<3x290xf32, #tpu.memory_space<vmem>>, %arg8: memref<64x290xf32, #tpu.memory_space<vmem>>) attributes {dimension_semantics = [#tpu.dimension_semantics<parallel>], iteration_bounds = array<i64: 2>, scalar_prefetch = 0 : i64, scratch_operands = 2 : i64, tpu.core_type = #tpu.core_type<tc>, window_params = [{transform_indices = @transform_0, window_bounds = array<i64: 1, 3, 256>}, {pipeline_mode = #tpu.pipeline_mode<synchronous>, transform_indices = @transform_1, window_bounds = array<i64: 9, 64, 3>}, {pipeline_mode = #tpu.pipeline_mode<synchronous>, transform_indices = @transform_2, window_bounds = array<i64: 64, 1>}, {pipeline_mode = #tpu.pipeline_mode<synchronous>, transform_indices = @transform_3, window_bounds = array<i64: 9, 3, 64>}, {pipeline_mode = #tpu.pipeline_mode<synchronous>, transform_indices = @transform_4, window_bounds = array<i64: 3, 1>}, {transform_indices = @transform_5, window_bounds = array<i64: 1, 3, 256>}]} {
    %0 = tpu.iota {dimensions = array<i32: 1>} : vector<1x256xi32>
    %c16_i32 = arith.constant 16 : i32
    %c0_i32 = arith.constant 0 : i32
    %1 = arith.cmpi eq, %c16_i32, %c0_i32 : i32
    %c1_i32 = arith.constant 1 : i32
    %2 = arith.select %1, %c1_i32, %c16_i32 : i32
    %3 = vector.broadcast %2 : i32 to vector<1x256xi32>
    %4 = arith.remsi %0, %3 : vector<1x256xi32>
    %c0_i32_0 = arith.constant 0 : i32
    %5 = vector.broadcast %c0_i32_0 : i32 to vector<1x256xi32>
    %6 = arith.cmpi ne, %4, %5 : vector<1x256xi32>
    %c0_i32_1 = arith.constant 0 : i32
    %7 = vector.broadcast %c0_i32_1 : i32 to vector<1x256xi32>
    %8 = arith.cmpi slt, %4, %7 : vector<1x256xi32>
    %c0_i32_2 = arith.constant 0 : i32
    %9 = arith.cmpi slt, %2, %c0_i32_2 : i32
    %10 = vector.broadcast %9 : i1 to vector<1x256xi1>
    %11 = vector.broadcast %10 : vector<1x256xi1> to vector<1x256xi1>
    %12 = arith.xori %8, %11 : vector<1x256xi1>
    %13 = arith.andi %12, %6 : vector<1x256xi1>
    %14 = vector.broadcast %2 : i32 to vector<1x256xi32>
    %15 = arith.addi %4, %14 : vector<1x256xi32>
    %16 = arith.select %13, %15, %4 : vector<1x256xi1>, vector<1x256xi32>
    %c0_i32_3 = arith.constant 0 : i32
    %17 = vector.broadcast %c0_i32_3 : i32 to vector<1x256xi32>
    %18 = arith.cmpi ne, %16, %17 : vector<1x256xi32>
    %19 = arith.extui %18 : vector<1x256xi1> to vector<1x256xi32>
    %20 = arith.sitofp %19 : vector<1x256xi32> to vector<1x256xf32>
    %c15_i32 = arith.constant 15 : i32
    %21 = vector.broadcast %c15_i32 : i32 to vector<1x256xi32>
    %22 = arith.cmpi ne, %16, %21 : vector<1x256xi32>
    %23 = arith.extui %22 : vector<1x256xi1> to vector<1x256xi32>
    %24 = arith.sitofp %23 : vector<1x256xi32> to vector<1x256xf32>
    %cst = arith.constant 0.000000e+00 : f32
    %25 = vector.broadcast %cst : f32 to vector<3x290xf32>
    %c0 = arith.constant 0 : index
    %c0_4 = arith.constant 0 : index
    %26 = vector.load %arg7[%c0, %c0_4] : memref<3x290xf32, #tpu.memory_space<vmem>>, vector<3x290xf32>
    tpu.vector_store %arg7[%c0, %c0_4], %25 {strides = array<i32>} : memref<3x290xf32, #tpu.memory_space<vmem>>, vector<3x290xf32>,
    %c0_5 = arith.constant 0 : index
    %c0_6 = arith.constant 0 : index
    %c0_7 = arith.constant 0 : index
    %27 = vector.load %arg1[%c0_5, %c0_6, %c0_7] : memref<1x3x256xf32, #tpu.memory_space<vmem>>, vector<1x3x256xf32>
    %28 = vector.shape_cast %27 : vector<1x3x256xf32> to vector<3x256xf32>
    %c0_8 = arith.constant 0 : index
    %c17 = arith.constant 17 : index
    %29 = vector.load %arg7[%c0_8, %c17] : memref<3x290xf32, #tpu.memory_space<vmem>>, vector<3x256xf32>
    tpu.vector_store %arg7[%c0_8, %c17], %28 {strides = array<i32>} : memref<3x290xf32, #tpu.memory_space<vmem>>, vector<3x256xf32>,
    %cst_9 = arith.constant 0.000000e+00 : f32
    %30 = vector.broadcast %cst_9 : f32 to vector<64x256xf32>
    %c0_10 = arith.constant 0 : index
    %c0_11 = arith.constant 0 : index
    %31 = vector.load %arg7[%c0_10, %c0_11] : memref<3x290xf32, #tpu.memory_space<vmem>>, vector<3x256xf32>
    %32 = vector.broadcast %20 : vector<1x256xf32> to vector<3x256xf32>
    %33 = arith.mulf %31, %32 : vector<3x256xf32>
    %c0_12 = arith.constant 0 : index
    %c0_13 = arith.constant 0 : index
    %c0_14 = arith.constant 0 : index
    %34 = vector.load %arg2[%c0_12, %c0_13, %c0_14] : memref<9x64x3xf32, #tpu.memory_space<vmem>>, vector<1x64x3xf32>
    %35 = vector.shape_cast %34 : vector<1x64x3xf32> to vector<64x3xf32>
    %cst_15 = arith.constant dense<0.000000e+00> : vector<64x256xf32>
    %36 = tpu.matmul %35, %33, %cst_15 {dimension_numbers = #tpu.dot_dimension_numbers<[1], [0], [0], [1], [0, 0, 1, 1], [], []>} : vector<64x3xf32>, vector<3x256xf32>, vector<64x256xf32> -> vector<64x256xf32>
    %37 = arith.addf %30, %36 : vector<64x256xf32>
    %c0_16 = arith.constant 0 : index
    %c1 = arith.constant 1 : index
    %38 = vector.load %arg7[%c0_16, %c1] : memref<3x290xf32, #tpu.memory_space<vmem>>, vector<3x256xf32>
    %c1_17 = arith.constant 1 : index
    %c0_18 = arith.constant 0 : index
    %c0_19 = arith.constant 0 : index
    %39 = vector.load %arg2[%c1_17, %c0_18, %c0_19] : memref<9x64x3xf32, #tpu.memory_space<vmem>>, vector<1x64x3xf32>
    %40 = vector.shape_cast %39 : vector<1x64x3xf32> to vector<64x3xf32>
    %cst_20 = arith.constant dense<0.000000e+00> : vector<64x256xf32>
    %41 = tpu.matmul %40, %38, %cst_20 {dimension_numbers = #tpu.dot_dimension_numbers<[1], [0], [0], [1], [0, 0, 1, 1], [], []>} : vector<64x3xf32>, vector<3x256xf32>, vector<64x256xf32> -> vector<64x256xf32>
    %42 = arith.addf %37, %41 : vector<64x256xf32>
    %c0_21 = arith.constant 0 : index
    %c2 = arith.constant 2 : index
    %43 = vector.load %arg7[%c0_21, %c2] : memref<3x290xf32, #tpu.memory_space<vmem>>, vector<3x256xf32>
    %44 = vector.broadcast %24 : vector<1x256xf32> to vector<3x256xf32>
    %45 = arith.mulf %43, %44 : vector<3x256xf32>
    %c2_22 = arith.constant 2 : index
    %c0_23 = arith.constant 0 : index
    %c0_24 = arith.constant 0 : index
    %46 = vector.load %arg2[%c2_22, %c0_23, %c0_24] : memref<9x64x3xf32, #tpu.memory_space<vmem>>, vector<1x64x3xf32>
    %47 = vector.shape_cast %46 : vector<1x64x3xf32> to vector<64x3xf32>
    %cst_25 = arith.constant dense<0.000000e+00> : vector<64x256xf32>
    %48 = tpu.matmul %47, %45, %cst_25 {dimension_numbers = #tpu.dot_dimension_numbers<[1], [0], [0], [1], [0, 0, 1, 1], [], []>} : vector<64x3xf32>, vector<3x256xf32>, vector<64x256xf32> -> vector<64x256xf32>
    %49 = arith.addf %42, %48 : vector<64x256xf32>
    %c0_26 = arith.constant 0 : index
    %c16 = arith.constant 16 : index
    %50 = vector.load %arg7[%c0_26, %c16] : memref<3x290xf32, #tpu.memory_space<vmem>>, vector<3x256xf32>
    %51 = vector.broadcast %20 : vector<1x256xf32> to vector<3x256xf32>
    %52 = arith.mulf %50, %51 : vector<3x256xf32>
    %c3 = arith.constant 3 : index
    %c0_27 = arith.constant 0 : index
    %c0_28 = arith.constant 0 : index
    %53 = vector.load %arg2[%c3, %c0_27, %c0_28] : memref<9x64x3xf32, #tpu.memory_space<vmem>>, vector<1x64x3xf32>
    %54 = vector.shape_cast %53 : vector<1x64x3xf32> to vector<64x3xf32>
    %cst_29 = arith.constant dense<0.000000e+00> : vector<64x256xf32>
    %55 = tpu.matmul %54, %52, %cst_29 {dimension_numbers = #tpu.dot_dimension_numbers<[1], [0], [0], [1], [0, 0, 1, 1], [], []>} : vector<64x3xf32>, vector<3x256xf32>, vector<64x256xf32> -> vector<64x256xf32>
    %56 = arith.addf %49, %55 : vector<64x256xf32>
    %c0_30 = arith.constant 0 : index
    %c17_31 = arith.constant 17 : index
    %57 = vector.load %arg7[%c0_30, %c17_31] : memref<3x290xf32, #tpu.memory_space<vmem>>, vector<3x256xf32>
    %c4 = arith.constant 4 : index
    %c0_32 = arith.constant 0 : index
    %c0_33 = arith.constant 0 : index
    %58 = vector.load %arg2[%c4, %c0_32, %c0_33] : memref<9x64x3xf32, #tpu.memory_space<vmem>>, vector<1x64x3xf32>
    %59 = vector.shape_cast %58 : vector<1x64x3xf32> to vector<64x3xf32>
    %cst_34 = arith.constant dense<0.000000e+00> : vector<64x256xf32>
    %60 = tpu.matmul %59, %57, %cst_34 {dimension_numbers = #tpu.dot_dimension_numbers<[1], [0], [0], [1], [0, 0, 1, 1], [], []>} : vector<64x3xf32>, vector<3x256xf32>, vector<64x256xf32> -> vector<64x256xf32>
    %61 = arith.addf %56, %60 : vector<64x256xf32>
    %c0_35 = arith.constant 0 : index
    %c18 = arith.constant 18 : index
    %62 = vector.load %arg7[%c0_35, %c18] : memref<3x290xf32, #tpu.memory_space<vmem>>, vector<3x256xf32>
    %63 = vector.broadcast %24 : vector<1x256xf32> to vector<3x256xf32>
    %64 = arith.mulf %62, %63 : vector<3x256xf32>
    %c5 = arith.constant 5 : index
    %c0_36 = arith.constant 0 : index
    %c0_37 = arith.constant 0 : index
    %65 = vector.load %arg2[%c5, %c0_36, %c0_37] : memref<9x64x3xf32, #tpu.memory_space<vmem>>, vector<1x64x3xf32>
    %66 = vector.shape_cast %65 : vector<1x64x3xf32> to vector<64x3xf32>
    %cst_38 = arith.constant dense<0.000000e+00> : vector<64x256xf32>
    %67 = tpu.matmul %66, %64, %cst_38 {dimension_numbers = #tpu.dot_dimension_numbers<[1], [0], [0], [1], [0, 0, 1, 1], [], []>} : vector<64x3xf32>, vector<3x256xf32>, vector<64x256xf32> -> vector<64x256xf32>
    %68 = arith.addf %61, %67 : vector<64x256xf32>
    %c0_39 = arith.constant 0 : index
    %c32 = arith.constant 32 : index
    %69 = vector.load %arg7[%c0_39, %c32] : memref<3x290xf32, #tpu.memory_space<vmem>>, vector<3x256xf32>
    %70 = vector.broadcast %20 : vector<1x256xf32> to vector<3x256xf32>
    %71 = arith.mulf %69, %70 : vector<3x256xf32>
    %c6 = arith.constant 6 : index
    %c0_40 = arith.constant 0 : index
    %c0_41 = arith.constant 0 : index
    %72 = vector.load %arg2[%c6, %c0_40, %c0_41] : memref<9x64x3xf32, #tpu.memory_space<vmem>>, vector<1x64x3xf32>
    %73 = vector.shape_cast %72 : vector<1x64x3xf32> to vector<64x3xf32>
    %cst_42 = arith.constant dense<0.000000e+00> : vector<64x256xf32>
    %74 = tpu.matmul %73, %71, %cst_42 {dimension_numbers = #tpu.dot_dimension_numbers<[1], [0], [0], [1], [0, 0, 1, 1], [], []>} : vector<64x3xf32>, vector<3x256xf32>, vector<64x256xf32> -> vector<64x256xf32>
    %75 = arith.addf %68, %74 : vector<64x256xf32>
    %c0_43 = arith.constant 0 : index
    %c33 = arith.constant 33 : index
    %76 = vector.load %arg7[%c0_43, %c33] : memref<3x290xf32, #tpu.memory_space<vmem>>, vector<3x256xf32>
    %c7 = arith.constant 7 : index
    %c0_44 = arith.constant 0 : index
    %c0_45 = arith.constant 0 : index
    %77 = vector.load %arg2[%c7, %c0_44, %c0_45] : memref<9x64x3xf32, #tpu.memory_space<vmem>>, vector<1x64x3xf32>
    %78 = vector.shape_cast %77 : vector<1x64x3xf32> to vector<64x3xf32>
    %cst_46 = arith.constant dense<0.000000e+00> : vector<64x256xf32>
    %79 = tpu.matmul %78, %76, %cst_46 {dimension_numbers = #tpu.dot_dimension_numbers<[1], [0], [0], [1], [0, 0, 1, 1], [], []>} : vector<64x3xf32>, vector<3x256xf32>, vector<64x256xf32> -> vector<64x256xf32>
    %80 = arith.addf %75, %79 : vector<64x256xf32>
    %c0_47 = arith.constant 0 : index
    %c34 = arith.constant 34 : index
    %81 = vector.load %arg7[%c0_47, %c34] : memref<3x290xf32, #tpu.memory_space<vmem>>, vector<3x256xf32>
    %82 = vector.broadcast %24 : vector<1x256xf32> to vector<3x256xf32>
    %83 = arith.mulf %81, %82 : vector<3x256xf32>
    %c8 = arith.constant 8 : index
    %c0_48 = arith.constant 0 : index
    %c0_49 = arith.constant 0 : index
    %84 = vector.load %arg2[%c8, %c0_48, %c0_49] : memref<9x64x3xf32, #tpu.memory_space<vmem>>, vector<1x64x3xf32>
    %85 = vector.shape_cast %84 : vector<1x64x3xf32> to vector<64x3xf32>
    %cst_50 = arith.constant dense<0.000000e+00> : vector<64x256xf32>
    %86 = tpu.matmul %85, %83, %cst_50 {dimension_numbers = #tpu.dot_dimension_numbers<[1], [0], [0], [1], [0, 0, 1, 1], [], []>} : vector<64x3xf32>, vector<3x256xf32>, vector<64x256xf32> -> vector<64x256xf32>
    %87 = arith.addf %80, %86 : vector<64x256xf32>
    %c0_51 = arith.constant 0 : index
    %c0_52 = arith.constant 0 : index
    %88 = vector.load %arg3[%c0_51, %c0_52] : memref<64x1xf32, #tpu.memory_space<vmem>>, vector<64x1xf32>
    %89 = vector.broadcast %88 : vector<64x1xf32> to vector<64x256xf32>
    %90 = arith.addf %87, %89 : vector<64x256xf32>
    %cst_53 = arith.constant 0.000000e+00 : f32
    %91 = vector.broadcast %cst_53 : f32 to vector<64x256xf32>
    %92 = arith.maximumf %90, %91 : vector<64x256xf32>
    %cst_54 = arith.constant 0.000000e+00 : f32
    %93 = vector.broadcast %cst_54 : f32 to vector<64x290xf32>
    %c0_55 = arith.constant 0 : index
    %c0_56 = arith.constant 0 : index
    %94 = vector.load %arg8[%c0_55, %c0_56] : memref<64x290xf32, #tpu.memory_space<vmem>>, vector<64x290xf32>
    tpu.vector_store %arg8[%c0_55, %c0_56], %93 {strides = array<i32>} : memref<64x290xf32, #tpu.memory_space<vmem>>, vector<64x290xf32>,
    %c0_57 = arith.constant 0 : index
    %c17_58 = arith.constant 17 : index
    %95 = vector.load %arg8[%c0_57, %c17_58] : memref<64x290xf32, #tpu.memory_space<vmem>>, vector<64x256xf32>
    tpu.vector_store %arg8[%c0_57, %c17_58], %92 {strides = array<i32>} : memref<64x290xf32, #tpu.memory_space<vmem>>, vector<64x256xf32>,
    %cst_59 = arith.constant 0.000000e+00 : f32
    %96 = vector.broadcast %cst_59 : f32 to vector<3x256xf32>
    %c0_60 = arith.constant 0 : index
    %c0_61 = arith.constant 0 : index
    %97 = vector.load %arg8[%c0_60, %c0_61] : memref<64x290xf32, #tpu.memory_space<vmem>>, vector<64x256xf32>
    %98 = vector.broadcast %20 : vector<1x256xf32> to vector<64x256xf32>
    %99 = arith.mulf %97, %98 : vector<64x256xf32>
    %c0_62 = arith.constant 0 : index
    %c0_63 = arith.constant 0 : index
    %c0_64 = arith.constant 0 : index
    %100 = vector.load %arg4[%c0_62, %c0_63, %c0_64] : memref<9x3x64xf32, #tpu.memory_space<vmem>>, vector<1x3x64xf32>
    %101 = vector.shape_cast %100 : vector<1x3x64xf32> to vector<3x64xf32>
    %cst_65 = arith.constant dense<0.000000e+00> : vector<3x256xf32>
    %102 = tpu.matmul %101, %99, %cst_65 {dimension_numbers = #tpu.dot_dimension_numbers<[1], [0], [0], [1], [0, 0, 1, 1], [], []>} : vector<3x64xf32>, vector<64x256xf32>, vector<3x256xf32> -> vector<3x256xf32>
    %103 = arith.addf %96, %102 : vector<3x256xf32>
    %c0_66 = arith.constant 0 : index
    %c1_67 = arith.constant 1 : index
    %104 = vector.load %arg8[%c0_66, %c1_67] : memref<64x290xf32, #tpu.memory_space<vmem>>, vector<64x256xf32>
    %c1_68 = arith.constant 1 : index
    %c0_69 = arith.constant 0 : index
    %c0_70 = arith.constant 0 : index
    %105 = vector.load %arg4[%c1_68, %c0_69, %c0_70] : memref<9x3x64xf32, #tpu.memory_space<vmem>>, vector<1x3x64xf32>
    %106 = vector.shape_cast %105 : vector<1x3x64xf32> to vector<3x64xf32>
    %cst_71 = arith.constant dense<0.000000e+00> : vector<3x256xf32>
    %107 = tpu.matmul %106, %104, %cst_71 {dimension_numbers = #tpu.dot_dimension_numbers<[1], [0], [0], [1], [0, 0, 1, 1], [], []>} : vector<3x64xf32>, vector<64x256xf32>, vector<3x256xf32> -> vector<3x256xf32>
    %108 = arith.addf %103, %107 : vector<3x256xf32>
    %c0_72 = arith.constant 0 : index
    %c2_73 = arith.constant 2 : index
    %109 = vector.load %arg8[%c0_72, %c2_73] : memref<64x290xf32, #tpu.memory_space<vmem>>, vector<64x256xf32>
    %110 = vector.broadcast %24 : vector<1x256xf32> to vector<64x256xf32>
    %111 = arith.mulf %109, %110 : vector<64x256xf32>
    %c2_74 = arith.constant 2 : index
    %c0_75 = arith.constant 0 : index
    %c0_76 = arith.constant 0 : index
    %112 = vector.load %arg4[%c2_74, %c0_75, %c0_76] : memref<9x3x64xf32, #tpu.memory_space<vmem>>, vector<1x3x64xf32>
    %113 = vector.shape_cast %112 : vector<1x3x64xf32> to vector<3x64xf32>
    %cst_77 = arith.constant dense<0.000000e+00> : vector<3x256xf32>
    %114 = tpu.matmul %113, %111, %cst_77 {dimension_numbers = #tpu.dot_dimension_numbers<[1], [0], [0], [1], [0, 0, 1, 1], [], []>} : vector<3x64xf32>, vector<64x256xf32>, vector<3x256xf32> -> vector<3x256xf32>
    %115 = arith.addf %108, %114 : vector<3x256xf32>
    %c0_78 = arith.constant 0 : index
    %c16_79 = arith.constant 16 : index
    %116 = vector.load %arg8[%c0_78, %c16_79] : memref<64x290xf32, #tpu.memory_space<vmem>>, vector<64x256xf32>
    %117 = vector.broadcast %20 : vector<1x256xf32> to vector<64x256xf32>
    %118 = arith.mulf %116, %117 : vector<64x256xf32>
    %c3_80 = arith.constant 3 : index
    %c0_81 = arith.constant 0 : index
    %c0_82 = arith.constant 0 : index
    %119 = vector.load %arg4[%c3_80, %c0_81, %c0_82] : memref<9x3x64xf32, #tpu.memory_space<vmem>>, vector<1x3x64xf32>
    %120 = vector.shape_cast %119 : vector<1x3x64xf32> to vector<3x64xf32>
    %cst_83 = arith.constant dense<0.000000e+00> : vector<3x256xf32>
    %121 = tpu.matmul %120, %118, %cst_83 {dimension_numbers = #tpu.dot_dimension_numbers<[1], [0], [0], [1], [0, 0, 1, 1], [], []>} : vector<3x64xf32>, vector<64x256xf32>, vector<3x256xf32> -> vector<3x256xf32>
    %122 = arith.addf %115, %121 : vector<3x256xf32>
    %c0_84 = arith.constant 0 : index
    %c17_85 = arith.constant 17 : index
    %123 = vector.load %arg8[%c0_84, %c17_85] : memref<64x290xf32, #tpu.memory_space<vmem>>, vector<64x256xf32>
    %c4_86 = arith.constant 4 : index
    %c0_87 = arith.constant 0 : index
    %c0_88 = arith.constant 0 : index
    %124 = vector.load %arg4[%c4_86, %c0_87, %c0_88] : memref<9x3x64xf32, #tpu.memory_space<vmem>>, vector<1x3x64xf32>
    %125 = vector.shape_cast %124 : vector<1x3x64xf32> to vector<3x64xf32>
    %cst_89 = arith.constant dense<0.000000e+00> : vector<3x256xf32>
    %126 = tpu.matmul %125, %123, %cst_89 {dimension_numbers = #tpu.dot_dimension_numbers<[1], [0], [0], [1], [0, 0, 1, 1], [], []>} : vector<3x64xf32>, vector<64x256xf32>, vector<3x256xf32> -> vector<3x256xf32>
    %127 = arith.addf %122, %126 : vector<3x256xf32>
    %c0_90 = arith.constant 0 : index
    %c18_91 = arith.constant 18 : index
    %128 = vector.load %arg8[%c0_90, %c18_91] : memref<64x290xf32, #tpu.memory_space<vmem>>, vector<64x256xf32>
    %129 = vector.broadcast %24 : vector<1x256xf32> to vector<64x256xf32>
    %130 = arith.mulf %128, %129 : vector<64x256xf32>
    %c5_92 = arith.constant 5 : index
    %c0_93 = arith.constant 0 : index
    %c0_94 = arith.constant 0 : index
    %131 = vector.load %arg4[%c5_92, %c0_93, %c0_94] : memref<9x3x64xf32, #tpu.memory_space<vmem>>, vector<1x3x64xf32>
    %132 = vector.shape_cast %131 : vector<1x3x64xf32> to vector<3x64xf32>
    %cst_95 = arith.constant dense<0.000000e+00> : vector<3x256xf32>
    %133 = tpu.matmul %132, %130, %cst_95 {dimension_numbers = #tpu.dot_dimension_numbers<[1], [0], [0], [1], [0, 0, 1, 1], [], []>} : vector<3x64xf32>, vector<64x256xf32>, vector<3x256xf32> -> vector<3x256xf32>
    %134 = arith.addf %127, %133 : vector<3x256xf32>
    %c0_96 = arith.constant 0 : index
    %c32_97 = arith.constant 32 : index
    %135 = vector.load %arg8[%c0_96, %c32_97] : memref<64x290xf32, #tpu.memory_space<vmem>>, vector<64x256xf32>
    %136 = vector.broadcast %20 : vector<1x256xf32> to vector<64x256xf32>
    %137 = arith.mulf %135, %136 : vector<64x256xf32>
    %c6_98 = arith.constant 6 : index
    %c0_99 = arith.constant 0 : index
    %c0_100 = arith.constant 0 : index
    %138 = vector.load %arg4[%c6_98, %c0_99, %c0_100] : memref<9x3x64xf32, #tpu.memory_space<vmem>>, vector<1x3x64xf32>
    %139 = vector.shape_cast %138 : vector<1x3x64xf32> to vector<3x64xf32>
    %cst_101 = arith.constant dense<0.000000e+00> : vector<3x256xf32>
    %140 = tpu.matmul %139, %137, %cst_101 {dimension_numbers = #tpu.dot_dimension_numbers<[1], [0], [0], [1], [0, 0, 1, 1], [], []>} : vector<3x64xf32>, vector<64x256xf32>, vector<3x256xf32> -> vector<3x256xf32>
    %141 = arith.addf %134, %140 : vector<3x256xf32>
    %c0_102 = arith.constant 0 : index
    %c33_103 = arith.constant 33 : index
    %142 = vector.load %arg8[%c0_102, %c33_103] : memref<64x290xf32, #tpu.memory_space<vmem>>, vector<64x256xf32>
    %c7_104 = arith.constant 7 : index
    %c0_105 = arith.constant 0 : index
    %c0_106 = arith.constant 0 : index
    %143 = vector.load %arg4[%c7_104, %c0_105, %c0_106] : memref<9x3x64xf32, #tpu.memory_space<vmem>>, vector<1x3x64xf32>
    %144 = vector.shape_cast %143 : vector<1x3x64xf32> to vector<3x64xf32>
    %cst_107 = arith.constant dense<0.000000e+00> : vector<3x256xf32>
    %145 = tpu.matmul %144, %142, %cst_107 {dimension_numbers = #tpu.dot_dimension_numbers<[1], [0], [0], [1], [0, 0, 1, 1], [], []>} : vector<3x64xf32>, vector<64x256xf32>, vector<3x256xf32> -> vector<3x256xf32>
    %146 = arith.addf %141, %145 : vector<3x256xf32>
    %c0_108 = arith.constant 0 : index
    %c34_109 = arith.constant 34 : index
    %147 = vector.load %arg8[%c0_108, %c34_109] : memref<64x290xf32, #tpu.memory_space<vmem>>, vector<64x256xf32>
    %148 = vector.broadcast %24 : vector<1x256xf32> to vector<64x256xf32>
    %149 = arith.mulf %147, %148 : vector<64x256xf32>
    %c8_110 = arith.constant 8 : index
    %c0_111 = arith.constant 0 : index
    %c0_112 = arith.constant 0 : index
    %150 = vector.load %arg4[%c8_110, %c0_111, %c0_112] : memref<9x3x64xf32, #tpu.memory_space<vmem>>, vector<1x3x64xf32>
    %151 = vector.shape_cast %150 : vector<1x3x64xf32> to vector<3x64xf32>
    %cst_113 = arith.constant dense<0.000000e+00> : vector<3x256xf32>
    %152 = tpu.matmul %151, %149, %cst_113 {dimension_numbers = #tpu.dot_dimension_numbers<[1], [0], [0], [1], [0, 0, 1, 1], [], []>} : vector<3x64xf32>, vector<64x256xf32>, vector<3x256xf32> -> vector<3x256xf32>
    %153 = arith.addf %146, %152 : vector<3x256xf32>
    %c0_114 = arith.constant 0 : index
    %c0_115 = arith.constant 0 : index
    %154 = vector.load %arg5[%c0_114, %c0_115] : memref<3x1xf32, #tpu.memory_space<vmem>>, vector<3x1xf32>
    %155 = vector.broadcast %154 : vector<3x1xf32> to vector<3x256xf32>
    %156 = arith.addf %153, %155 : vector<3x256xf32>
    %c0_116 = arith.constant 0 : index
    %c0_117 = arith.constant 0 : index
    %c0_118 = arith.constant 0 : index
    %157 = vector.load %arg6[%c0_116, %c0_117, %c0_118] : memref<1x3x256xf32, #tpu.memory_space<vmem>>, vector<1x3x256xf32>
    %158 = vector.shape_cast %157 : vector<1x3x256xf32> to vector<3x256xf32>
    %159 = vector.shape_cast %156 : vector<3x256xf32> to vector<1x3x256xf32>
    tpu.vector_store %arg6[%c0_116, %c0_117, %c0_118], %159 {strides = array<i32>} : memref<1x3x256xf32, #tpu.memory_space<vmem>>, vector<1x3x256xf32>,
    return
  }
  func.func @transform_0(%arg0: i32) -> (i32, i32, i32) {
    %c0_i32 = arith.constant 0 : i32
    %c0_i32_0 = arith.constant 0 : i32
    %c0_i32_1 = arith.constant 0 : i32
    return %arg0, %c0_i32, %c0_i32_0 : i32, i32, i32
  }
  func.func @transform_1(%arg0: i32) -> (i32, i32, i32) {
    %c0_i32 = arith.constant 0 : i32
    %c0_i32_0 = arith.constant 0 : i32
    %c0_i32_1 = arith.constant 0 : i32
    %c0_i32_2 = arith.constant 0 : i32
    return %c0_i32, %c0_i32_0, %c0_i32_1 : i32, i32, i32
  }
  func.func @transform_2(%arg0: i32) -> (i32, i32) {
    %c0_i32 = arith.constant 0 : i32
    %c0_i32_0 = arith.constant 0 : i32
    %c0_i32_1 = arith.constant 0 : i32
    return %c0_i32, %c0_i32_0 : i32, i32
  }
  func.func @transform_3(%arg0: i32) -> (i32, i32, i32) {
    %c0_i32 = arith.constant 0 : i32
    %c0_i32_0 = arith.constant 0 : i32
    %c0_i32_1 = arith.constant 0 : i32
    %c0_i32_2 = arith.constant 0 : i32
    return %c0_i32, %c0_i32_0, %c0_i32_1 : i32, i32, i32
  }
  func.func @transform_4(%arg0: i32) -> (i32, i32) {
    %c0_i32 = arith.constant 0 : i32
    %c0_i32_0 = arith.constant 0 : i32
    %c0_i32_1 = arith.constant 0 : i32
    return %c0_i32, %c0_i32_0 : i32, i32
  }
  func.func @transform_5(%arg0: i32) -> (i32, i32, i32) {
    %c0_i32 = arith.constant 0 : i32
    %c0_i32_0 = arith.constant 0 : i32
    %c0_i32_1 = arith.constant 0 : i32
    return %arg0, %c0_i32, %c0_i32_0 : i32, i32, i32
  }
}

</mosaic_0001>

<bundles_post_ra>
// kernel: ppem_forward_impl.1
= control target key start
LH: loop header
LB: loop body
LE: loop exit
PB: predicated region body
PF: predicated region fallthrough
CT: control target
= control target key end

     0   :  { %s4181_s18 = smov 0   ;;  %s6371_s0 = inlined_call_operand.vmem [shape: f32[2,3,256], index: 0, kind: input, shape index: {}]   ;;  %s6372_s1 = inlined_call_operand.vmem [shape: f32[9,64,3], index: 1, kind: input, shape index: {}]   ;;  %s6373_s2 = inlined_call_operand.vmem [shape: f32[64,1], index: 2, kind: input, shape index: {}]   ;;  %s6374_s3 = inlined_call_operand.vmem [shape: f32[9,3,64], index: 3, kind: input, shape index: {}]   ;;  %s6375_s4 = inlined_call_operand.vmem [shape: f32[3,1], index: 4, kind: input, shape index: {}]   ;;  %s6376_s5 = inlined_call_operand.vmem [shape: f32[2,3,256], index: 5, kind: output, shape index: {}]  }
   0x1 LB: > { %s3871_s19 = sadd.s32 4294967295, %s4133_s18   ;;  %p3875_p0 = scmp.ge.s32.totalorder %s4133_s18, 1  ;;  %s4133_s18 = sphi %s4181_s18, %s15_s18  }
   0x2   : > { %p187_p1 = scmp.lt.s32.totalorder %s4133_s18, 3 }
   0x4   : > { %p188_p2 = pnand %p3875_p0, %p187_p1 }
   0x6   : > { %191 = sbr.rel (%p188_p2) target bundleno = 1462 (0x5b6), region = 40 }
   0xb   : > { %p4189_p3 = scmp.lt.s32.totalorder %s3871_s19, 1  ;;  %v225_v0 = vlaneseq  ;;  %vm265_vm0 = vcmask 272384   ;;  %v6377_v1 = vmov 0.0   ;;  %s4136_s25 = smov 17   ;;  %vm276_vm5 = vcmask 1042568   ;;  %v3884_v49 = vld [vmem:[%s6372_s1 + $0x40] sm:$0xff] }
   0xc   : > { %264 = vst [vmem:[#allocation2] sm:$0x77] %v6377_v1  ;;  %1992 = vst [vmem:[#allocation3] sm:$0xff] %v6377_v1  ;;  %412 = vmatprep.mubr.f32.mxu0 %v6377_v1  ;;  %448 = vmatprep.mubr.f32.mxu1 %v6377_v1  ;;  %s4137_s26 = smov 16   ;;  %s4138_s27 = smov 2   ;;  %vm277_vm6 = vcmask 1046532  }
   0xd   : > { %1995 = vst [vmem:[#allocation3 + $0x18] sm:$0xff] %v6377_v1  ;;  %1998 = vst [vmem:[#allocation3 + $0x30] sm:$0xff] %v6377_v1  ;;  %s6652_s19 = smov (!%p4189_p3, %s3871_s19), 1  ;;  %v226_v2 = vand.u32 127, %v225_v0  ;;  %vm272_vm7 = vcmask 138240   ;;  %vm280_vm8 = vcmask 133120  }
   0xe   : > { %2001 = vst [vmem:[#allocation3 + $0x48] sm:$0xff] %v6377_v1  ;;  %2004 = vst [vmem:[#allocation3 + $0x60] sm:$0xff] %v6377_v1  ;;  %s4057_s21 = sshll.u32 %s6652_s19, 3  ;;  %vm612_vm10 = vcmask 15360   ;;  %s4139_s28 = smov 127   ;;  %vm1728_vm11 = vcmask 277504  }
   0xf   : > { %2007 = vst [vmem:[#allocation3 + $0x78] sm:$0xff] %v6377_v1  ;;  %2010 = vst [vmem:[#allocation3 + $0x90] sm:$0xff] %v6377_v1  ;;  %v227_v3 = vadd.s32 128, %v226_v2  ;;  %v232_v4 = vand.u32 15, %v226_v2  ;;  %s219_s24 = scalar_lea.vmem %s6371_s0, %s4057_s21  ;;  %s4140_s29 = smov 18   ;;  %vm801_vm12 = vcmask 130048  }
  0x10   : > { %2013 = vst [vmem:[#allocation3 + $0xa8] sm:$0xff] %v6377_v1  ;;  %266 = vst.msk [vmem:[#allocation2 + $0x8] sm:$0x7] %vm265_vm0, %v6377_v1  ;;  %v267_v5 = vld [vmem:[%s219_s24] sm:$0x77]  ;;  %s4141_s30 = smov 126  }
  0x11   : > { %v239_v6 = vand.u32 15, %v227_v3  ;;  %vm252_vm1 = vcmp.ne.s32.totalorder %v232_v4, 0  ;;  %vm258_vm2 = vcmp.ne.s32.totalorder %v232_v4, 15  ;;  %269 = vrot.lane.b32.xlu0 %v267_v5, %s4136_s25  ;;  %vm278_vm9 = vmor %vm277_vm6, %vm276_vm5  ;;  %1994 = vst.msk [vmem:[#allocation3 + $0x10] sm:$0xff] %vm1728_vm11, %v6377_v1  ;;  %s4142_s6 = smov 32   ;;  %s4143_s7 = smov 112  }
  0x12   : > { %v4217_v7 = vsel %vm252_vm1, 1.0, %v6377_v1  ;;  %v4220_v8 = vsel %vm258_vm2, 1.0, %v6377_v1  ;;  %1997 = vst.msk [vmem:[#allocation3 + $0x28] sm:$0xff] %vm1728_vm11, %v6377_v1  ;;  %2000 = vst.msk [vmem:[#allocation3 + $0x40] sm:$0xff] %vm1728_vm11, %v6377_v1  ;;  %v4144_v35 = vmov 0   ;;  %s4145_s8 = smov 34  }
  0x13   : > { %6416 = vst [vmem:[#allocation4_spill] sm:$0xff] %v4217_v7  ;;  %vm253_vm3 = vcmp.ne.s32.totalorder %v239_v6, 0  ;;  %vm259_vm4 = vcmp.ne.s32.totalorder %v239_v6, 15  ;;  %2003 = vst.msk [vmem:[#allocation3 + $0x58] sm:$0xff] %vm1728_vm11, %v6377_v1  ;;  %4085 = vset.pattern.permute.xlu0 %v4144_v35  ;;  %4086 = vset.pattern.permute.xlu1 %v4144_v35  ;;  %s4146_s9 = smov 111   ;;  %vm315_vm13 = vcmask 1039360  }
  0x14   : > { %v4223_v9 = vsel %vm253_vm3, 1.0, %v6377_v1  ;;  %v4226_v10 = vsel %vm259_vm4, 1.0, %v6377_v1  ;;  %2006 = vst.msk [vmem:[#allocation3 + $0x70] sm:$0xff] %vm1728_vm11, %v6377_v1  ;;  %2009 = vst.msk [vmem:[#allocation3 + $0x88] sm:$0xff] %vm1728_vm11, %v6377_v1  ;;  %vm343_vm14 = vcmask 1042432   ;;  %vm1170_vm15 = vcmask 146432  }
  0x15   : > { %6417 = vst [vmem:[#allocation5_spill] sm:$0xff] %v4223_v9  ;;  %v4230_v11 = vcombine.low %v4217_v7, %v4223_v9  ;;  %v608_v12 = vcombine.low %v4220_v8, %v4226_v10  ;;  %2012 = vst.msk [vmem:[#allocation3 + $0xa0] sm:$0xff] %vm1728_vm11, %v6377_v1  ;;  %vm318_vm0 = vcmask 23552   ;;  %v3890_v55 = vld [vmem:[%s6372_s1 + $0x70] sm:$0xff]  ;;  %s4147_s14 = smov 110   ;;  %vm1359_vm1 = vcmask 261120  }
  0x16   : > { %2015 = vst.msk [vmem:[#allocation3 + $0xb8] sm:$0xff] %vm1728_vm11, %v6377_v1  ;;  %v3885_v57 = vld [vmem:[%s6372_s1 + $0x48] sm:$0xff]  ;;  %v3891_v61 = vld [vmem:[%s6372_s1 + $0x78] sm:$0xff]  ;;  %vm636_vm2 = vcmask 1031168   ;;  %v3886_v3 = vld [vmem:[%s6372_s1 + $0x50] sm:$0xff]  ;;  %s4148_s11 = smov 96  }
  0x17   : > { %798 = vrot.lane.b32.xlu1 %v4230_v11, %s4137_s26  ;;  %609 = vrot.lane.b32.xlu0 %v608_v12, %s4138_s27  ;;  %vm1005_vm3 = vcmask 908288   ;;  %s4149_s17 = smov 95   ;;  %vm825_vm4 = vcmask 916480   ;;  %s4150_s16 = smov 94   ;;  %vm1194_vm5 = vcmask 900096   ;;  %vm1383_vm6 = vcmask 785408  }
  0x83   : > { %v270_v13 = vpop.permute.xlu0 %269 }
  0x84   : > { %v271_v14 = vrot.slane %v270_v13, 4 }
  0x86   : > { %v273_v15 = vsel %vm272_vm7, %v271_v14, %v270_v13  ;;  %281 = vst.msk [vmem:[#allocation2 + $0x8] sm:$0x7] %vm280_vm8, %v271_v14  ;;  %vm1563_vm8 = vcmask 777216  }
  0x87   : > { %279 = vst.msk [vmem:[#allocation2] sm:$0x77] %vm278_vm9, %v273_v15  ;;  %v288_v15 = vld [vmem:[%s6372_s1] sm:$0xff]  ;;  %vm1752_vm9 = vcmask 769024  }
  0x89   : > { %v610_v16 = vpop.permute.xlu0 %609  ;;  %v799_v25 = vpop.permute.xlu1 %798 }
  0x8a   : > { %v611_v17 = vrot.slane %v610_v16, 4  ;;  %v800_v26 = vrot.slane %v799_v25, 4 }
  0x8c   : > { %v613_v18 = vsel %vm612_vm10, %v611_v17, %v610_v16  ;;  %v802_v30 = vsel %vm801_vm12, %v800_v26, %v799_v25 }
  0x8d   : > { %v296_v19 = vld [vmem:[#allocation2 + $0x8] sm:$0x7] }
  0x8e   : > { %v604_v20 = vld [vmem:[#allocation2] sm:$0x77]  ;;  %313 = vrot.lane.b32.xlu0 %v296_v19, %s4139_s28  ;;  %v605_v27 = vld [vmem:[#allocation2 + $0x8] sm:$0x7] }
  0x8f   : > { %v282_v21 = vld [vmem:[#allocation2] sm:$0x77]  ;;  %v616_v23 = vmul.f32 %v613_v18, %v604_v20  ;;  %v797_v28 = vld [vmem:[#allocation2 + $0x8] sm:$0x7]  ;;  %v617_v29 = vmul.f32 %v611_v17, %v605_v27  ;;  %v3887_v17 = vld [vmem:[%s6372_s1 + $0x58] sm:$0xff] }
  0x90   : > { %v308_v22 = vcombine.high %v282_v21, %v282_v21  ;;  %v806_v31 = vmul.f32 %v800_v26, %v797_v28  ;;  %v796_v32 = vld [vmem:[#allocation2] sm:$0x77]  ;;  %v986_v37 = vld [vmem:[#allocation2 + $0x8] sm:$0x7]  ;;  %v287_v43 = vmul.f32 %v4230_v11, %v282_v21  ;;  %v290_v26 = vld [vmem:[%s6372_s1 + $0x10] sm:$0xff] }
  0x91   : > { %v629_v24 = vcombine.high %v616_v23, %v616_v23  ;;  %v805_v33 = vmul.f32 %v802_v30, %v796_v32  ;;  %v985_v34 = vld [vmem:[#allocation2] sm:$0x77]  ;;  %v1166_v45 = vld [vmem:[#allocation2 + $0x8] sm:$0x7] }
  0x92   : > { %311 = vrot.lane.b32.xlu1 %v308_v22, %s4139_s28  ;;  %1167 = vrot.lane.b32.xlu0 %v608_v12, %s4140_s29  ;;  %v998_v36 = vcombine.high %v985_v34, %v985_v34  ;;  %v1165_v50 = vld [vmem:[#allocation2] sm:$0x77]  ;;  %v462_v54 = vcombine.high %v287_v43, %v287_v43  ;;  %v1355_v6 = vld [vmem:[#allocation2 + $0x8] sm:$0x7] }
  0x93   : > { %v818_v38 = vcombine.high %v805_v33, %v805_v33  ;;  %v1354_v62 = vld [vmem:[#allocation2] sm:$0x77]  ;;  %v289_v20 = vld [vmem:[%s6372_s1 + $0x8] sm:$0xff] }
  0x94   : > { %v1543_v14 = vld [vmem:[#allocation2] sm:$0x77]  ;;  %v3889_v30 = vld [vmem:[%s6372_s1 + $0x68] sm:$0xff] }
  0x95   : > { %v1556_v19 = vcombine.high %v1543_v14, %v1543_v14  ;;  %v1723_v35 = vld [vmem:[#allocation2] sm:$0x77] }
  0x96   : > { %309 = vrot.lane.b32.xlu1 %v282_v21, %s4139_s28  ;;  %632 = vrot.lane.b32.xlu0 %v629_v24, %s4141_s30 }
  0x9a   : > { %1356 = vrot.lane.b32.xlu1 %v4230_v11, %s4142_s6  ;;  %630 = vrot.lane.b32.xlu0 %v616_v23, %s4141_s30  ;;  %v3888_v23 = vld [vmem:[%s6372_s1 + $0x60] sm:$0xff] }
  0x9e   : > { %634 = vrot.lane.b32.xlu1 %v617_v29, %s4141_s30  ;;  %823 = vrot.lane.b32.xlu0 %v806_v31, %s4143_s7  ;;  %v1544_v29 = vld [vmem:[#allocation2 + $0x8] sm:$0x7] }
  0xa2   : > { %819 = vrot.lane.b32.xlu1 %v805_v33, %s4143_s7  ;;  %1725 = vrot.lane.b32.xlu0 %v608_v12, %s4145_s8  ;;  %v1724_v33 = vld [vmem:[#allocation2 + $0x8] sm:$0x7] }
  0xa6   : > { %1001 = vrot.lane.b32.xlu1 %v998_v36, %s4146_s9  ;;  %1003 = vrot.lane.b32.xlu0 %v986_v37, %s4146_s9  ;;  %v291_v37 = vld [vmem:[%s6372_s1 + $0x18] sm:$0xff] }
  0xaa   : > { %821 = vrot.lane.b32.xlu1 %v818_v38, %s4143_s7 }
  0xae   : > { %999 = vrot.lane.b32.xlu1 %v985_v34, %s4146_s9 }
 0x100   : > { %v314_v39 = vpop.permute.xlu0 %313 }
 0x104   : > { %v312_v40 = vpop.permute.xlu1 %311  ;;  %v1168_v41 = vpop.permute.xlu0 %1167 }
 0x105   : > { %v317_v42 = vsel %vm315_vm13, %v312_v40, %v314_v39  ;;  %v1169_v44 = vrot.slane %v1168_v41, 4  ;;  %v3912_v39 = vld [vmem:[%s6372_s1 + $0x80] sm:$0xff] }
 0x106   : > { %3892 = vmatprep.subr.msk.mxu0 %vm343_vm14, %v317_v42  ;;  %4059 = vmatprep.subr.msk.mxu1 %vm343_vm14, %v317_v42  ;;  %v292_v42 = vld [vmem:[%s6372_s1 + $0x20] sm:$0xff] }
 0x107   : > { %v1171_v46 = vsel %vm1170_vm15, %v1169_v44, %v1168_v41  ;;  %v1175_v48 = vmul.f32 %v1169_v44, %v1166_v45  ;;  %v1918_v41 = vld [vmem:[%s6373_s2 + $0x30] sm:$0xff]  ;;  %v293_v45 = vld [vmem:[%s6372_s1 + $0x28] sm:$0xff] }
 0x108   : > { %v310_v47 = vpop.permute.xlu1 %309  ;;  %v633_v51 = vpop.permute.xlu0 %632  ;;  %v1174_v53 = vmul.f32 %v1171_v46, %v1165_v50  ;;  %v3914_v46 = vld [vmem:[%s6372_s1 + $0x90] sm:$0xff]  ;;  %v1915_v50 = vld [vmem:[%s6373_s2 + $0x18] sm:$0xff] }
 0x109   : > { %v316_v52 = vsel %vm315_vm13, %v310_v47, %v312_v40  ;;  %1192 = vrot.lane.b32.xlu1 %v1175_v48, %s4147_s14  ;;  %v1917_v47 = vld [vmem:[%s6373_s2 + $0x28] sm:$0xff]  ;;  %v294_v48 = vld [vmem:[%s6372_s1 + $0x30] sm:$0xff] }
 0x10a   : > { %3893 = vmatpush1.msk.msra.mxu0 %vm343_vm14, %v316_v52  ;;  %4060 = vmatpush1.msk.msra.mxu1 %vm343_vm14, %v316_v52  ;;  %v1187_v60 = vcombine.high %v1174_v53, %v1174_v53  ;;  %v3916_v52 = vld [vmem:[%s6372_s1 + $0xa0] sm:$0xff] }
 0x10b   : > { %3894 = vmatmul.mubr.msk.f32.vlgmr.msra.gmra.mxu0 %vm318_vm0, %v3884_v49  ;;  %3902 = vmatprep.subr.msk.mxu1 %vm343_vm14, %v462_v54  ;;  %v3915_v49 = vld [vmem:[%s6372_s1 + $0x98] sm:$0xff]  ;;  %v3930_v54 = vld [vmem:[%s6372_s1 + $0xc0] sm:$0xff] }
 0x10c   : > { %1188 = vrot.lane.b32.xlu0 %v1174_v53, %s4147_s14  ;;  %v1357_v56 = vpop.permute.xlu1 %1356  ;;  %3900 = vmatmul.mubr.msk.f32.vlgmr.msra.gmra.mxu1 %vm318_vm0, %v3890_v55  ;;  %v631_v59 = vpop.permute.xlu0 %630  ;;  %v1913_v53 = vld [vmem:[%s6373_s2 + $0x8] sm:$0xff] }
 0x10d   : > { %v1358_v58 = vrot.slane %v1357_v56, 4  ;;  %418 = vmatprep.mubr.f32.mxu0 %v6377_v1  ;;  %3903 = vmatpush1.msk.msra.mxu1 %vm343_vm14, %v287_v43  ;;  %v637_v13 = vsel %vm636_vm2, %v631_v59, %v633_v51  ;;  %v3913_v43 = vld [vmem:[%s6372_s1 + $0x88] sm:$0xff]  ;;  %v3919_v59 = vld [vmem:[%s6372_s1 + $0xb8] sm:$0xff] }
 0x10e   : > { %454 = vmatprep.mubr.f32.mxu1 %v6377_v1  ;;  %v3917_v55 = vld [vmem:[%s6372_s1 + $0xa8] sm:$0xff] }
 0x10f   : > { %v1360_v63 = vsel %vm1359_vm1, %v1358_v58, %v1357_v56  ;;  %3895 = vmatmul.mubr.msk.f32.gmra.mxu0 %vm318_vm0, %v3885_v57  ;;  %v1364_v11 = vmul.f32 %v1358_v58, %v1355_v6  ;;  %v3931_v56 = vld [vmem:[%s6372_s1 + $0xc8] sm:$0xff]  ;;  %v3918_v57 = vld [vmem:[%s6372_s1 + $0xb0] sm:$0xff]  ;;  %v3952_v6 = vld [vmem:[%s6372_s1 + $0x120] sm:$0xff] }
 0x110   : > { %v1363_v0 = vmul.f32 %v1360_v63, %v1354_v62  ;;  %1190 = vrot.lane.b32.xlu0 %v1187_v60, %s4147_s14  ;;  %v635_v2 = vpop.permute.xlu1 %634  ;;  %424 = vmatprep.mubr.f32.mxu0 %v6377_v1  ;;  %v824_v5 = vpop.permute.xlu0 %823  ;;  %v3932_v58 = vld [vmem:[%s6372_s1 + $0xd0] sm:$0xff]  ;;  %v3933_v60 = vld [vmem:[%s6372_s1 + $0xd8] sm:$0xff]  ;;  %v3934_v62 = vld [vmem:[%s6372_s1 + $0xe0] sm:$0xff] }
 0x111   : > { %v638_v4 = vsel %vm636_vm2, %v633_v51, %v635_v2  ;;  %3901 = vmatmul.mubr.msk.f32.gmra.mxu1 %vm318_vm0, %v3891_v61  ;;  %v295_v51 = vld [vmem:[%s6372_s1 + $0x38] sm:$0xff]  ;;  %v3948_v61 = vld [vmem:[%s6372_s1 + $0x100] sm:$0xff]  ;;  %v3949_v63 = vld [vmem:[%s6372_s1 + $0x108] sm:$0xff] }
 0x112   : > { %3920 = vmatprep.subr.msk.mxu0 %vm343_vm14, %v638_v4  ;;  %v1376_v12 = vcombine.high %v1363_v0, %v1363_v0  ;;  %555 = vmatprep.mubr.f32.mxu1 %v6377_v1  ;;  %v3950_v2 = vld [vmem:[%s6372_s1 + $0x110] sm:$0xff]  ;;  %v3951_v4 = vld [vmem:[%s6372_s1 + $0x118] sm:$0xff] }
 0x113   : > { %3896 = vmatmul.mubr.msk.f32.gmra.mxu0 %vm318_vm0, %v3886_v3  ;;  %v3936_v3 = vld [vmem:[%s6372_s1 + $0xf0] sm:$0xff] }
 0x114   : > { %1381 = vrot.lane.b32.xlu0 %v1364_v11, %s4148_s11  ;;  %3921 = vmatpush1.msk.msra.mxu0 %vm343_vm14, %v637_v13  ;;  %v820_v16 = vpop.permute.xlu1 %819  ;;  %v1726_v18 = vpop.permute.xlu0 %1725  ;;  %v3953_v11 = vld [vmem:[%s6372_s1 + $0x128] sm:$0xff]  ;;  %v3955_v13 = vld [vmem:[%s6372_s1 + $0x138] sm:$0xff] }
 0x115   : > { %1379 = vrot.lane.b32.xlu1 %v1376_v12, %s4148_s11  ;;  %430 = vmatprep.mubr.f32.mxu0 %v6377_v1  ;;  %v1727_v21 = vrot.slane %v1726_v18, 4  ;;  %v3954_v12 = vld [vmem:[%s6372_s1 + $0x130] sm:$0xff] }
 0x116   : > { %3904 = vmatmul.mubr.msk.f32.vlgmr.msra.gmra.mxu1 %vm318_vm0, %v288_v15  ;;  %v1916_v15 = vld [vmem:[%s6373_s2 + $0x20] sm:$0xff] }
 0x117   : > { %3897 = vmatmul.mubr.msk.f32.gmra.mxu0 %vm318_vm0, %v3887_v17  ;;  %561 = vmatprep.mubr.f32.mxu1 %v6377_v1  ;;  %v1729_v27 = vsel %vm1728_vm11, %v1727_v21, %v1726_v18  ;;  %v1733_v34 = vmul.f32 %v1727_v21, %v1724_v33  ;;  %v1912_v17 = vld [vmem:[%s6373_s2] sm:$0xff] }
 0x118   : > { %1559 = vrot.lane.b32.xlu0 %v1556_v19, %s4149_s17  ;;  %v1002_v22 = vpop.permute.xlu1 %1001  ;;  %436 = vmatprep.mubr.f32.mxu0 %v6377_v1  ;;  %v1004_v24 = vpop.permute.xlu0 %1003  ;;  %v1732_v36 = vmul.f32 %v1729_v27, %v1723_v35  ;;  %v3969_v35 = vld [vmem:[%s6372_s1 + $0x158] sm:$0xff] }
 0x119   : > { %1377 = vrot.lane.b32.xlu1 %v1363_v0, %s4148_s11  ;;  %v1007_v25 = vsel %vm1005_vm3, %v1002_v22, %v1004_v24  ;;  %v3935_v0 = vld [vmem:[%s6372_s1 + $0xe8] sm:$0xff] }
 0x11a   : > { %3905 = vmatmul.mubr.msk.f32.gmra.mxu1 %vm318_vm0, %v289_v20  ;;  %3956 = vmatprep.subr.msk.mxu0 %vm343_vm14, %v1007_v25  ;;  %v1745_v44 = vcombine.high %v1732_v36, %v1732_v36 }
 0x11b   : > { %3898 = vmatmul.mubr.msk.f32.gmra.mxu0 %vm318_vm0, %v3888_v23  ;;  %567 = vmatprep.mubr.f32.mxu1 %v6377_v1  ;;  %v3966_v23 = vld [vmem:[%s6372_s1 + $0x140] sm:$0xff] }
 0x11c   : > { %1557 = vrot.lane.b32.xlu0 %v1543_v14, %s4149_s17  ;;  %v822_v28 = vpop.permute.xlu1 %821  ;;  %442 = vmatprep.mubr.f32.mxu0 %v6377_v1  ;;  %v1919_v14 = vld [vmem:[%s6373_s2 + $0x38] sm:$0xff] }
 0x11d   : > { %v826_v31 = vsel %vm825_vm4, %v820_v16, %v822_v28  ;;  %1561 = vrot.lane.b32.xlu1 %v1544_v29, %s4149_s17  ;;  %v827_v32 = vsel %vm825_vm4, %v822_v28, %v824_v5  ;;  %v3937_v5 = vld [vmem:[%s6372_s1 + $0xf8] sm:$0xff]  ;;  %v1914_v16 = vld [vmem:[%s6373_s2 + $0x10] sm:$0xff] }
 0x11e   : > { %3938 = vmatprep.subr.msk.mxu1 %vm343_vm14, %v827_v32  ;;  %3906 = vmatmul.mubr.msk.f32.gmra.mxu1 %vm318_vm0, %v290_v26  ;;  %v3967_v26 = vld [vmem:[%s6372_s1 + $0x148] sm:$0xff] }
 0x11f   : > { %3899 = vmatmul.mubr.msk.f32.gmra.mxu0 %vm318_vm0, %v3889_v30  ;;  %3939 = vmatpush1.msk.msra.mxu1 %vm343_vm14, %v826_v31  ;;  %v3968_v30 = vld [vmem:[%s6372_s1 + $0x150] sm:$0xff]  ;;  %v3984_v31 = vld [vmem:[%s6372_s1 + $0x180] sm:$0xff] }
 0x120   : > { %1750 = vrot.lane.b32.xlu0 %v1733_v34, %s4150_s16  ;;  %v1000_v38 = vpop.permute.xlu1 %999  ;;  %731 = vmatprep.mubr.f32.mxu0 %v6377_v1 }
 0x121   : > { %v1006_v40 = vsel %vm1005_vm3, %v1000_v38, %v1002_v22  ;;  %1746 = vrot.lane.b32.xlu1 %v1732_v36, %s4150_s16  ;;  %573 = vmatprep.mubr.f32.mxu1 %v6377_v1  ;;  %v3985_v36 = vld [vmem:[%s6372_s1 + $0x188] sm:$0xff] }
 0x122   : > { %3907 = vmatmul.mubr.msk.f32.gmra.mxu1 %vm318_vm0, %v291_v37 }
 0x123   : > { %3922 = vmatmul.mubr.msk.f32.vlgmr.msra.gmra.mxu0 %vm318_vm0, %v3912_v39  ;;  %579 = vmatprep.mubr.f32.mxu1 %v6377_v1  ;;  %v3970_v39 = vld [vmem:[%s6372_s1 + $0x160] sm:$0xff] }
 0x124   : > { %3957 = vmatpush1.msk.msra.mxu0 %vm343_vm14, %v1006_v40  ;;  %737 = vmatprep.mubr.f32.mxu0 %v6377_v1  ;;  %v3986_v40 = vld [vmem:[%s6372_s1 + $0x190] sm:$0xff] }
 0x125   : > { %1952 = vperm.xlu1 %4086, %v1918_v41   ;;  %1957 = vperm.xlu0 %4085, %v1919_v14   ;;  %v3971_v41 = vld [vmem:[%s6372_s1 + $0x168] sm:$0xff] }
 0x126   : > { %3908 = vmatmul.mubr.msk.f32.gmra.mxu1 %vm318_vm0, %v292_v42  ;;  %v3987_v42 = vld [vmem:[%s6372_s1 + $0x198] sm:$0xff] }
 0x127   : > { %3923 = vmatmul.mubr.msk.f32.gmra.mxu0 %vm318_vm0, %v3913_v43  ;;  %585 = vmatprep.mubr.f32.mxu1 %v6377_v1  ;;  %v3972_v43 = vld [vmem:[%s6372_s1 + $0x170] sm:$0xff] }
 0x128   : > { %743 = vmatprep.mubr.f32.mxu0 %v6377_v1 }
 0x129   : > { %1748 = vrot.lane.b32.xlu1 %v1745_v44, %s4150_s16  ;;  %1942 = vperm.xlu0 %4085, %v1916_v15   ;;  %v3988_v44 = vld [vmem:[%s6372_s1 + $0x1a0] sm:$0xff] }
 0x12a   : > { %3909 = vmatmul.mubr.msk.f32.gmra.mxu1 %vm318_vm0, %v293_v45 }
 0x12b   : > { %3924 = vmatmul.mubr.msk.f32.gmra.mxu0 %vm318_vm0, %v3914_v46  ;;  %591 = vmatprep.mubr.f32.mxu1 %v6377_v1  ;;  %v3973_v46 = vld [vmem:[%s6372_s1 + $0x178] sm:$0xff] }
 0x12c   : > { %749 = vmatprep.mubr.f32.mxu0 %v6377_v1 }
 0x12d   : > { %1947 = vperm.xlu1 %4086, %v1917_v47   ;;  %1932 = vperm.xlu0 %4085, %v1914_v16   ;;  %v3989_v47 = vld [vmem:[%s6372_s1 + $0x1a8] sm:$0xff] }
 0x12e   : > { %3910 = vmatmul.mubr.msk.f32.gmra.mxu1 %vm318_vm0, %v294_v48 }
 0x12f   : > { %3925 = vmatmul.mubr.msk.f32.gmra.mxu0 %vm318_vm0, %v3915_v49  ;;  %597 = vmatprep.mubr.f32.mxu1 %v6377_v1  ;;  %v3990_v49 = vld [vmem:[%s6372_s1 + $0x1b0] sm:$0xff] }
 0x130   : > { %755 = vmatprep.mubr.f32.mxu0 %v6377_v1 }
 0x131   : > { %1937 = vperm.xlu1 %4086, %v1915_v50   ;;  %1922 = vperm.xlu0 %4085, %v1912_v17   ;;  %v4002_v50 = vld [vmem:[%s6372_s1 + $0x1c0] sm:$0xff] }
 0x132   : > { %3911 = vmatmul.mubr.msk.f32.gmra.mxu1 %vm318_vm0, %v295_v51 }
 0x133   : > { %3926 = vmatmul.mubr.msk.f32.gmra.mxu0 %vm318_vm0, %v3916_v52  ;;  %920 = vmatprep.mubr.f32.mxu1 %v6377_v1 }
 0x134   : > { %761 = vmatprep.mubr.f32.mxu0 %v6377_v1 }
 0x135   : > { %1927 = vperm.xlu1 %4086, %v1913_v53  }
 0x136   : > { %3940 = vmatmul.mubr.msk.f32.vlgmr.msra.gmra.mxu1 %vm318_vm0, %v3930_v54 }
 0x137   : > { %3927 = vmatmul.mubr.msk.f32.gmra.mxu0 %vm318_vm0, %v3917_v55  ;;  %926 = vmatprep.mubr.f32.mxu1 %v6377_v1  ;;  %v3991_v55 = vld [vmem:[%s6372_s1 + $0x1b8] sm:$0xff] }
 0x138   : > { %767 = vmatprep.mubr.f32.mxu0 %v6377_v1 }
 0x13a   : > { %3941 = vmatmul.mubr.msk.f32.gmra.mxu1 %vm318_vm0, %v3931_v56  ;;  %v4003_v56 = vld [vmem:[%s6372_s1 + $0x1c8] sm:$0xff] }
 0x13b   : > { %3928 = vmatmul.mubr.msk.f32.gmra.mxu0 %vm318_vm0, %v3918_v57  ;;  %932 = vmatprep.mubr.f32.mxu1 %v6377_v1  ;;  %v4004_v57 = vld [vmem:[%s6372_s1 + $0x1d0] sm:$0xff] }
 0x13c   : > { %773 = vmatprep.mubr.f32.mxu0 %v6377_v1 }
 0x13e   : > { %3942 = vmatmul.mubr.msk.f32.gmra.mxu1 %vm318_vm0, %v3932_v58  ;;  %v4020_v58 = vld [vmem:[%s6372_s1 + $0x200] sm:$0xff] }
 0x13f   : > { %3929 = vmatmul.mubr.msk.f32.gmra.mxu0 %vm318_vm0, %v3919_v59  ;;  %938 = vmatprep.mubr.f32.mxu1 %v6377_v1  ;;  %v4005_v59 = vld [vmem:[%s6372_s1 + $0x1d8] sm:$0xff] }
 0x140   : > { %1100 = vmatprep.mubr.f32.mxu0 %v6377_v1 }
 0x142   : > { %3943 = vmatmul.mubr.msk.f32.gmra.mxu1 %vm318_vm0, %v3933_v60  ;;  %v4021_v60 = vld [vmem:[%s6372_s1 + $0x208] sm:$0xff] }
 0x143   : > { %3958 = vmatmul.mubr.msk.f32.vlgmr.msra.gmra.mxu0 %vm318_vm0, %v3948_v61  ;;  %944 = vmatprep.mubr.f32.mxu1 %v6377_v1  ;;  %v4006_v61 = vld [vmem:[%s6372_s1 + $0x1e0] sm:$0xff] }
 0x144   : > { %1106 = vmatprep.mubr.f32.mxu0 %v6377_v1 }
 0x146   : > { %3944 = vmatmul.mubr.msk.f32.gmra.mxu1 %vm318_vm0, %v3934_v62  ;;  %v4022_v62 = vld [vmem:[%s6372_s1 + $0x210] sm:$0xff] }
 0x147   : > { %3959 = vmatmul.mubr.msk.f32.gmra.mxu0 %vm318_vm0, %v3949_v63  ;;  %950 = vmatprep.mubr.f32.mxu1 %v6377_v1  ;;  %v4007_v63 = vld [vmem:[%s6372_s1 + $0x1e8] sm:$0xff] }
 0x148   : > { %1112 = vmatprep.mubr.f32.mxu0 %v6377_v1 }
 0x14a   : > { %3945 = vmatmul.mubr.msk.f32.gmra.mxu1 %vm318_vm0, %v3935_v0  ;;  %v4023_v0 = vld [vmem:[%s6372_s1 + $0x218] sm:$0xff] }
 0x14b   : > { %3960 = vmatmul.mubr.msk.f32.gmra.mxu0 %vm318_vm0, %v3950_v2  ;;  %956 = vmatprep.mubr.f32.mxu1 %v6377_v1  ;;  %v4008_v2 = vld [vmem:[%s6372_s1 + $0x1f0] sm:$0xff] }
 0x14c   : > { %1118 = vmatprep.mubr.f32.mxu0 %v6377_v1 }
 0x14e   : > { %3946 = vmatmul.mubr.msk.f32.gmra.mxu1 %vm318_vm0, %v3936_v3  ;;  %v4024_v3 = vld [vmem:[%s6372_s1 + $0x220] sm:$0xff] }
 0x14f   : > { %3961 = vmatmul.mubr.msk.f32.gmra.mxu0 %vm318_vm0, %v3951_v4  ;;  %962 = vmatprep.mubr.f32.mxu1 %v6377_v1  ;;  %v4009_v4 = vld [vmem:[%s6372_s1 + $0x1f8] sm:$0xff] }
 0x150   : > { %1124 = vmatprep.mubr.f32.mxu0 %v6377_v1 }
 0x152   : > { %3947 = vmatmul.mubr.msk.f32.gmra.mxu1 %vm318_vm0, %v3937_v5  ;;  %v4025_v5 = vld [vmem:[%s6372_s1 + $0x228] sm:$0xff] }
 0x153   : > { %3962 = vmatmul.mubr.msk.f32.gmra.mxu0 %vm318_vm0, %v3952_v6  ;;  %1289 = vmatprep.mubr.f32.mxu1 %v6377_v1  ;;  %v4026_v6 = vld [vmem:[%s6372_s1 + $0x230] sm:$0xff] }
 0x154   : > { %1130 = vmatprep.mubr.f32.mxu0 %v6377_v1 }
 0x157   : > { %3963 = vmatmul.mubr.msk.f32.gmra.mxu0 %vm318_vm0, %v3953_v11  ;;  %v4027_v11 = vld [vmem:[%s6372_s1 + $0x238] sm:$0xff] }
 0x158   : > { %1136 = vmatprep.mubr.f32.mxu0 %v6377_v1 }
 0x15b   : > { %3964 = vmatmul.mubr.msk.f32.gmra.mxu0 %vm318_vm0, %v3954_v12 }
 0x15c   : > { %1142 = vmatprep.mubr.f32.mxu0 %v6377_v1 }
 0x15f   : > { %3965 = vmatmul.mubr.msk.f32.gmra.mxu0 %vm318_vm0, %v3955_v13 }
 0x160   : > { %1478 = vmatprep.mubr.f32.mxu0 %v6377_v1 }
 0x17b   : > { %v1193_v19 = vpop.permute.xlu1 %1192 }
 0x17e   : > { %v1189_v18 = vpop.permute.xlu0 %1188 }
 0x182   : > { %v1191_v20 = vpop.permute.xlu0 %1190 }
 0x183   : > { %v1195_v21 = vsel %vm1194_vm5, %v1189_v18, %v1191_v20  ;;  %v1196_v22 = vsel %vm1194_vm5, %v1191_v20, %v1193_v19 }
 0x184   : > { %3974 = vmatprep.subr.msk.mxu1 %vm343_vm14, %v1196_v22 }
 0x185   : > { %3975 = vmatpush1.msk.msra.mxu1 %vm343_vm14, %v1195_v21 }
 0x186   : > { %3976 = vmatmul.mubr.msk.f32.vlgmr.msra.gmra.mxu1 %vm318_vm0, %v3966_v23  ;;  %v1382_v24 = vpop.permute.xlu0 %1381 }
 0x187   : > { %v1380_v25 = vpop.permute.xlu1 %1379  ;;  %1295 = vmatprep.mubr.f32.mxu1 %v6377_v1 }
 0x188   : > { %v1385_v27 = vsel %vm1383_vm6, %v1380_v25, %v1382_v24 }
 0x189   : > { %3992 = vmatprep.subr.msk.mxu0 %vm343_vm14, %v1385_v27 }
 0x18a   : > { %3977 = vmatmul.mubr.msk.f32.gmra.mxu1 %vm318_vm0, %v3967_v26  ;;  %v1560_v28 = vpop.permute.xlu0 %1559 }
 0x18b   : > { %v1378_v29 = vpop.permute.xlu1 %1377  ;;  %1301 = vmatprep.mubr.f32.mxu1 %v6377_v1 }
 0x18c   : > { %v1384_v32 = vsel %vm1383_vm6, %v1378_v29, %v1380_v25 }
 0x18d   : > { %3993 = vmatpush1.msk.msra.mxu0 %vm343_vm14, %v1384_v32 }
 0x18e   : > { %3978 = vmatmul.mubr.msk.f32.gmra.mxu1 %vm318_vm0, %v3968_v30  ;;  %3994 = vmatmul.mubr.msk.f32.vlgmr.msra.gmra.mxu0 %vm318_vm0, %v3984_v31  ;;  %v1558_v33 = vpop.permute.xlu0 %1557 }
 0x18f   : > { %v1562_v34 = vpop.permute.xlu1 %1561  ;;  %1307 = vmatprep.mubr.f32.mxu1 %v6377_v1  ;;  %1484 = vmatprep.mubr.f32.mxu0 %v6377_v1  ;;  %v1564_v38 = vsel %vm1563_vm8, %v1558_v33, %v1560_v28 }
 0x190   : > { %v1565_v37 = vsel %vm1563_vm8, %v1560_v28, %v1562_v34 }
 0x191   : > { %4010 = vmatprep.subr.msk.mxu1 %vm343_vm14, %v1565_v37 }
 0x192   : > { %3979 = vmatmul.mubr.msk.f32.gmra.mxu1 %vm318_vm0, %v3969_v35  ;;  %3995 = vmatmul.mubr.msk.f32.gmra.mxu0 %vm318_vm0, %v3985_v36  ;;  %v1751_v51 = vpop.permute.xlu0 %1750 }
 0x193   : > { %4011 = vmatpush1.msk.msra.mxu1 %vm343_vm14, %v1564_v38  ;;  %1313 = vmatprep.mubr.f32.mxu1 %v6377_v1  ;;  %v1747_v45 = vpop.permute.xlu1 %1746 }
 0x194   : > { %1490 = vmatprep.mubr.f32.mxu0 %v6377_v1 }
 0x196   : > { %3980 = vmatmul.mubr.msk.f32.gmra.mxu1 %vm318_vm0, %v3970_v39  ;;  %3996 = vmatmul.mubr.msk.f32.gmra.mxu0 %vm318_vm0, %v3986_v40 }
 0x197   : > { %1319 = vmatprep.mubr.f32.mxu1 %v6377_v1  ;;  %1496 = vmatprep.mubr.f32.mxu0 %v6377_v1 }
 0x19a   : > { %3981 = vmatmul.mubr.msk.f32.gmra.mxu1 %vm318_vm0, %v3971_v41  ;;  %3997 = vmatmul.mubr.msk.f32.gmra.mxu0 %vm318_vm0, %v3987_v42 }
 0x19b   : > { %1325 = vmatprep.mubr.f32.mxu1 %v6377_v1  ;;  %1502 = vmatprep.mubr.f32.mxu0 %v6377_v1 }
 0x19e   : > { %3982 = vmatmul.mubr.msk.f32.gmra.mxu1 %vm318_vm0, %v3972_v43  ;;  %3998 = vmatmul.mubr.msk.f32.gmra.mxu0 %vm318_vm0, %v3988_v44 }
 0x19f   : > { %1331 = vmatprep.mubr.f32.mxu1 %v6377_v1  ;;  %1508 = vmatprep.mubr.f32.mxu0 %v6377_v1 }
 0x1a0   : > { %v4610_v48 = vpop.permute.xlu1 %1952 }
 0x1a1   : > { %6418 = vst [vmem:[#allocation6_spill] sm:$0xff] %v4610_v48 }
 0x1a2   : > { %3983 = vmatmul.mubr.msk.f32.gmra.mxu1 %vm318_vm0, %v3973_v46  ;;  %3999 = vmatmul.mubr.msk.f32.gmra.mxu0 %vm318_vm0, %v3989_v47  ;;  %v4087_v47 = vpack.i.bf16 %v4226_v10, %v4220_v8 }
 0x1a3   : > { %1514 = vmatprep.mubr.f32.mxu0 %v6377_v1  ;;  %1658 = vmatprep.mubr.f32.mxu1 %v6377_v1 }
 0x1a4   : > { %v1749_v52 = vpop.permute.xlu1 %1748  ;;  %4088 = vrot.lane.b32.xlu1 %v4087_v47, %s4138_s27  ;;  %4098 = vrot.lane.b32.xlu0 %v4087_v47, %s4140_s29 }
 0x1a5   : > { %v1753_v53 = vsel %vm1752_vm9, %v1747_v45, %v1749_v52  ;;  %v1754_v54 = vsel %vm1752_vm9, %v1749_v52, %v1751_v51 }
 0x1a6   : > { %4000 = vmatmul.mubr.msk.f32.gmra.mxu0 %vm318_vm0, %v3990_v49  ;;  %4012 = vmatmul.mubr.msk.f32.vlgmr.msra.gmra.mxu1 %vm318_vm0, %v4002_v50 }
 0x1a7   : > { %4028 = vmatprep.subr.msk.mxu0 %vm343_vm14, %v1754_v54  ;;  %1520 = vmatprep.mubr.f32.mxu0 %v6377_v1 }
 0x1a8   : > { %4029 = vmatpush1.msk.msra.mxu0 %vm343_vm14, %v1753_v53  ;;  %1664 = vmatprep.mubr.f32.mxu1 %v6377_v1  ;;  %vm2096_vm14 = vcmask 1047688  }
 0x1aa   : > { %4001 = vmatmul.mubr.msk.f32.gmra.mxu0 %vm318_vm0, %v3991_v55  ;;  %4013 = vmatmul.mubr.msk.f32.gmra.mxu1 %vm318_vm0, %v4003_v56 }
 0x1ab   : > { %1670 = vmatprep.mubr.f32.mxu1 %v6377_v1  ;;  %1847 = vmatprep.mubr.f32.mxu0 %v6377_v1 }
 0x1ae   : > { %4014 = vmatmul.mubr.msk.f32.gmra.mxu1 %vm318_vm0, %v4004_v57  ;;  %4030 = vmatmul.mubr.msk.f32.vlgmr.msra.gmra.mxu0 %vm318_vm0, %v4020_v58  ;;  %v4092_v57 = vpack.i.bf16 %v4223_v9, %v4217_v7 }
 0x1af   : > { %1676 = vmatprep.mubr.f32.mxu1 %v6377_v1  ;;  %1853 = vmatprep.mubr.f32.mxu0 %v6377_v1 }
 0x1b0   : > { %4093 = vrot.lane.b32.xlu1 %v4092_v57, %s4137_s26 }
 0x1b2   : > { %4015 = vmatmul.mubr.msk.f32.gmra.mxu1 %vm318_vm0, %v4005_v59  ;;  %4031 = vmatmul.mubr.msk.f32.gmra.mxu0 %vm318_vm0, %v4021_v60 }
 0x1b3   : > { %1682 = vmatprep.mubr.f32.mxu1 %v6377_v1  ;;  %1859 = vmatprep.mubr.f32.mxu0 %v6377_v1 }
 0x1b4   : > { %4103 = vrot.lane.b32.xlu1 %v4092_v57, %s4142_s6 }
 0x1b6   : > { %4016 = vmatmul.mubr.msk.f32.gmra.mxu1 %vm318_vm0, %v4006_v61  ;;  %4032 = vmatmul.mubr.msk.f32.gmra.mxu0 %vm318_vm0, %v4022_v62 }
 0x1b7   : > { %1688 = vmatprep.mubr.f32.mxu1 %v6377_v1  ;;  %1865 = vmatprep.mubr.f32.mxu0 %v6377_v1 }
 0x1b8   : > { %4108 = vrot.lane.b32.xlu1 %v4087_v47, %s4145_s8 }
 0x1ba   : > { %4017 = vmatmul.mubr.msk.f32.gmra.mxu1 %vm318_vm0, %v4007_v63  ;;  %4033 = vmatmul.mubr.msk.f32.gmra.mxu0 %vm318_vm0, %v4023_v0 }
 0x1bb   : > { %1694 = vmatprep.mubr.f32.mxu1 %v6377_v1  ;;  %1871 = vmatprep.mubr.f32.mxu0 %v6377_v1 }
 0x1be   : > { %4018 = vmatmul.mubr.msk.f32.gmra.mxu1 %vm318_vm0, %v4008_v2  ;;  %4034 = vmatmul.mubr.msk.f32.gmra.mxu0 %vm318_vm0, %v4024_v3 }
 0x1bf   : > { %1700 = vmatprep.mubr.f32.mxu1 %v6377_v1  ;;  %1877 = vmatprep.mubr.f32.mxu0 %v6377_v1 }
 0x1c2   : > { %4019 = vmatmul.mubr.msk.f32.gmra.mxu1 %vm318_vm0, %v4009_v4  ;;  %4035 = vmatmul.mubr.msk.f32.gmra.mxu0 %vm318_vm0, %v4025_v5 }
 0x1c3   : > { %1883 = vmatprep.mubr.f32.mxu0 %v6377_v1  ;;  %2336 = vmatprep.mubr.f32.mxu1 %v6377_v1 }
 0x1c6   : > { %4036 = vmatmul.mubr.msk.f32.gmra.mxu0 %vm318_vm0, %v4026_v6 }
 0x1c7   : > { %1889 = vmatprep.mubr.f32.mxu0 %v6377_v1 }
 0x1ca   : > { %4037 = vmatmul.mubr.msk.f32.gmra.mxu0 %vm318_vm0, %v4027_v11 }
 0x1cb   : > { %v414_v12 = vpop.f32.mrf.mxu0  ;;  %2622 = vmatprep.mubr.f32.mxu0 %v6377_v1 }
 0x1cc   : > { %v450_v14 = vpop.f32.mrf.mxu1 }
 0x1cd   : > { %v416_v13 = vpop.f32.mrf.mxu0 }
 0x1ce   : > { %v452_v16 = vpop.f32.mrf.mxu1 }
 0x1cf   : > { %v420_v15 = vpop.f32.mrf.mxu0 }
 0x1d1   : > { %v422_v17 = vpop.f32.mrf.mxu0  ;;  %v456_v18 = vpop.f32.mrf.mxu1 }
 0x1d3   : > { %v426_v19 = vpop.f32.mrf.mxu0  ;;  %v4710_v20 = vpop.f32.mrf.mxu1 }
 0x1d5   : > { %v428_v21 = vpop.f32.mrf.mxu0 }
 0x1d6   : > { %v557_v22 = vpop.f32.mrf.mxu1 }
 0x1d7   : > { %v432_v23 = vpop.f32.mrf.mxu0  ;;  %v558_v24 = vadd.f32 %v557_v22, %v414_v12 }
 0x1d8   : > { %v559_v25 = vpop.f32.mrf.mxu1 }
 0x1d9   : > { %v434_v26 = vpop.f32.mrf.mxu0  ;;  %v560_v27 = vadd.f32 %v559_v25, %v416_v13 }
 0x1da   : > { %v563_v28 = vpop.f32.mrf.mxu1 }
 0x1db   : > { %v438_v29 = vpop.f32.mrf.mxu0  ;;  %v564_v30 = vadd.f32 %v563_v28, %v420_v15 }
 0x1dc   : > { %v565_v31 = vpop.f32.mrf.mxu1 }
 0x1dd   : > { %v440_v32 = vpop.f32.mrf.mxu0  ;;  %v566_v33 = vadd.f32 %v565_v31, %v422_v17 }
 0x1de   : > { %v569_v34 = vpop.f32.mrf.mxu1 }
 0x1df   : > { %v444_v35 = vpop.f32.mrf.mxu0  ;;  %v570_v36 = vadd.f32 %v569_v34, %v426_v19 }
 0x1e0   : > { %v571_v37 = vpop.f32.mrf.mxu1 }
 0x1e1   : > { %v446_v38 = vpop.f32.mrf.mxu0  ;;  %v572_v39 = vadd.f32 %v571_v37, %v428_v21 }
 0x1e2   : > { %v575_v40 = vpop.f32.mrf.mxu1 }
 0x1e3   : > { %v733_v41 = vpop.f32.mrf.mxu0  ;;  %v576_v42 = vadd.f32 %v575_v40, %v432_v23 }
 0x1e4   : > { %v4712_v43 = vadd.f32 %v733_v41, %v558_v24  ;;  %v577_v44 = vpop.f32.mrf.mxu1 }
 0x1e5   : > { %v735_v45 = vpop.f32.mrf.mxu0  ;;  %v578_v46 = vadd.f32 %v577_v44, %v434_v26 }
 0x1e6   : > { %v4716_v49 = vadd.f32 %v735_v45, %v560_v27  ;;  %v581_v50 = vpop.f32.mrf.mxu1 }
 0x1e7   : > { %v739_v51 = vpop.f32.mrf.mxu0  ;;  %v582_v52 = vadd.f32 %v581_v50, %v438_v29 }
 0x1e8   : > { %v4719_v53 = vadd.f32 %v739_v51, %v564_v30  ;;  %v583_v54 = vpop.f32.mrf.mxu1 }
 0x1e9   : > { %v741_v55 = vpop.f32.mrf.mxu0  ;;  %v584_v56 = vadd.f32 %v583_v54, %v440_v32 }
 0x1ea   : > { %v4723_v58 = vadd.f32 %v741_v55, %v566_v33  ;;  %v587_v59 = vpop.f32.mrf.mxu1 }
 0x1eb   : > { %v745_v60 = vpop.f32.mrf.mxu0  ;;  %v588_v8 = vadd.f32 %v587_v59, %v444_v35 }
 0x1ec   : > { %v4726_v10 = vadd.f32 %v745_v60, %v570_v36  ;;  %v589_v61 = vpop.f32.mrf.mxu1 }
 0x1ed   : > { %v747_v62 = vpop.f32.mrf.mxu0  ;;  %v590_v63 = vadd.f32 %v589_v61, %v446_v38 }
 0x1ee   : > { %v4728_v0 = vadd.f32 %v747_v62, %v572_v39  ;;  %v593_v2 = vpop.f32.mrf.mxu1 }
 0x1ef   : > { %v751_v3 = vpop.f32.mrf.mxu0  ;;  %v594_v4 = vadd.f32 %v593_v2, %v450_v14 }
 0x1f0   : > { %v4731_v5 = vadd.f32 %v751_v3, %v576_v42  ;;  %v595_v6 = vpop.f32.mrf.mxu1 }
 0x1f1   : > { %v753_v11 = vpop.f32.mrf.mxu0  ;;  %v596_v12 = vadd.f32 %v595_v6, %v452_v16 }
 0x1f2   : > { %v4733_v13 = vadd.f32 %v753_v11, %v578_v46  ;;  %v599_v15 = vpop.f32.mrf.mxu1 }
 0x1f3   : > { %v757_v17 = vpop.f32.mrf.mxu0  ;;  %v600_v19 = vadd.f32 %v599_v15, %v456_v18 }
 0x1f4   : > { %v4735_v21 = vadd.f32 %v757_v17, %v582_v52  ;;  %v601_v22 = vpop.f32.mrf.mxu1 }
 0x1f5   : > { %v759_v23 = vpop.f32.mrf.mxu0  ;;  %v602_v24 = vadd.f32 %v601_v22, %v4710_v20 }
 0x1f6   : > { %v4739_v14 = vadd.f32 %v759_v23, %v584_v56  ;;  %v922_v34 = vpop.f32.mrf.mxu1 }
 0x1f7   : > { %v763_v25 = vpop.f32.mrf.mxu0 }
 0x1f8   : > { %v4742_v26 = vadd.f32 %v763_v25, %v588_v8  ;;  %v4754_v35 = vpop.f32.mrf.mxu1 }
 0x1f9   : > { %v765_v16 = vpop.f32.mrf.mxu0 }
 0x1fa   : > { %v4744_v27 = vadd.f32 %v765_v16, %v590_v63  ;;  %v4756_v36 = vpop.f32.mrf.mxu1 }
 0x1fb   : > { %v769_v28 = vpop.f32.mrf.mxu0 }
 0x1fc   : > { %v4746_v18 = vadd.f32 %v769_v28, %v594_v4  ;;  %v4760_v38 = vpop.f32.mrf.mxu1 }
 0x1fd   : > { %v771_v29 = vpop.f32.mrf.mxu0 }
 0x1fe   : > { %6419 = vst [vmem:[#allocation7_spill] sm:$0xff] %v4746_v18  ;;  %v4748_v30 = vadd.f32 %v771_v29, %v596_v12  ;;  %v4764_v40 = vpop.f32.mrf.mxu1 }
 0x1ff   : > { %v775_v31 = vpop.f32.mrf.mxu0 }
 0x200   : > { %6420 = vst [vmem:[#allocation8_spill] sm:$0xff] %v4748_v30  ;;  %v4750_v20 = vadd.f32 %v775_v31, %v600_v19  ;;  %v4768_v42 = vpop.f32.mrf.mxu1 }
 0x201   : > { %v777_v32 = vpop.f32.mrf.mxu0 }
 0x202   : > { %6421 = vst [vmem:[#allocation9_spill] sm:$0xff] %v4750_v20  ;;  %v4752_v33 = vadd.f32 %v777_v32, %v602_v24  ;;  %v4772_v45 = vpop.f32.mrf.mxu1 }
 0x203   : > { %v4758_v37 = vpop.f32.mrf.mxu0 }
 0x204   : > { %6422 = vst [vmem:[#allocation10_spill] sm:$0xff] %v4752_v33  ;;  %v4776_v47 = vpop.f32.mrf.mxu1 }
 0x205   : > { %v4762_v39 = vpop.f32.mrf.mxu0 }
 0x206   : > { %v4780_v51 = vpop.f32.mrf.mxu1 }
 0x207   : > { %v4766_v41 = vpop.f32.mrf.mxu0 }
 0x208   : > { %v4784_v54 = vpop.f32.mrf.mxu1 }
 0x209   : > { %v4770_v44 = vpop.f32.mrf.mxu0 }
 0x20a   : > { %v4788_v56 = vpop.f32.mrf.mxu1 }
 0x20b   : > { %v4774_v46 = vpop.f32.mrf.mxu0 }
 0x20c   : > { %v4792_v59 = vpop.f32.mrf.mxu1 }
 0x20d   : > { %v4778_v50 = vpop.f32.mrf.mxu0 }
 0x20e   : > { %v4796_v8 = vpop.f32.mrf.mxu1 }
 0x20f   : > { %v4782_v52 = vpop.f32.mrf.mxu0  ;;  %6423 = vst [vmem:[#allocation11_spill] sm:$0xff] %v4796_v8 }
 0x210   : > { %v4800_v62 = vpop.f32.mrf.mxu1 }
 0x211   : > { %v4786_v55 = vpop.f32.mrf.mxu0  ;;  %6424 = vst [vmem:[#allocation12_spill] sm:$0xff] %v4800_v62 }
 0x212   : > { %v4804_v2 = vpop.f32.mrf.mxu1 }
 0x213   : > { %v4790_v57 = vpop.f32.mrf.mxu0  ;;  %6426 = vst [vmem:[#allocation14_spill] sm:$0xff] %v4804_v2 }
 0x214   : > { %v4808_v4 = vpop.f32.mrf.mxu1 }
 0x215   : > { %v4794_v60 = vpop.f32.mrf.mxu0  ;;  %6428 = vst [vmem:[#allocation16_spill] sm:$0xff] %v4808_v4 }
 0x217   : > { %v4798_v61 = vpop.f32.mrf.mxu0 }
 0x219   : > { %v4802_v63 = vpop.f32.mrf.mxu0 }
 0x21a   : > { %6425 = vst [vmem:[#allocation13_spill] sm:$0xff] %v4802_v63 }
 0x21b   : > { %v4806_v3 = vpop.f32.mrf.mxu0 }
 0x21c   : > { %6427 = vst [vmem:[#allocation15_spill] sm:$0xff] %v4806_v3 }
 0x21d   : > { %v4810_v6 = vpop.f32.mrf.mxu0 }
 0x21e   : > { %6429 = vst [vmem:[#allocation17_spill] sm:$0xff] %v4810_v6  ;;  %v4840_v6 = vpop.permute.xlu0 %1957 }
 0x21f   : > { %v4812_v12 = vpop.f32.mrf.mxu0  ;;  %6434 = vst [vmem:[#allocation22_spill] sm:$0xff] %v4840_v6  ;;  %v969_v6 = vadd.f32 %v922_v34, %v4712_v43 }
 0x220   : > { %6430 = vst [vmem:[#allocation18_spill] sm:$0xff] %v4812_v12 }
 0x221   : > { %v4814_v19 = vpop.f32.mrf.mxu0 }
 0x222   : > { %6431 = vst [vmem:[#allocation19_spill] sm:$0xff] %v4814_v19 }
 0x246   : > { %v1291_v11 = vpop.f32.mrf.mxu1 }
 0x248   : > { %v1293_v15 = vpop.f32.mrf.mxu1 }
 0x24a   : > { %v1297_v17 = vpop.f32.mrf.mxu1 }
 0x24c   : > { %v1299_v22 = vpop.f32.mrf.mxu1 }
 0x24e   : > { %v4816_v23 = vpop.f32.mrf.mxu1  ;;  %v1480_v24 = vpop.f32.mrf.mxu0 }
 0x250   : > { %v4818_v25 = vpop.f32.mrf.mxu1  ;;  %v1482_v16 = vpop.f32.mrf.mxu0 }
 0x252   : > { %v4820_v28 = vpop.f32.mrf.mxu1  ;;  %v1486_v29 = vpop.f32.mrf.mxu0 }
 0x254   : > { %v4822_v31 = vpop.f32.mrf.mxu1  ;;  %v1488_v32 = vpop.f32.mrf.mxu0 }
 0x256   : > { %v4824_v1 = vpop.f32.mrf.mxu1  ;;  %v4826_v7 = vpop.f32.mrf.mxu0 }
 0x258   : > { %v4828_v9 = vpop.f32.mrf.mxu1  ;;  %v4830_v48 = vpop.f32.mrf.mxu0 }
 0x25a   : > { %v4832_v19 = vpop.f32.mrf.mxu1  ;;  %v4834_v12 = vpop.f32.mrf.mxu0 }
 0x25b   : > { %6432 = vst [vmem:[#allocation20_spill] sm:$0xff] %v4832_v19  ;;  %v4854_v19 = vpop.permute.xlu0 %1942 }
 0x25c   : > { %v4836_v4 = vpop.f32.mrf.mxu1  ;;  %v4838_v33 = vpop.f32.mrf.mxu0  ;;  %6441 = vst [vmem:[#allocation29_spill] sm:$0xff] %v4854_v19 }
 0x25d   : > { %6433 = vst [vmem:[#allocation21_spill] sm:$0xff] %v4836_v4 }
 0x25e   : > { %v4842_v2 = vpop.f32.mrf.mxu1  ;;  %v4844_v20 = vpop.f32.mrf.mxu0 }
 0x25f   : > { %6435 = vst [vmem:[#allocation23_spill] sm:$0xff] %v4842_v2  ;;  %6436 = vst [vmem:[#allocation24_spill] sm:$0xff] %v4844_v20  ;;  %v4863_v20 = vpop.permute.xlu1 %1947  ;;  %v4873_v43 = vpop.permute.xlu0 %1932 }
 0x260   : > { %v4846_v3 = vpop.f32.mrf.mxu1  ;;  %v4848_v62 = vpop.f32.mrf.mxu0  ;;  %6445 = vst [vmem:[#allocation33_spill] sm:$0xff] %v4863_v20  ;;  %v972_v20 = vadd.f32 %v4760_v38, %v4723_v58  ;;  %v974_v58 = vadd.f32 %v4768_v42, %v4728_v0 }
 0x261   : > { %6437 = vst [vmem:[#allocation25_spill] sm:$0xff] %v4846_v3  ;;  %6438 = vst [vmem:[#allocation26_spill] sm:$0xff] %v4848_v62  ;;  %v970_v3 = vadd.f32 %v4754_v35, %v4716_v49 }
 0x262   : > { %v4850_v30 = vpop.f32.mrf.mxu1  ;;  %v4852_v63 = vpop.f32.mrf.mxu0 }
 0x263   : > { %6439 = vst [vmem:[#allocation27_spill] sm:$0xff] %v4850_v30  ;;  %6440 = vst [vmem:[#allocation28_spill] sm:$0xff] %v4852_v63  ;;  %v1149_v30 = vadd.f32 %v4758_v37, %v969_v6  ;;  %v1150_v19 = vadd.f32 %v4762_v39, %v970_v3  ;;  %v973_v6 = vadd.f32 %v4764_v40, %v4726_v10 }
 0x264   : > { %v4856_v8 = vpop.f32.mrf.mxu1  ;;  %v4858_v4 = vpop.f32.mrf.mxu0 }
 0x265   : > { %6442 = vst [vmem:[#allocation30_spill] sm:$0xff] %v4856_v8  ;;  %6443 = vst [vmem:[#allocation31_spill] sm:$0xff] %v4858_v4  ;;  %v971_v8 = vadd.f32 %v4756_v36, %v4719_v53  ;;  %v1338_v4 = vadd.f32 %v1291_v11, %v1149_v30  ;;  %v1339_v35 = vadd.f32 %v1293_v15, %v1150_v19  ;;  %v4884_v36 = vpop.permute.xlu1 %1937  ;;  %v1923_v19 = vpop.permute.xlu0 %1922 }
 0x266   : > { %v4861_v18 = vpop.f32.mrf.mxu0  ;;  %v1660_v2 = vpop.f32.mrf.mxu1  ;;  %v1152_v30 = vadd.f32 %v4770_v44, %v972_v20  ;;  %v1153_v38 = vadd.f32 %v4774_v46, %v973_v6  ;;  %v1154_v20 = vadd.f32 %v4778_v50, %v974_v58 }
 0x267   : > { %6444 = vst [vmem:[#allocation32_spill] sm:$0xff] %v4861_v18  ;;  %v1151_v49 = vadd.f32 %v4766_v41, %v971_v8  ;;  %v1527_v37 = vadd.f32 %v1480_v24, %v1338_v4  ;;  %v1528_v3 = vadd.f32 %v1482_v16, %v1339_v35  ;;  %v975_v24 = vadd.f32 %v4772_v45, %v4731_v5 }
 0x268   : > { %v4868_v62 = vpop.f32.mrf.mxu0  ;;  %v1662_v63 = vpop.f32.mrf.mxu1  ;;  %v1341_v4 = vadd.f32 %v1299_v22, %v1152_v30  ;;  %v1342_v44 = vadd.f32 %v4816_v23, %v1153_v38  ;;  %v976_v22 = vadd.f32 %v4776_v47, %v4733_v13 }
 0x269   : > { %6446 = vst [vmem:[#allocation34_spill] sm:$0xff] %v4868_v62  ;;  %v1340_v39 = vadd.f32 %v1297_v17, %v1151_v49  ;;  %v1707_v11 = vadd.f32 %v1660_v2, %v1527_v37  ;;  %v1708_v10 = vadd.f32 %v1662_v63, %v1528_v3  ;;  %v1155_v63 = vadd.f32 %v4782_v52, %v975_v24  ;;  %v1928_v50 = vpop.permute.xlu1 %1927 }
 0x26a   : > { %v4875_v34 = vpop.f32.mrf.mxu0  ;;  %v1666_v18 = vpop.f32.mrf.mxu1  ;;  %v1530_v16 = vadd.f32 %v1488_v32, %v1341_v4  ;;  %v1531_v49 = vadd.f32 %v4826_v7, %v1342_v44  ;;  %v1156_v32 = vadd.f32 %v4786_v55, %v976_v22  ;;  %v978_v3 = vadd.f32 %v4784_v54, %v4739_v14  ;;  %v6452_v22 = vld [vmem:[#allocation26_spill] sm:$0xff] }
 0x26b   : > { %v1529_v15 = vadd.f32 %v1486_v29, %v1340_v39  ;;  %v1343_v29 = vadd.f32 %v4818_v25, %v1154_v20  ;;  %v1344_v13 = vadd.f32 %v4820_v28, %v1155_v63 }
 0x26c   : > { %v4882_v62 = vpop.f32.mrf.mxu0  ;;  %v1668_v53 = vpop.f32.mrf.mxu1  ;;  %v1158_v4 = vadd.f32 %v4794_v60, %v978_v3  ;;  %v6447_v60 = vld [vmem:[#allocation24_spill] sm:$0xff]  ;;  %v6458_v3 = vld [vmem:[#allocation9_spill] sm:$0xff] }
 0x26d   : > { %v1709_v0 = vadd.f32 %v1666_v18, %v1529_v15  ;;  %v1710_v35 = vadd.f32 %v1668_v53, %v1530_v16  ;;  %v977_v18 = vadd.f32 %v4780_v51, %v4735_v21  ;;  %v1532_v47 = vadd.f32 %v4830_v48, %v1343_v29  ;;  %v6448_v16 = vld [vmem:[#allocation7_spill] sm:$0xff] }
 0x26e   : > { %v1672_v41 = vpop.f32.mrf.mxu1  ;;  %v1849_v8 = vpop.f32.mrf.mxu0  ;;  %v1345_v21 = vadd.f32 %v4822_v31, %v1156_v32  ;;  %v1533_v51 = vadd.f32 %v4834_v12, %v1344_v13  ;;  %v6457_v13 = vld [vmem:[#allocation28_spill] sm:$0xff] }
 0x26f   : > { %v1896_v40 = vadd.f32 %v1849_v8, %v1707_v11  ;;  %v1711_v30 = vadd.f32 %v1672_v41, %v1531_v49  ;;  %v1157_v11 = vadd.f32 %v4790_v57, %v977_v18  ;;  %v979_v8 = vadd.f32 %v4788_v56, %v4742_v26  ;;  %v6456_v18 = vld [vmem:[#allocation21_spill] sm:$0xff] }
 0x270   : > { %v1674_v2 = vpop.f32.mrf.mxu1  ;;  %v1851_v17 = vpop.f32.mrf.mxu0  ;;  %v1534_v54 = vadd.f32 %v4838_v33, %v1345_v21  ;;  %v1347_v56 = vadd.f32 %v4828_v9, %v1158_v4 }
 0x271   : > { %v1897_v42 = vadd.f32 %v1851_v17, %v1708_v10  ;;  %v1960_v46 = vadd.f32 %v1923_v19, %v1896_v40  ;;  %v1712_v48 = vadd.f32 %v1674_v2, %v1532_v47  ;;  %v1346_v14 = vadd.f32 %v4824_v1, %v1157_v11  ;;  %v6459_v11 = vld [vmem:[#allocation14_spill] sm:$0xff] }
 0x272   : > { %v1678_v5 = vpop.f32.mrf.mxu1  ;;  %v1855_v45 = vpop.f32.mrf.mxu0  ;;  %v1159_v26 = vadd.f32 %v4798_v61, %v979_v8  ;;  %v1536_v9 = vadd.f32 %v6452_v22, %v1347_v56  ;;  %v983_v21 = vadd.f32 %v6459_v11, %v6458_v3  ;;  %v6468_v56 = vld [vmem:[#allocation32_spill] sm:$0xff] }
 0x273   : > { %v1961_v23 = vadd.f32 %v1923_v19, %v1897_v42  ;;  %v1898_v37 = vadd.f32 %v1855_v45, %v1709_v0  ;;  %v1976_v6 = vmax.f32 %v1960_v46, 0.0  ;;  %v1713_v12 = vadd.f32 %v1678_v5, %v1533_v51  ;;  %v6449_v0 = vld [vmem:[#allocation11_spill] sm:$0xff]  ;;  %v6450_v46 = vld [vmem:[#allocation13_spill] sm:$0xff] }
 0x274   : > { %v1680_v52 = vpop.f32.mrf.mxu1  ;;  %v1857_v25 = vpop.f32.mrf.mxu0  ;;  %v980_v19 = vadd.f32 %v4792_v59, %v4744_v27  ;;  %v1535_v1 = vadd.f32 %v6447_v60, %v1346_v14  ;;  %v981_v42 = vadd.f32 %v6449_v0, %v6448_v16  ;;  %v6451_v59 = vld [vmem:[#allocation20_spill] sm:$0xff]  ;;  %v6460_v51 = vld [vmem:[#allocation17_spill] sm:$0xff]  ;;  %v6470_v16 = vld [vmem:[#allocation27_spill] sm:$0xff] }
 0x275   : > { %v1962_v7 = vadd.f32 %v1928_v50, %v1898_v37  ;;  %v1899_v39 = vadd.f32 %v1857_v25, %v1710_v35  ;;  %2032 = vrot.lane.b32.xlu1 %v1976_v6, %s4136_s25  ;;  %v1977_v53 = vmax.f32 %v1961_v23, 0.0  ;;  %v1714_v20 = vadd.f32 %v1680_v52, %v1534_v54  ;;  %v6454_v35 = vld [vmem:[#allocation12_spill] sm:$0xff]  ;;  %v6455_v37 = vld [vmem:[#allocation15_spill] sm:$0xff]  ;;  %v6463_v54 = vld [vmem:[#allocation29_spill] sm:$0xff] }
 0x276   : > { %v1684_v55 = vpop.f32.mrf.mxu1  ;;  %v1861_v28 = vpop.f32.mrf.mxu0  ;;  %v1160_v27 = vadd.f32 %v6450_v46, %v980_v19  ;;  %v1348_v61 = vadd.f32 %v6451_v59, %v1159_v26  ;;  %v1161_v6 = vadd.f32 %v6455_v37, %v981_v42  ;;  %v6467_v19 = vld [vmem:[#allocation25_spill] sm:$0xff]  ;;  %v6471_v42 = vld [vmem:[#allocation34_spill] sm:$0xff] }
 0x277   : > { %v1978_v58 = vmax.f32 %v1962_v7, 0.0  ;;  %v1963_v38 = vadd.f32 %v1928_v50, %v1899_v39  ;;  %v1900_v41 = vadd.f32 %v1861_v28, %v1711_v30  ;;  %2034 = vrot.lane.b32.xlu0 %v1977_v53, %s4136_s25  ;;  %v1715_v49 = vadd.f32 %v1684_v55, %v1535_v1  ;;  %v6461_v28 = vld [vmem:[#allocation23_spill] sm:$0xff] }
 0x278   : > { %v1686_v57 = vpop.f32.mrf.mxu1  ;;  %v1863_v31 = vpop.f32.mrf.mxu0  ;;  %v1349_v32 = vadd.f32 %v6456_v18, %v1160_v27  ;;  %v1537_v47 = vadd.f32 %v6457_v13, %v1348_v61 }
 0x279   : > { %v1979_v15 = vmax.f32 %v1963_v38, 0.0  ;;  %v1964_v10 = vadd.f32 %v4873_v43, %v1900_v41  ;;  %v1901_v40 = vadd.f32 %v1863_v31, %v1712_v48  ;;  %2036 = vrot.lane.b32.xlu1 %v1978_v58, %s4136_s25  ;;  %v1716_v30 = vadd.f32 %v1686_v57, %v1536_v9  ;;  %v6462_v58 = vld [vmem:[#allocation31_spill] sm:$0xff]  ;;  %v6472_v9 = vld [vmem:[#allocation33_spill] sm:$0xff] }
 0x27a   : > { %v1690_v24 = vpop.f32.mrf.mxu1  ;;  %v1867_v33 = vpop.f32.mrf.mxu0  ;;  %v1350_v48 = vadd.f32 %v6461_v28, %v1161_v6  ;;  %v1538_v38 = vadd.f32 %v6462_v58, %v1349_v32 }
 0x27b   : > { %v1980_v44 = vmax.f32 %v1964_v10, 0.0  ;;  %v1965_v2 = vadd.f32 %v4873_v43, %v1901_v40  ;;  %v1902_v17 = vadd.f32 %v1867_v33, %v1713_v12  ;;  %2038 = vrot.lane.b32.xlu0 %v1979_v15, %s4136_s25  ;;  %v6453_v43 = vld [vmem:[#allocation8_spill] sm:$0xff]  ;;  %v1717_v4 = vadd.f32 %v1690_v24, %v1537_v47  ;;  %v6466_v10 = vld [vmem:[#allocation18_spill] sm:$0xff] }
 0x27c   : > { %v1692_v63 = vpop.f32.mrf.mxu1  ;;  %v1869_v29 = vpop.f32.mrf.mxu0  ;;  %v982_v23 = vadd.f32 %v6454_v35, %v6453_v43  ;;  %v6465_v12 = vld [vmem:[#allocation16_spill] sm:$0xff]  ;;  %v1163_v40 = vadd.f32 %v6466_v10, %v983_v21  ;;  %v1539_v60 = vadd.f32 %v6468_v56, %v1350_v48 }
 0x27d   : > { %v1981_v5 = vmax.f32 %v1965_v2, 0.0  ;;  %v1966_v45 = vadd.f32 %v4884_v36, %v1902_v17  ;;  %v1903_v50 = vadd.f32 %v1869_v29, %v1714_v20  ;;  %2040 = vrot.lane.b32.xlu1 %v1980_v44, %s4136_s25  ;;  %v1718_v33 = vadd.f32 %v1692_v63, %v1538_v38  ;;  %v6469_v2 = vld [vmem:[#allocation19_spill] sm:$0xff]  ;;  %v6473_v63 = vld [vmem:[#allocation30_spill] sm:$0xff]  ;;  %v4973_v38 = vpop.permute.xlu1 %4088 }
 0x27e   : > { %v1696_v52 = vpop.f32.mrf.mxu1  ;;  %v1873_v25 = vpop.f32.mrf.mxu0  ;;  %v1162_v55 = vadd.f32 %v6460_v51, %v982_v23  ;;  %v1352_v0 = vadd.f32 %v6470_v16, %v1163_v40 }
 0x27f   : > { %v1982_v7 = vmax.f32 %v1966_v45, 0.0  ;;  %v1967_v39 = vadd.f32 %v4884_v36, %v1903_v50  ;;  %v1904_v53 = vadd.f32 %v1873_v25, %v1715_v49  ;;  %2042 = vrot.lane.b32.xlu0 %v1981_v5, %s4136_s25  ;;  %v6464_v36 = vld [vmem:[#allocation10_spill] sm:$0xff]  ;;  %v1719_v61 = vadd.f32 %v1696_v52, %v1539_v60 }
 0x280   : > { %v1698_v41 = vpop.f32.mrf.mxu1  ;;  %v1875_v8 = vpop.f32.mrf.mxu0  ;;  %v984_v15 = vadd.f32 %v6465_v12, %v6464_v36  ;;  %v1351_v26 = vadd.f32 %v6467_v19, %v1162_v55  ;;  %v1541_v45 = vadd.f32 %v4875_v34, %v1352_v0  ;;  %v6474_v52 = vld [vmem:[#allocation6_spill] sm:$0xff] }
 0x281   : > { %v1983_v14 = vmax.f32 %v1967_v39, 0.0  ;;  %v1968_v57 = vadd.f32 %v6463_v54, %v1904_v53  ;;  %v1905_v31 = vadd.f32 %v1875_v8, %v1716_v30  ;;  %2044 = vrot.lane.b32.xlu1 %v1982_v7, %s4136_s25 }
 0x282   : > { %v1879_v1 = vpop.f32.mrf.mxu0  ;;  %v1164_v17 = vadd.f32 %v6469_v2, %v984_v15  ;;  %v1540_v46 = vadd.f32 %v6471_v42, %v1351_v26  ;;  %v1702_v27 = vpop.f32.mrf.mxu1 }
 0x283   : > { %v1984_v20 = vmax.f32 %v1968_v57, 0.0  ;;  %v1969_v24 = vadd.f32 %v6463_v54, %v1905_v31  ;;  %v1906_v44 = vadd.f32 %v1879_v1, %v1717_v4  ;;  %2046 = vrot.lane.b32.xlu0 %v1983_v14, %s4136_s25  ;;  %v1721_v13 = vadd.f32 %v1702_v27, %v1541_v45  ;;  %v4099_v14 = vpop.permute.xlu0 %4098 }
 0x284   : > { %v1881_v59 = vpop.f32.mrf.mxu0  ;;  %v1353_v5 = vadd.f32 %v6473_v63, %v1164_v17  ;;  %v1720_v43 = vadd.f32 %v1698_v41, %v1540_v46  ;;  %v1704_v18 = vpop.f32.mrf.mxu1  ;;  %v5052_v63 = vunpack.i.h.bf16 %v4099_v14 }
 0x285   : > { %v1985_v22 = vmax.f32 %v1969_v24, 0.0  ;;  %v1970_v29 = vadd.f32 %v6472_v9, %v1906_v44  ;;  %v1907_v49 = vadd.f32 %v1881_v59, %v1718_v33  ;;  %2048 = vrot.lane.b32.xlu1 %v1984_v20, %s4136_s25  ;;  %v4094_v41 = vpop.permute.xlu1 %4093  ;;  %v5016_v24 = vunpack.i.l.bf16 %v4973_v38 }
 0x286   : > { %v1885_v50 = vpop.f32.mrf.mxu0  ;;  %v1542_v6 = vadd.f32 %v4882_v62, %v1353_v5  ;;  %v6475_v62 = vld [vmem:[#allocation22_spill] sm:$0xff]  ;;  %v5023_v17 = vunpack.i.h.bf16 %v4094_v41  ;;  %v5034_v46 = vunpack.i.l.bf16 %v4094_v41 }
 0x287   : > { %v1986_v35 = vmax.f32 %v1970_v29, 0.0  ;;  %v1971_v23 = vadd.f32 %v6472_v9, %v1907_v49  ;;  %v1908_v37 = vadd.f32 %v1885_v50, %v1719_v61  ;;  %2050 = vrot.lane.b32.xlu0 %v1985_v22, %s4136_s25  ;;  %v5048_v29 = vunpack.i.l.bf16 %v4099_v14 }
 0x288   : > { %v1887_v32 = vpop.f32.mrf.mxu0  ;;  %v1722_v7 = vadd.f32 %v1704_v18, %v1542_v6 }
 0x289   : > { %v1987_v47 = vmax.f32 %v1971_v23, 0.0  ;;  %v1972_v25 = vadd.f32 %v6474_v52, %v1908_v37  ;;  %v1909_v30 = vadd.f32 %v1887_v32, %v1720_v43  ;;  %2052 = vrot.lane.b32.xlu1 %v1986_v35, %s4136_s25  ;;  %v4975_v8 = vpop.permute.xlu1 %4103  ;;  %v5081_v32 = vunpack.i.h.bf16 %v4973_v38 }
 0x28a   : > { %v1891_v34 = vpop.f32.mrf.mxu0  ;;  %v5064_v43 = vunpack.i.l.bf16 %v4975_v8  ;;  %v5071_v37 = vunpack.i.h.bf16 %v4975_v8 }
 0x28b   : > { %v1988_v39 = vmax.f32 %v1972_v25, 0.0  ;;  %v1973_v53 = vadd.f32 %v6474_v52, %v1909_v30  ;;  %v1910_v3 = vadd.f32 %v1891_v34, %v1721_v13  ;;  %2054 = vrot.lane.b32.xlu0 %v1987_v47, %s4136_s25  ;;  %v5091_v47 = vsel %vm612_vm10, %v5016_v24, %v5081_v32 }
 0x28c   : > { %v1893_v11 = vpop.f32.mrf.mxu0  ;;  %v5106_v34 = vsel %vm801_vm12, %v5034_v46, %v5023_v17 }
 0x28d   : > { %v1989_v21 = vmax.f32 %v1973_v53, 0.0  ;;  %v1974_v51 = vadd.f32 %v6475_v62, %v1910_v3  ;;  %v1911_v55 = vadd.f32 %v1893_v11, %v1722_v7  ;;  %2056 = vrot.lane.b32.xlu1 %v1988_v39, %s4136_s25  ;;  %v4977_v4 = vpop.permute.xlu1 %4108  ;;  %v5118_v53 = vsel %vm1170_vm15, %v5048_v29, %v5052_v63 }
 0x28e   : > { %v5127_v11 = vsel %vm1359_vm1, %v5064_v43, %v5071_v37 }
 0x28f   : > { %v1990_v28 = vmax.f32 %v1974_v51, 0.0  ;;  %v1975_v48 = vadd.f32 %v6475_v62, %v1911_v55  ;;  %2058 = vrot.lane.b32.xlu0 %v1989_v21, %s4136_s25 }
 0x291   : > { %v1991_v58 = vmax.f32 %v1975_v48, 0.0  ;;  %2060 = vrot.lane.b32.xlu1 %v1990_v28, %s4136_s25 }
 0x293   : > { %2062 = vrot.lane.b32.xlu0 %v1991_v58, %s4136_s25  ;;  %s224_s25 = scalar_lea.vmem %s6376_s5, %s4057_s21 }
 0x2e7   : > { %v2033_v54 = vpop.permute.xlu1 %2032 }
 0x2e8   : > { %2097 = vst.msk [vmem:[#allocation3] sm:$0xff] %vm2096_vm14, %v2033_v54 }
 0x2e9   : > { %v2035_v57 = vpop.permute.xlu0 %2034 }
 0x2ea   : > { %v4981_v31 = vsel %vm272_vm7, %v2033_v54, %v2035_v57  ;;  %2099 = vst.msk [vmem:[#allocation3 + $0x10] sm:$0xff] %vm272_vm7, %v2035_v57 }
 0x2eb   : > { %2098 = vst [vmem:[#allocation3 + $0x8] sm:$0xff] %v4981_v31  ;;  %v2037_v36 = vpop.permute.xlu1 %2036  ;;  %v2426_v52 = vmul.f32 %v5091_v47, %v4981_v31  ;;  %v2640_v7 = vmul.f32 %v5106_v34, %v4981_v31  ;;  %v3012_v3 = vmul.f32 %v5118_v53, %v4981_v31  ;;  %v3226_v21 = vmul.f32 %v5127_v11, %v4981_v31 }
 0x2ec   : > { %2100 = vst.msk [vmem:[#allocation3 + $0x18] sm:$0xff] %vm2096_vm14, %v2037_v36 }
 0x2ed   : > { %v2039_v12 = vpop.permute.xlu0 %2038 }
 0x2ee   : > { %v4987_v15 = vsel %vm272_vm7, %v2037_v36, %v2039_v12  ;;  %2102 = vst.msk [vmem:[#allocation3 + $0x28] sm:$0xff] %vm272_vm7, %v2039_v12 }
 0x2ef   : > { %2101 = vst [vmem:[#allocation3 + $0x20] sm:$0xff] %v4987_v15  ;;  %v2041_v10 = vpop.permute.xlu1 %2040  ;;  %v4991_v40 = vld [vmem:[#allocation3] sm:$0xff]  ;;  %v2429_v41 = vmul.f32 %v5091_v47, %v4987_v15  ;;  %v2643_v54 = vmul.f32 %v5106_v34, %v4987_v15  ;;  %v3015_v36 = vmul.f32 %v5118_v53, %v4987_v15 }
 0x2f0   : > { %2103 = vst.msk [vmem:[#allocation3 + $0x30] sm:$0xff] %vm2096_vm14, %v2041_v10  ;;  %2188 = vrot.lane.b32.xlu1 %v4991_v40, %s4139_s28  ;;  %v2425_v0 = vmul.f32 %v5016_v24, %v4991_v40  ;;  %v2639_v22 = vmul.f32 %v5034_v46, %v4991_v40  ;;  %v3011_v45 = vmul.f32 %v5048_v29, %v4991_v40 }
 0x2f1   : > { %v2043_v19 = vpop.permute.xlu0 %2042  ;;  %v4996_v26 = vld [vmem:[#allocation3 + $0x10] sm:$0xff]  ;;  %v3225_v18 = vmul.f32 %v5064_v43, %v4991_v40 }
 0x2f2   : > { %v4999_v56 = vsel %vm272_vm7, %v2041_v10, %v2043_v19  ;;  %2105 = vst.msk [vmem:[#allocation3 + $0x40] sm:$0xff] %vm272_vm7, %v2043_v19  ;;  %2851 = vrot.lane.b32.xlu0 %v4996_v26, %s4146_s9  ;;  %v2641_v27 = vmul.f32 %v5023_v17, %v4996_v26  ;;  %v3013_v35 = vmul.f32 %v5052_v63, %v4996_v26 }
 0x2f3   : > { %2104 = vst [vmem:[#allocation3 + $0x38] sm:$0xff] %v4999_v56  ;;  %v2045_v60 = vpop.permute.xlu1 %2044  ;;  %v5021_v2 = vld [vmem:[#allocation3 + $0x18] sm:$0xff]  ;;  %v3227_v13 = vmul.f32 %v5071_v37, %v4996_v26  ;;  %v2427_v25 = vmul.f32 %v5081_v32, %v4996_v26  ;;  %v3229_v10 = vmul.f32 %v5127_v11, %v4987_v15 }
 0x2f4   : > { %2106 = vst.msk [vmem:[#allocation3 + $0x48] sm:$0xff] %vm2096_vm14, %v2045_v60  ;;  %2847 = vrot.lane.b32.xlu1 %v4991_v40, %s4146_s9  ;;  %v2428_v39 = vmul.f32 %v5016_v24, %v5021_v2  ;;  %v3228_v62 = vmul.f32 %v5064_v43, %v5021_v2  ;;  %v2642_v51 = vmul.f32 %v5034_v46, %v5021_v2 }
 0x2f5   : > { %v2047_v1 = vpop.permute.xlu0 %2046  ;;  %v5101_v30 = vld [vmem:[#allocation3 + $0x28] sm:$0xff]  ;;  %v3014_v28 = vmul.f32 %v5048_v29, %v5021_v2 }
 0x2f6   : > { %v5009_v33 = vsel %vm272_vm7, %v2045_v60, %v2047_v1  ;;  %2108 = vst.msk [vmem:[#allocation3 + $0x58] sm:$0xff] %vm272_vm7, %v2047_v1  ;;  %2190 = vrot.lane.b32.xlu0 %v4981_v31, %s4139_s28  ;;  %v2644_v55 = vmul.f32 %v5023_v17, %v5101_v30  ;;  %v3016_v58 = vmul.f32 %v5052_v63, %v5101_v30 }
 0x2f7   : > { %2107 = vst [vmem:[#allocation3 + $0x50] sm:$0xff] %v5009_v33  ;;  %v2049_v20 = vpop.permute.xlu1 %2048  ;;  %v5146_v48 = vld [vmem:[#allocation3 + $0x30] sm:$0xff]  ;;  %v3230_v38 = vmul.f32 %v5071_v37, %v5101_v30  ;;  %v2430_v8 = vmul.f32 %v5081_v32, %v5101_v30 }
 0x2f8   : > { %2109 = vst.msk [vmem:[#allocation3 + $0x60] sm:$0xff] %vm2096_vm14, %v2049_v20  ;;  %2192 = vrot.lane.b32.xlu1 %v4996_v26, %s4139_s28  ;;  %v2431_v14 = vmul.f32 %v5016_v24, %v5146_v48  ;;  %v3231_v12 = vmul.f32 %v5064_v43, %v5146_v48  ;;  %v2645_v60 = vmul.f32 %v5034_v46, %v5146_v48 }
 0x2f9   : > { %v2051_v44 = vpop.permute.xlu0 %2050  ;;  %v5174_v57 = vld [vmem:[#allocation3 + $0x40] sm:$0xff] }
 0x2fa   : > { %v5026_v16 = vsel %vm272_vm7, %v2049_v20, %v2051_v44  ;;  %2111 = vst.msk [vmem:[#allocation3 + $0x70] sm:$0xff] %vm272_vm7, %v2051_v44  ;;  %2194 = vrot.lane.b32.xlu0 %v5021_v2, %s4139_s28  ;;  %v2647_v1 = vmul.f32 %v5023_v17, %v5174_v57  ;;  %v3017_v20 = vmul.f32 %v5048_v29, %v5146_v48 }
 0x2fb   : > { %2110 = vst [vmem:[#allocation3 + $0x68] sm:$0xff] %v5026_v16  ;;  %v2053_v42 = vpop.permute.xlu1 %2052  ;;  %v5191_v19 = vld [vmem:[#allocation3 + $0x48] sm:$0xff]  ;;  %v3019_v44 = vmul.f32 %v5052_v63, %v5174_v57 }
 0x2fc   : > { %2112 = vst.msk [vmem:[#allocation3 + $0x78] sm:$0xff] %vm2096_vm14, %v2053_v42  ;;  %2475 = vrot.lane.b32.xlu1 %v2425_v0, %s4141_s30  ;;  %v2433_v0 = vmul.f32 %v5081_v32, %v5174_v57 }
 0x2fd   : > { %v2055_v59 = vpop.permute.xlu0 %2054 }
 0x2fe   : > { %v5041_v61 = vsel %vm272_vm7, %v2053_v42, %v2055_v59  ;;  %2114 = vst.msk [vmem:[#allocation3 + $0x88] sm:$0xff] %vm272_vm7, %v2055_v59  ;;  %2693 = vrot.lane.b32.xlu0 %v2641_v27, %s4143_s7  ;;  %v3233_v42 = vmul.f32 %v5071_v37, %v5174_v57  ;;  %v2432_v27 = vmul.f32 %v5091_v47, %v4999_v56  ;;  %v5220_v59 = vld [vmem:[#allocation3 + $0x58] sm:$0xff] }
 0x2ff   : > { %2113 = vst [vmem:[#allocation3 + $0x80] sm:$0xff] %v5041_v61  ;;  %v2057_v9 = vpop.permute.xlu1 %2056 }
 0x300   : > { %2115 = vst.msk [vmem:[#allocation3 + $0x90] sm:$0xff] %vm2096_vm14, %v2057_v9  ;;  %2689 = vrot.lane.b32.xlu1 %v2639_v22, %s4143_s7  ;;  %v2646_v22 = vmul.f32 %v5106_v34, %v4999_v56 }
 0x301   : > { %v2059_v49 = vpop.permute.xlu0 %2058 }
 0x302   : > { %v5055_v5 = vsel %vm272_vm7, %v2057_v9, %v2059_v49  ;;  %2117 = vst.msk [vmem:[#allocation3 + $0xa0] sm:$0xff] %vm272_vm7, %v2059_v49  ;;  %2853 = vrot.lane.b32.xlu0 %v5021_v2, %s4146_s9  ;;  %v2434_v9 = vmul.f32 %v5016_v24, %v5191_v19  ;;  %v3018_v49 = vmul.f32 %v5118_v53, %v4999_v56 }
 0x303   : > { %2116 = vst [vmem:[#allocation3 + $0x98] sm:$0xff] %v5055_v5  ;;  %v2061_v50 = vpop.permute.xlu1 %2060 }
 0x304   : > { %2118 = vst.msk [vmem:[#allocation3 + $0xa8] sm:$0xff] %vm2096_vm14, %v2061_v50  ;;  %3061 = vrot.lane.b32.xlu1 %v3011_v45, %s4147_s14 }
 0x305   : > { %v2063_v23 = vpop.permute.xlu0 %2062 }
 0x306   : > { %v5074_v6 = vsel %vm272_vm7, %v2061_v50, %v2063_v23  ;;  %2120 = vst.msk [vmem:[#allocation3 + $0xb8] sm:$0xff] %vm272_vm7, %v2063_v23  ;;  %3065 = vrot.lane.b32.xlu0 %v3013_v35, %s4147_s14  ;;  %v3232_v50 = vmul.f32 %v5127_v11, %v4999_v56  ;;  %v3234_v23 = vmul.f32 %v5064_v43, %v5191_v19  ;;  %vm2268_vm7 = vcmask 523264  }
 0x307   : > { %2119 = vst [vmem:[#allocation3 + $0xb0] sm:$0xff] %v5074_v6 }
 0x308   : > { %3275 = vrot.lane.b32.xlu1 %v3225_v18, %s4148_s11 }
 0x30a   : > { %3279 = vrot.lane.b32.xlu0 %v3227_v13, %s4148_s11  ;;  %v2648_v13 = vmul.f32 %v5034_v46, %v5191_v19 }
 0x30c   : > { %2849 = vrot.lane.b32.xlu1 %v4981_v31, %s4146_s9 }
 0x30e   : > { %2477 = vrot.lane.b32.xlu0 %v2426_v52, %s4141_s30 }
 0x310   : > { %2479 = vrot.lane.b32.xlu1 %v2427_v25, %s4141_s30  ;;  %v5252_v25 = vld [vmem:[#allocation3 + $0x60] sm:$0xff] }
 0x312   : > { %2198 = vrot.lane.b32.xlu0 %v5101_v30, %s4139_s28 }
 0x314   : > { %2691 = vrot.lane.b32.xlu1 %v2640_v7, %s4143_s7 }
 0x316   : > { %2481 = vrot.lane.b32.xlu0 %v2428_v39, %s4141_s30  ;;  %v3020_v39 = vmul.f32 %v5048_v29, %v5191_v19 }
 0x318   : > { %3063 = vrot.lane.b32.xlu1 %v3012_v3, %s4147_s14 }
 0x31a   : > { %2857 = vrot.lane.b32.xlu0 %v5101_v30, %s4146_s9 }
 0x31c   : > { %3277 = vrot.lane.b32.xlu1 %v3226_v21, %s4148_s11  ;;  %v2650_v21 = vmul.f32 %v5023_v17, %v5220_v59 }
 0x31e   : > { %3281 = vrot.lane.b32.xlu0 %v3228_v62, %s4148_s11 }
 0x320   : > { %2695 = vrot.lane.b32.xlu1 %v2642_v51, %s4143_s7 }
 0x322   : > { %2699 = vrot.lane.b32.xlu0 %v2644_v55, %s4143_s7 }
 0x324   : > { %3067 = vrot.lane.b32.xlu1 %v3014_v28, %s4147_s14 }
 0x326   : > { %2859 = vrot.lane.b32.xlu0 %v5146_v48, %s4146_s9 }
 0x328   : > { %2196 = vrot.lane.b32.xlu1 %v4987_v15, %s4139_s28 }
 0x32a   : > { %3071 = vrot.lane.b32.xlu0 %v3016_v58, %s4147_s14  ;;  %v3022_v58 = vmul.f32 %v5052_v63, %v5220_v59 }
 0x32c   : > { %2855 = vrot.lane.b32.xlu1 %v4987_v15, %s4146_s9 }
 0x32e   : > { %3285 = vrot.lane.b32.xlu0 %v3230_v38, %s4148_s11 }
 0x330   : > { %2200 = vrot.lane.b32.xlu1 %v5146_v48, %s4139_s28 }
 0x332   : > { %2483 = vrot.lane.b32.xlu0 %v2429_v41, %s4141_s30  ;;  %v2436_v41 = vmul.f32 %v5081_v32, %v5220_v59 }
 0x334   : > { %2485 = vrot.lane.b32.xlu1 %v2430_v8, %s4141_s30 }
 0x336   : > { %2487 = vrot.lane.b32.xlu0 %v2431_v14, %s4141_s30  ;;  %v3236_v14 = vmul.f32 %v5071_v37, %v5220_v59 }
 0x338   : > { %2697 = vrot.lane.b32.xlu1 %v2643_v54, %s4143_s7 }
 0x33a   : > { %2863 = vrot.lane.b32.xlu0 %v5174_v57, %s4146_s9 }
 0x33c   : > { %3069 = vrot.lane.b32.xlu1 %v3015_v36, %s4147_s14  ;;  %v2649_v36 = vmul.f32 %v5106_v34, %v5009_v33 }
 0x33e   : > { %3287 = vrot.lane.b32.xlu0 %v3231_v12, %s4148_s11 }
 0x340   : > { %3283 = vrot.lane.b32.xlu1 %v3229_v10, %s4148_s11  ;;  %v2435_v10 = vmul.f32 %v5091_v47, %v5009_v33 }
 0x342   : > { %2202 = vrot.lane.b32.xlu0 %v4999_v56, %s4139_s28 }
 0x344   : > { %2204 = vrot.lane.b32.xlu1 %v5174_v57, %s4139_s28 }
 0x346   : > { %2206 = vrot.lane.b32.xlu0 %v5191_v19, %s4139_s28 }
 0x348   : > { %2701 = vrot.lane.b32.xlu1 %v2645_v60, %s4143_s7 }
 0x34a   : > { %2705 = vrot.lane.b32.xlu0 %v2647_v1, %s4143_s7  ;;  %v3021_v1 = vmul.f32 %v5118_v53, %v5009_v33 }
 0x34c   : > { %3073 = vrot.lane.b32.xlu1 %v3017_v20, %s4147_s14 }
 0x34e   : > { %2865 = vrot.lane.b32.xlu0 %v5191_v19, %s4146_s9 }
 0x350   : > { %2861 = vrot.lane.b32.xlu1 %v4999_v56, %s4146_s9 }
 0x352   : > { %3077 = vrot.lane.b32.xlu0 %v3019_v44, %s4147_s14  ;;  %v5310_v44 = vld [vmem:[#allocation3 + $0x70] sm:$0xff] }
 0x354   : > { %2491 = vrot.lane.b32.xlu1 %v2433_v0, %s4141_s30 }
 0x356   : > { %3291 = vrot.lane.b32.xlu0 %v3233_v42, %s4148_s11  ;;  %v3235_v42 = vmul.f32 %v5127_v11, %v5009_v33 }
 0x358   : > { %2489 = vrot.lane.b32.xlu1 %v2432_v27, %s4141_s30 }
 0x35a   : > { %2210 = vrot.lane.b32.xlu0 %v5220_v59, %s4139_s28 }
 0x35c   : > { %2703 = vrot.lane.b32.xlu1 %v2646_v22, %s4143_s7 }
 0x35e   : > { %2493 = vrot.lane.b32.xlu0 %v2434_v9, %s4141_s30  ;;  %v2437_v9 = vmul.f32 %v5016_v24, %v5252_v25 }
 0x360   : > { %3075 = vrot.lane.b32.xlu1 %v3018_v49, %s4147_s14 }
 0x362   : > { %v5233_v45 = vpop.permute.xlu1 %2188  ;;  %2869 = vrot.lane.b32.xlu0 %v5220_v59, %s4146_s9 }
 0x364   : > { %v5239_v35 = vpop.permute.xlu0 %2851  ;;  %3289 = vrot.lane.b32.xlu1 %v3232_v50, %s4148_s11  ;;  %v3237_v50 = vmul.f32 %v5064_v43, %v5252_v25 }
 0x365   : > { %6476 = vst [vmem:[#allocation24_spill] sm:$0xff] %v5239_v35 }
 0x366   : > { %v5244_v18 = vpop.permute.xlu1 %2847  ;;  %3293 = vrot.lane.b32.xlu0 %v3234_v23, %s4148_s11 }
 0x367   : > { %6477 = vst [vmem:[#allocation7_spill] sm:$0xff] %v5244_v18 }
 0x368   : > { %v5249_v52 = vpop.permute.xlu0 %2190  ;;  %2707 = vrot.lane.b32.xlu1 %v2648_v13, %s4143_s7  ;;  %v2651_v13 = vmul.f32 %v5034_v46, %v5252_v25 }
 0x36a   : > { %v5254_v7 = vpop.permute.xlu1 %2192  ;;  %2212 = vrot.lane.b32.xlu0 %v5252_v25, %s4139_s28 }
 0x36c   : > { %v5260_v3 = vpop.permute.xlu0 %2194  ;;  %3079 = vrot.lane.b32.xlu1 %v3020_v39, %s4147_s14 }
 0x36e   : > { %v5265_v62 = vpop.permute.xlu1 %2475  ;;  %2711 = vrot.lane.b32.xlu0 %v2650_v21, %s4143_s7 }
 0x36f   : > { %6478 = vst [vmem:[#allocation11_spill] sm:$0xff] %v5265_v62 }
 0x370   : > { %v5268_v51 = vpop.permute.xlu0 %2693  ;;  %2208 = vrot.lane.b32.xlu1 %v5009_v33, %s4139_s28 }
 0x371   : > { %6479 = vst [vmem:[#allocation13_spill] sm:$0xff] %v5268_v51 }
 0x372   : > { %v5272_v55 = vpop.permute.xlu1 %2689  ;;  %2871 = vrot.lane.b32.xlu0 %v5252_v25, %s4146_s9 }
 0x373   : > { %6480 = vst [vmem:[#allocation20_spill] sm:$0xff] %v5272_v55 }
 0x374   : > { %v5276_v28 = vpop.permute.xlu0 %2853  ;;  %2867 = vrot.lane.b32.xlu1 %v5009_v33, %s4146_s9 }
 0x375   : > { %6481 = vst [vmem:[#allocation26_spill] sm:$0xff] %v5276_v28  ;;  %v5462_v28 = vld [vmem:[#allocation3 + $0x90] sm:$0xff] }
 0x376   : > { %3083 = vrot.lane.b32.xlu0 %v3022_v58, %s4147_s14  ;;  %v5283_v38 = vpop.permute.xlu1 %3061  ;;  %v3023_v58 = vmul.f32 %v5048_v29, %v5252_v25 }
 0x377   : > { %6482 = vst [vmem:[#allocation8_spill] sm:$0xff] %v5283_v38  ;;  %v3239_v38 = vmul.f32 %v5071_v37, %v5310_v44 }
 0x378   : > { %v5287_v8 = vpop.permute.xlu0 %3065  ;;  %2497 = vrot.lane.b32.xlu1 %v2436_v41, %s4141_s30 }
 0x379   : > { %6483 = vst [vmem:[#allocation12_spill] sm:$0xff] %v5287_v8  ;;  %v2438_v8 = vmul.f32 %v5091_v47, %v5026_v16 }
 0x37a   : > { %3297 = vrot.lane.b32.xlu0 %v3236_v14, %s4148_s11  ;;  %v5293_v54 = vpop.permute.xlu1 %3275  ;;  %v2439_v14 = vmul.f32 %v5081_v32, %v5310_v44 }
 0x37b   : > { %6484 = vst [vmem:[#allocation15_spill] sm:$0xff] %v5293_v54 }
 0x37c   : > { %v5297_v12 = vpop.permute.xlu0 %3279  ;;  %2709 = vrot.lane.b32.xlu1 %v2649_v36, %s4143_s7 }
 0x37d   : > { %6485 = vst [vmem:[#allocation21_spill] sm:$0xff] %v5297_v12 }
 0x37e   : > { %2495 = vrot.lane.b32.xlu0 %v2435_v10, %s4141_s30  ;;  %v5303_v60 = vpop.permute.xlu1 %2849 }
 0x37f   : > { %6486 = vst [vmem:[#allocation28_spill] sm:$0xff] %v5303_v60 }
 0x380   : > { %v5307_v20 = vpop.permute.xlu0 %2477  ;;  %3081 = vrot.lane.b32.xlu1 %v3021_v1, %s4147_s14  ;;  %v2653_v1 = vmul.f32 %v5023_v17, %v5310_v44 }
 0x381   : > { %6487 = vst [vmem:[#allocation9_spill] sm:$0xff] %v5307_v20  ;;  %v2657_v20 = vmul.f32 %v5034_v46, %v5462_v28 }
 0x382   : > { %2216 = vrot.lane.b32.xlu0 %v5310_v44, %s4139_s28  ;;  %v5314_v0 = vpop.permute.xlu1 %2479 }
 0x383   : > { %6488 = vst [vmem:[#allocation14_spill] sm:$0xff] %v5314_v0 }
 0x384   : > { %v5318_v27 = vpop.permute.xlu0 %2198  ;;  %3295 = vrot.lane.b32.xlu1 %v3235_v42, %s4148_s11 }
 0x386   : > { %2875 = vrot.lane.b32.xlu0 %v5310_v44, %s4146_s9  ;;  %v5323_v22 = vpop.permute.xlu1 %2691 }
 0x387   : > { %6489 = vst [vmem:[#allocation17_spill] sm:$0xff] %v5323_v22 }
 0x388   : > { %v5327_v49 = vpop.permute.xlu0 %2481  ;;  %2499 = vrot.lane.b32.xlu1 %v2437_v9, %s4141_s30 }
 0x389   : > { %6490 = vst [vmem:[#allocation23_spill] sm:$0xff] %v5327_v49 }
 0x38a   : > { %3299 = vrot.lane.b32.xlu0 %v3237_v50, %s4148_s11  ;;  %v5333_v23 = vpop.permute.xlu1 %3063  ;;  %v5367_v50 = vld [vmem:[#allocation3 + $0x78] sm:$0xff] }
 0x38b   : > { %6491 = vst [vmem:[#allocation31_spill] sm:$0xff] %v5333_v23 }
 0x38c   : > { %v5337_v39 = vpop.permute.xlu0 %2857  ;;  %2713 = vrot.lane.b32.xlu1 %v2651_v13, %s4143_s7 }
 0x38d   : > { %6492 = vst [vmem:[#allocation29_spill] sm:$0xff] %v5337_v39 }
 0x38e   : > { %3461 = vrot.lane.b32.xlu0 %v5310_v44, %s4149_s17  ;;  %v5342_v21 = vpop.permute.xlu1 %3277 }
 0x38f   : > { %6493 = vst [vmem:[#allocation10_spill] sm:$0xff] %v5342_v21 }
 0x390   : > { %v5346_v41 = vpop.permute.xlu0 %3281  ;;  %3085 = vrot.lane.b32.xlu1 %v3023_v58, %s4147_s14 }
 0x391   : > { %6494 = vst [vmem:[#allocation16_spill] sm:$0xff] %v5346_v41 }
 0x392   : > { %2503 = vrot.lane.b32.xlu0 %v2439_v14, %s4141_s30  ;;  %v5352_v36 = vpop.permute.xlu1 %2695  ;;  %v3025_v14 = vmul.f32 %v5052_v63, %v5310_v44 }
 0x393   : > { %6495 = vst [vmem:[#allocation18_spill] sm:$0xff] %v5352_v36 }
 0x394   : > { %v5354_v10 = vpop.permute.xlu0 %2699  ;;  %2214 = vrot.lane.b32.xlu1 %v5026_v16, %s4139_s28 }
 0x395   : > { %6496 = vst [vmem:[#allocation25_spill] sm:$0xff] %v5354_v10 }
 0x396   : > { %2717 = vrot.lane.b32.xlu0 %v2653_v1, %s4143_s7  ;;  %v5361_v42 = vpop.permute.xlu1 %3067 }
 0x397   : > { %6497 = vst [vmem:[#allocation32_spill] sm:$0xff] %v5361_v42 }
 0x398   : > { %v5363_v9 = vpop.permute.xlu0 %2859  ;;  %2873 = vrot.lane.b32.xlu1 %v5026_v16, %s4146_s9 }
 0x399   : > { %6498 = vst [vmem:[#allocation19_spill] sm:$0xff] %v5363_v9 }
 0x39a   : > { %2877 = vrot.lane.b32.xlu0 %v5367_v50, %s4146_s9  ;;  %v5371_v13 = vpop.permute.xlu1 %2196 }
 0x39c   : > { %v5373_v58 = vpop.permute.xlu0 %3071  ;;  %3459 = vrot.lane.b32.xlu1 %v5026_v16, %s4149_s17 }
 0x39d   : > { %6499 = vst [vmem:[#allocation27_spill] sm:$0xff] %v5373_v58 }
 0x39e   : > { %3089 = vrot.lane.b32.xlu0 %v3025_v14, %s4147_s14  ;;  %v5380_v1 = vpop.permute.xlu1 %2855  ;;  %v5395_v14 = vld [vmem:[#allocation3 + $0x88] sm:$0xff] }
 0x39f   : > { %6500 = vst [vmem:[#allocation34_spill] sm:$0xff] %v5380_v1  ;;  %v2656_v22 = vmul.f32 %v5023_v17, %v5395_v14  ;;  %v3242_v39 = vmul.f32 %v5071_v37, %v5395_v14 }
 0x3a0   : > { %v5382_v54 = vpop.permute.xlu0 %3285  ;;  %2218 = vrot.lane.b32.xlu1 %v5367_v50, %s4139_s28 }
 0x3a1   : > { %6501 = vst [vmem:[#allocation33_spill] sm:$0xff] %v5382_v54  ;;  %v2652_v54 = vmul.f32 %v5106_v34, %v5026_v16 }
 0x3a2   : > { %3303 = vrot.lane.b32.xlu0 %v3239_v38, %s4148_s11  ;;  %v5389_v21 = vpop.permute.xlu1 %2200  ;;  %v2440_v38 = vmul.f32 %v5016_v24, %v5367_v50 }
 0x3a4   : > { %v5391_v12 = vpop.permute.xlu0 %2483  ;;  %3463 = vrot.lane.b32.xlu1 %v5367_v50, %s4149_s17 }
 0x3a5   : > { %6502 = vst [vmem:[#allocation30_spill] sm:$0xff] %v5391_v12  ;;  %v2444_v12 = vmul.f32 %v5091_v47, %v5055_v5 }
 0x3a6   : > { %2222 = vrot.lane.b32.xlu0 %v5395_v14, %s4139_s28  ;;  %v5399_v23 = vpop.permute.xlu1 %2485 }
 0x3a7   : > { %6503 = vst [vmem:[#allocation6_spill] sm:$0xff] %v5399_v23 }
 0x3a8   : > { %v5403_v41 = vpop.permute.xlu0 %2487  ;;  %2501 = vrot.lane.b32.xlu1 %v2438_v8, %s4141_s30  ;;  %v3024_v8 = vmul.f32 %v5118_v53, %v5026_v16 }
 0x3a9   : > { %6504 = vst [vmem:[#allocation22_spill] sm:$0xff] %v5403_v41 }
 0x3aa   : > { %2505 = vrot.lane.b32.xlu0 %v2440_v38, %s4141_s30  ;;  %v5409_v42 = vpop.permute.xlu1 %2697  ;;  %v3240_v38 = vmul.f32 %v5064_v43, %v5367_v50 }
 0x3ab   : > { %6505 = vst [vmem:[#allocation35_spill] sm:$0xff] %v5409_v42  ;;  %v2442_v42 = vmul.f32 %v5081_v32, %v5395_v14 }
 0x3ac   : > { %v5413_v58 = vpop.permute.xlu0 %2863  ;;  %2715 = vrot.lane.b32.xlu1 %v2652_v54, %s4143_s7  ;;  %v3238_v54 = vmul.f32 %v5127_v11, %v5026_v16 }
 0x3ad   : > { %6506 = vst [vmem:[#allocation36_spill] sm:$0xff] %v5413_v58 }
 0x3ae   : > { %2881 = vrot.lane.b32.xlu0 %v5395_v14, %s4146_s9  ;;  %v5418_v18 = vpop.permute.xlu1 %3069 }
 0x3af   : > { %6507 = vst [vmem:[#allocation37_spill] sm:$0xff] %v5418_v18 }
 0x3b0   : > { %v5422_v55 = vpop.permute.xlu0 %3287  ;;  %3087 = vrot.lane.b32.xlu1 %v3024_v8, %s4147_s14  ;;  %v2654_v8 = vmul.f32 %v5034_v46, %v5367_v50 }
 0x3b1   : > { %6508 = vst [vmem:[#allocation38_spill] sm:$0xff] %v5422_v55 }
 0x3b2   : > { %3305 = vrot.lane.b32.xlu0 %v3240_v38, %s4148_s11  ;;  %v5428_v60 = vpop.permute.xlu1 %3283 }
 0x3b3   : > { %6509 = vst [vmem:[#allocation39_spill] sm:$0xff] %v5428_v60 }
 0x3b4   : > { %v5432_v35 = vpop.permute.xlu0 %2202  ;;  %3301 = vrot.lane.b32.xlu1 %v3238_v54, %s4148_s11  ;;  %v3026_v54 = vmul.f32 %v5048_v29, %v5367_v50 }
 0x3b6   : > { %3467 = vrot.lane.b32.xlu0 %v5395_v14, %s4149_s17  ;;  %v5437_v18 = vpop.permute.xlu1 %2204 }
 0x3b8   : > { %v5441_v55 = vpop.permute.xlu0 %2206  ;;  %2719 = vrot.lane.b32.xlu1 %v2654_v8, %s4143_s7 }
 0x3ba   : > { %2220 = vrot.lane.b32.xlu0 %v5041_v61, %s4139_s28  ;;  %v5446_v38 = vpop.permute.xlu1 %2701 }
 0x3bb   : > { %6510 = vst [vmem:[#allocation40_spill] sm:$0xff] %v5446_v38 }
 0x3bc   : > { %v5450_v60 = vpop.permute.xlu0 %2705  ;;  %3091 = vrot.lane.b32.xlu1 %v3026_v54, %s4147_s14 }
 0x3bd   : > { %6511 = vst [vmem:[#allocation41_spill] sm:$0xff] %v5450_v60 }
 0x3be   : > { %2723 = vrot.lane.b32.xlu0 %v2656_v22, %s4143_s7  ;;  %v5456_v51 = vpop.permute.xlu1 %3073  ;;  %v3028_v22 = vmul.f32 %v5052_v63, %v5395_v14 }
 0x3bf   : > { %6512 = vst [vmem:[#allocation42_spill] sm:$0xff] %v5456_v51 }
 0x3c0   : > { %v5458_v8 = vpop.permute.xlu0 %2865  ;;  %2879 = vrot.lane.b32.xlu1 %v5041_v61, %s4146_s9 }
 0x3c1   : > { %6513 = vst [vmem:[#allocation43_spill] sm:$0xff] %v5458_v8  ;;  %v5525_v8 = vunpack.i.l.bf16 %v4977_v4 }
 0x3c2   : > { %2883 = vrot.lane.b32.xlu0 %v5462_v28, %s4146_s9  ;;  %v5466_v36 = vpop.permute.xlu1 %2861 }
 0x3c3   : > { %6514 = vst [vmem:[#allocation44_spill] sm:$0xff] %v5466_v36 }
 0x3c4   : > { %v5468_v54 = vpop.permute.xlu0 %3077  ;;  %3465 = vrot.lane.b32.xlu1 %v5041_v61, %s4149_s17 }
 0x3c5   : > { %6515 = vst [vmem:[#allocation45_spill] sm:$0xff] %v5468_v54 }
 0x3c6   : > { %3095 = vrot.lane.b32.xlu0 %v3028_v22, %s4147_s14  ;;  %v5475_v51 = vpop.permute.xlu1 %2491  ;;  %v2441_v22 = vmul.f32 %v5091_v47, %v5041_v61 }
 0x3c7   : > { %6516 = vst [vmem:[#allocation46_spill] sm:$0xff] %v5475_v51 }
 0x3c8   : > { %v5477_v1 = vpop.permute.xlu0 %3291  ;;  %2224 = vrot.lane.b32.xlu1 %v5462_v28, %s4139_s28 }
 0x3c9   : > { %6517 = vst [vmem:[#allocation47_spill] sm:$0xff] %v5477_v1 }
 0x3ca   : > { %3309 = vrot.lane.b32.xlu0 %v3242_v39, %s4148_s11  ;;  %v5484_v54 = vpop.permute.xlu1 %2489  ;;  %v5500_v39 = vld [vmem:[#allocation3 + $0xa0] sm:$0xff] }
 0x3cb   : > { %6518 = vst [vmem:[#allocation48_spill] sm:$0xff] %v5484_v54 }
 0x3cc   : > { %v5488_v10 = vpop.permute.xlu0 %2210  ;;  %2509 = vrot.lane.b32.xlu1 %v2442_v42, %s4141_s30  ;;  %v2655_v42 = vmul.f32 %v5106_v34, %v5041_v61 }
 0x3ce   : > { %2507 = vrot.lane.b32.xlu0 %v2441_v22, %s4141_s30  ;;  %v5494_v1 = vpop.permute.xlu1 %2703  ;;  %v3243_v22 = vmul.f32 %v5064_v43, %v5462_v28 }
 0x3cf   : > { %6519 = vst [vmem:[#allocation49_spill] sm:$0xff] %v5494_v1  ;;  %v3027_v1 = vmul.f32 %v5118_v53, %v5041_v61 }
 0x3d0   : > { %v5496_v9 = vpop.permute.xlu0 %2493  ;;  %3469 = vrot.lane.b32.xlu1 %v5462_v28, %s4149_s17 }
 0x3d1   : > { %6520 = vst [vmem:[#allocation50_spill] sm:$0xff] %v5496_v9 }
 0x3d2   : > { %2887 = vrot.lane.b32.xlu0 %v5500_v39, %s4146_s9  ;;  %v5504_v38 = vpop.permute.xlu1 %3075 }
 0x3d3   : > { %6521 = vst [vmem:[#allocation51_spill] sm:$0xff] %v5504_v38  ;;  %v5522_v38 = vunpack.i.h.bf16 %v4977_v4 }
 0x3d4   : > { %v5508_v36 = vpop.permute.xlu0 %2869  ;;  %2721 = vrot.lane.b32.xlu1 %v2655_v42, %s4143_s7 }
 0x3d5   : > { %6522 = vst [vmem:[#allocation52_spill] sm:$0xff] %v5508_v36  ;;  %v5541_v4 = vsel %vm1728_vm11, %v5525_v8, %v5522_v38 }
 0x3d6   : > { %3311 = vrot.lane.b32.xlu0 %v3243_v22, %s4148_s11  ;;  %v5514_v58 = vpop.permute.xlu1 %3289  ;;  %v3241_v22 = vmul.f32 %v5127_v11, %v5041_v61 }
 0x3d7   : > { %6523 = vst [vmem:[#allocation53_spill] sm:$0xff] %v5514_v58 }
 0x3d8   : > { %v5518_v60 = vpop.permute.xlu0 %3293  ;;  %3093 = vrot.lane.b32.xlu1 %v3027_v1, %s4147_s14  ;;  %v3615_v1 = vmul.f32 %v5525_v8, %v5462_v28 }
 0x3d9   : > { %6524 = vst [vmem:[#allocation54_spill] sm:$0xff] %v5518_v60 }
 0x3da   : > { %3473 = vrot.lane.b32.xlu0 %v5500_v39, %s4149_s17  ;;  %v5529_v42 = vpop.permute.xlu1 %2707 }
 0x3db   : > { %6525 = vst [vmem:[#allocation55_spill] sm:$0xff] %v5529_v42  ;;  %v3613_v42 = vmul.f32 %v5541_v4, %v5041_v61 }
 0x3dc   : > { %v5533_v58 = vpop.permute.xlu0 %2212  ;;  %3307 = vrot.lane.b32.xlu1 %v3241_v22, %s4148_s11 }
 0x3de   : > { %3683 = vrot.lane.b32.xlu0 %v3615_v1, %s4150_s16  ;;  %v5544_v60 = vpop.permute.xlu1 %3079  ;;  %v5559_v1 = vld [vmem:[#allocation3 + $0xa8] sm:$0xff] }
 0x3df   : > { %6526 = vst [vmem:[#allocation56_spill] sm:$0xff] %v5544_v60  ;;  %v2660_v51 = vmul.f32 %v5034_v46, %v5559_v1  ;;  %v3032_v46 = vmul.f32 %v5048_v29, %v5559_v1 }
 0x3e0   : > { %v5548_v36 = vpop.permute.xlu0 %2711  ;;  %3679 = vrot.lane.b32.xlu1 %v3613_v42, %s4150_s16  ;;  %v2443_v42 = vmul.f32 %v5016_v24, %v5462_v28 }
 0x3e1   : > { %6527 = vst [vmem:[#allocation57_spill] sm:$0xff] %v5548_v36  ;;  %v2445_v36 = vmul.f32 %v5081_v32, %v5500_v39 }
 0x3e2   : > { %2226 = vrot.lane.b32.xlu0 %v5055_v5, %s4139_s28  ;;  %v5553_v22 = vpop.permute.xlu1 %2208 }
 0x3e4   : > { %v5555_v62 = vpop.permute.xlu0 %2871  ;;  %2228 = vrot.lane.b32.xlu1 %v5500_v39, %s4139_s28 }
 0x3e5   : > { %6528 = vst [vmem:[#allocation58_spill] sm:$0xff] %v5555_v62 }
 0x3e6   : > { %2230 = vrot.lane.b32.xlu0 %v5559_v1, %s4139_s28  ;;  %v5563_v61 = vpop.permute.xlu1 %2867 }
 0x3e7   : > { %6529 = vst [vmem:[#allocation59_spill] sm:$0xff] %v5563_v61  ;;  %v2659_v61 = vmul.f32 %v5023_v17, %v5500_v39 }
 0x3e8   : > { %v5567_v60 = vpop.permute.xlu0 %3083  ;;  %2511 = vrot.lane.b32.xlu1 %v2443_v42, %s4141_s30 }
 0x3e9   : > { %6530 = vst [vmem:[#allocation60_spill] sm:$0xff] %v5567_v60  ;;  %v3029_v60 = vmul.f32 %v5048_v29, %v5462_v28 }
 0x3ea   : > { %2515 = vrot.lane.b32.xlu0 %v2445_v36, %s4141_s30  ;;  %v5573_v62 = vpop.permute.xlu1 %2497 }
 0x3ec   : > { %v5577_v0 = vpop.permute.xlu0 %3297  ;;  %2725 = vrot.lane.b32.xlu1 %v2657_v20, %s4143_s7 }
 0x3ed   : > { %6531 = vst [vmem:[#allocation61_spill] sm:$0xff] %v5577_v0 }
 0x3ee   : > { %2729 = vrot.lane.b32.xlu0 %v2659_v61, %s4143_s7  ;;  %v5583_v42 = vpop.permute.xlu1 %2709  ;;  %v3031_v61 = vmul.f32 %v5052_v63, %v5500_v39 }
 0x3ef   : > { %6532 = vst [vmem:[#allocation62_spill] sm:$0xff] %v5583_v42 }
 0x3f0   : > { %v5587_v36 = vpop.permute.xlu0 %2495  ;;  %3097 = vrot.lane.b32.xlu1 %v3029_v60, %s4147_s14  ;;  %v3245_v60 = vmul.f32 %v5071_v37, %v5500_v39 }
 0x3f2   : > { %2889 = vrot.lane.b32.xlu0 %v5559_v1, %s4146_s9  ;;  %v5592_v0 = vpop.permute.xlu1 %3081 }
 0x3f3   : > { %6533 = vst [vmem:[#allocation63_spill] sm:$0xff] %v5592_v0 }
 0x3f4   : > { %v5594_v20 = vpop.permute.xlu0 %2216  ;;  %2885 = vrot.lane.b32.xlu1 %v5055_v5, %s4146_s9 }
 0x3f6   : > { %3101 = vrot.lane.b32.xlu0 %v3031_v61, %s4147_s14  ;;  %v5601_v42 = vpop.permute.xlu1 %3295 }
 0x3f7   : > { %6534 = vst [vmem:[#allocation64_spill] sm:$0xff] %v5601_v42  ;;  %v2658_v42 = vmul.f32 %v5106_v34, %v5055_v5 }
 0x3f8   : > { %v5603_v49 = vpop.permute.xlu0 %2875  ;;  %3471 = vrot.lane.b32.xlu1 %v5055_v5, %s4149_s17 }
 0x3f9   : > { %6535 = vst [vmem:[#allocation65_spill] sm:$0xff] %v5603_v49 }
 0x3fa   : > { %3315 = vrot.lane.b32.xlu0 %v3245_v60, %s4148_s11  ;;  %v5610_v0 = vpop.permute.xlu1 %2499  ;;  %v3617_v60 = vmul.f32 %v5522_v38, %v5500_v39 }
 0x3fc   : > { %v5614_v23 = vpop.permute.xlu0 %3299  ;;  %2513 = vrot.lane.b32.xlu1 %v2444_v12, %s4141_s30  ;;  %v3030_v12 = vmul.f32 %v5118_v53, %v5055_v5 }
 0x3fd   : > { %6536 = vst [vmem:[#allocation66_spill] sm:$0xff] %v5614_v23 }
 0x3fe   : > { %3475 = vrot.lane.b32.xlu0 %v5559_v1, %s4149_s17  ;;  %v5619_v61 = vpop.permute.xlu1 %2713 }
 0x3ff   : > { %6537 = vst [vmem:[#allocation67_spill] sm:$0xff] %v5619_v61  ;;  %v2161_v61 = vld [vmem:[#allocation3 + $0xb8] sm:$0xff] }
 0x400   : > { %v5623_v49 = vpop.permute.xlu0 %3461  ;;  %2727 = vrot.lane.b32.xlu1 %v2658_v42, %s4143_s7  ;;  %v3244_v42 = vmul.f32 %v5127_v11, %v5055_v5 }
 0x401   : > { %6538 = vst [vmem:[#allocation68_spill] sm:$0xff] %v5623_v49 }
 0x402   : > { %3687 = vrot.lane.b32.xlu0 %v3617_v60, %s4150_s16  ;;  %v5629_v23 = vpop.permute.xlu1 %3085  ;;  %v2446_v60 = vmul.f32 %v5016_v24, %v5559_v1 }
 0x403   : > { %6539 = vst [vmem:[#allocation69_spill] sm:$0xff] %v5629_v23 }
 0x404   : > { %v5633_v41 = vpop.permute.xlu0 %2503  ;;  %3099 = vrot.lane.b32.xlu1 %v3030_v12, %s4147_s14  ;;  %v3616_v12 = vmul.f32 %v5541_v4, %v5055_v5 }
 0x406   : > { %2234 = vrot.lane.b32.xlu0 %v2161_v61, %s4139_s28  ;;  %v5637_v49 = vpop.permute.xlu1 %2214 }
 0x408   : > { %v5641_v39 = vpop.permute.xlu0 %2717  ;;  %3313 = vrot.lane.b32.xlu1 %v3244_v42, %s4148_s11 }
 0x409   : > { %6540 = vst [vmem:[#allocation70_spill] sm:$0xff] %v5641_v39 }
 0x40a   : > { %2517 = vrot.lane.b32.xlu0 %v2446_v60, %s4141_s30  ;;  %v5647_v23 = vpop.permute.xlu1 %2873 }
 0x40b   : > { %6541 = vst [vmem:[#allocation71_spill] sm:$0xff] %v5647_v23 }
 0x40c   : > { %v5651_v54 = vpop.permute.xlu0 %2877  ;;  %3685 = vrot.lane.b32.xlu1 %v3616_v12, %s4150_s16  ;;  %v3246_v12 = vmul.f32 %v5064_v43, %v5559_v1  ;;  %v3618_v43 = vmul.f32 %v5525_v8, %v5559_v1 }
 0x40d   : > { %6542 = vst [vmem:[#allocation72_spill] sm:$0xff] %v5651_v54 }
 0x40e   : > { %2731 = vrot.lane.b32.xlu0 %v2660_v51, %s4143_s7  ;;  %v5657_v42 = vpop.permute.xlu1 %3459 }
 0x40f   : > { %6543 = vst [vmem:[#allocation73_spill] sm:$0xff] %v5657_v42 }
 0x410   : > { %v5659_v39 = vpop.permute.xlu0 %3089  ;;  %2232 = vrot.lane.b32.xlu1 %v5074_v6, %s4139_s28 }
 0x411   : > { %6544 = vst [vmem:[#allocation74_spill] sm:$0xff] %v5659_v39 }
 0x412   : > { %2893 = vrot.lane.b32.xlu0 %v2161_v61, %s4146_s9  ;;  %v5664_v24 = vpop.permute.xlu1 %2218 }
 0x414   : > { %v5666_v5 = vpop.permute.xlu0 %3303  ;;  %2891 = vrot.lane.b32.xlu1 %v5074_v6, %s4146_s9 }
 0x415   : > { %6545 = vst [vmem:[#allocation75_spill] sm:$0xff] %v5666_v5  ;;  %v2448_v5 = vmul.f32 %v5081_v32, %v2161_v61 }
 0x416   : > { %3103 = vrot.lane.b32.xlu0 %v3032_v46, %s4147_s14  ;;  %v5673_v51 = vpop.permute.xlu1 %3463  ;;  %v2662_v46 = vmul.f32 %v5023_v17, %v2161_v61 }
 0x417   : > { %6546 = vst [vmem:[#allocation76_spill] sm:$0xff] %v5673_v51 }
 0x418   : > { %v5675_v60 = vpop.permute.xlu0 %2222  ;;  %3477 = vrot.lane.b32.xlu1 %v5074_v6, %s4149_s17 }
 0x41a   : > { %3317 = vrot.lane.b32.xlu0 %v3246_v12, %s4148_s11  ;;  %v5682_v42 = vpop.permute.xlu1 %2501 }
 0x41c   : > { %v5685_v39 = vpop.permute.xlu0 %2505  ;;  %2521 = vrot.lane.b32.xlu1 %v2448_v5, %s4141_s30  ;;  %v3034_v5 = vmul.f32 %v5052_v63, %v2161_v61  ;;  %v3620_v63 = vmul.f32 %v5522_v38, %v2161_v61 }
 0x41e   : > { %3479 = vrot.lane.b32.xlu0 %v2161_v61, %s4149_s17  ;;  %v5689_v29 = vpop.permute.xlu1 %2715 }
 0x41f   : > { %6547 = vst [vmem:[#allocation77_spill] sm:$0xff] %v5689_v29  ;;  %v3612_v29 = vmul.f32 %v5525_v8, %v5367_v50 }
 0x420   : > { %v5692_v51 = vpop.permute.xlu0 %2881  ;;  %2735 = vrot.lane.b32.xlu1 %v2662_v46, %s4143_s7  ;;  %v3248_v46 = vmul.f32 %v5071_v37, %v2161_v61  ;;  %v2447_v37 = vmul.f32 %v5091_v47, %v5074_v6  ;;  %v3614_v61 = vmul.f32 %v5522_v38, %v5395_v14 }
 0x421   : > { %6548 = vst [vmem:[#allocation78_spill] sm:$0xff] %v5692_v51 }
 0x422   : > { %3689 = vrot.lane.b32.xlu0 %v3618_v43, %s4150_s16  ;;  %v5698_v32 = vpop.permute.xlu1 %3087 }
 0x423   : > { %6549 = vst [vmem:[#allocation79_spill] sm:$0xff] %v5698_v32  ;;  %v3610_v32 = vmul.f32 %v5541_v4, %v5026_v16 }
 0x424   : > { %v5700_v12 = vpop.permute.xlu0 %3305  ;;  %3457 = vrot.lane.b32.xlu1 %v5252_v25, %s4149_s17 }
 0x425   : > { %6550 = vst [vmem:[#allocation80_spill] sm:$0xff] %v5700_v12 }
 0x426   : > { %3107 = vrot.lane.b32.xlu0 %v3034_v5, %s4147_s14  ;;  %v5706_v17 = vpop.permute.xlu1 %3301 }
 0x427   : > { %6551 = vst [vmem:[#allocation81_spill] sm:$0xff] %v5706_v17 }
 0x428   : > { %v3468_v23 = vpop.permute.xlu0 %3467  ;;  %3453 = vrot.lane.b32.xlu1 %v5009_v33, %s4149_s17 }
 0x42a   : > { %3321 = vrot.lane.b32.xlu0 %v3248_v46, %s4148_s11  ;;  %v2720_v43 = vpop.permute.xlu1 %2719 }
 0x42c   : > { %v5714_v12 = vpop.permute.xlu0 %2220  ;;  %3673 = vrot.lane.b32.xlu1 %v3610_v32, %s4150_s16 }
 0x42e   : > { %3693 = vrot.lane.b32.xlu0 %v3620_v63, %s4150_s16  ;;  %v3092_v5 = vpop.permute.xlu1 %3091  ;;  %v3607_v63 = vmul.f32 %v5541_v4, %v5009_v33 }
 0x430   : > { %v2724_v17 = vpop.permute.xlu0 %2723  ;;  %3451 = vrot.lane.b32.xlu1 %v5191_v19, %s4149_s17 }
 0x432   : > { %2519 = vrot.lane.b32.xlu0 %v2447_v37, %s4141_s30  ;;  %v5724_v46 = vpop.permute.xlu1 %2879 }
 0x433   : > { %6552 = vst [vmem:[#allocation82_spill] sm:$0xff] %v5724_v46  ;;  %v3611_v46 = vmul.f32 %v5522_v38, %v5310_v44 }
 0x434   : > { %v5726_v16 = vpop.permute.xlu0 %2883  ;;  %3447 = vrot.lane.b32.xlu1 %v4999_v56, %s4149_s17 }
 0x436   : > { %3681 = vrot.lane.b32.xlu0 %v3614_v61, %s4150_s16  ;;  %v5733_v32 = vpop.permute.xlu1 %3465 }
 0x437   : > { %6553 = vst [vmem:[#allocation83_spill] sm:$0xff] %v5733_v32  ;;  %v5739_v47 = vsel %vm1563_vm8, %v5733_v32, %v3468_v23  ;;  %v3033_v32 = vmul.f32 %v5118_v53, %v5074_v6  ;;  %v3609_v53 = vmul.f32 %v5525_v8, %v5252_v25 }
 0x438   : > { %6554 = vst [vmem:[#allocation84_spill] sm:$0xff] %v5739_v47  ;;  %v3096_v37 = vpop.permute.xlu0 %3095  ;;  %3667 = vrot.lane.b32.xlu1 %v3607_v63, %s4150_s16  ;;  %v2661_v63 = vmul.f32 %v5106_v34, %v5074_v6 }
 0x43a   : > { %3677 = vrot.lane.b32.xlu0 %v3612_v29, %s4150_s16  ;;  %v5745_v14 = vpop.permute.xlu1 %2224 }
 0x43c   : > { %v3310_v61 = vpop.permute.xlu0 %3309  ;;  %3445 = vrot.lane.b32.xlu1 %v5146_v48, %s4149_s17 }
 0x43e   : > { %3455 = vrot.lane.b32.xlu0 %v5220_v59, %s4149_s17  ;;  %v2510_v33 = vpop.permute.xlu1 %2509 }
 0x440   : > { %v5751_v23 = vpop.permute.xlu0 %2507  ;;  %3441 = vrot.lane.b32.xlu1 %v4987_v15, %s4149_s17 }
 0x441   : > { %v5759_v29 = vsel %vm636_vm2, %v5751_v23, %v2510_v33  ;;  %v3247_v33 = vmul.f32 %v5127_v11, %v5074_v6 }
 0x442   : > { %2733 = vrot.lane.b32.xlu0 %v2661_v63, %s4143_s7  ;;  %v5762_v47 = vpop.permute.xlu1 %3469 }
 0x444   : > { %v2888_v54 = vpop.permute.xlu0 %2887  ;;  %3105 = vrot.lane.b32.xlu1 %v3033_v32, %s4147_s14 }
 0x446   : > { %3675 = vrot.lane.b32.xlu0 %v3611_v46, %s4150_s16  ;;  %v2722_v34 = vpop.permute.xlu1 %2721  ;;  %v3604_v46 = vmul.f32 %v5541_v4, %v4999_v56  ;;  %v3608_v56 = vmul.f32 %v5522_v38, %v5220_v59 }
 0x447   : > { %v5773_v51 = vsel %vm825_vm4, %v2720_v43, %v2722_v34  ;;  %v5776_v63 = vsel %vm825_vm4, %v2722_v34, %v2724_v17 }
 0x448   : > { %v5778_v9 = vpop.permute.xlu0 %3311  ;;  %3319 = vrot.lane.b32.xlu1 %v3247_v33, %s4148_s11 }
 0x44a   : > { %3671 = vrot.lane.b32.xlu0 %v3609_v53, %s4150_s16  ;;  %v3094_v44 = vpop.permute.xlu1 %3093 }
 0x44b   : > { %v5787_v11 = vsel %vm1194_vm5, %v3092_v5, %v3094_v44  ;;  %v5790_v43 = vsel %vm1194_vm5, %v3094_v44, %v3096_v37  ;;  %v3619_v44 = vmul.f32 %v5541_v4, %v5074_v6 }
 0x44c   : > { %6555 = vst [vmem:[#allocation85_spill] sm:$0xff] %v5787_v11  ;;  %6556 = vst [vmem:[#allocation86_spill] sm:$0xff] %v5790_v43  ;;  %v3474_v17 = vpop.permute.xlu0 %3473  ;;  %3661 = vrot.lane.b32.xlu1 %v3604_v46, %s4150_s16 }
 0x44e   : > { %3449 = vrot.lane.b32.xlu0 %v5174_v57, %s4149_s17  ;;  %v5795_v32 = vpop.permute.xlu1 %3307 }
 0x44f   : > { %6557 = vst [vmem:[#allocation87_spill] sm:$0xff] %v5795_v32  ;;  %v5799_v34 = vsel %vm1383_vm6, %v5795_v32, %v3310_v61  ;;  %v3606_v61 = vmul.f32 %v5525_v8, %v5191_v19 }
 0x450   : > { %6558 = vst [vmem:[#allocation88_spill] sm:$0xff] %v5799_v34  ;;  %v5801_v33 = vpop.permute.xlu0 %3683  ;;  %3439 = vrot.lane.b32.xlu1 %v5021_v2, %s4149_s17  ;;  %v3598_v34 = vmul.f32 %v5541_v4, %v4981_v31 }
 0x452   : > { %3669 = vrot.lane.b32.xlu0 %v3608_v56, %s4150_s16  ;;  %v5808_v5 = vpop.permute.xlu1 %3679  ;;  %v3601_v56 = vmul.f32 %v5541_v4, %v4987_v15 }
 0x453   : > { %6559 = vst [vmem:[#allocation89_spill] sm:$0xff] %v5808_v5 }
 0x454   : > { %v5810_v37 = vpop.permute.xlu0 %2226  ;;  %3435 = vrot.lane.b32.xlu1 %v4981_v31, %s4149_s17  ;;  %v3602_v31 = vmul.f32 %v5522_v38, %v5101_v30 }
 0x456   : > { %3665 = vrot.lane.b32.xlu0 %v3606_v61, %s4150_s16  ;;  %v5817_v53 = vpop.permute.xlu1 %2228  ;;  %v3605_v61 = vmul.f32 %v5522_v38, %v5174_v57 }
 0x458   : > { %v2231_v59 = vpop.permute.xlu0 %2230  ;;  %3691 = vrot.lane.b32.xlu1 %v3619_v44, %s4150_s16  ;;  %v3603_v44 = vmul.f32 %v5525_v8, %v5146_v48 }
 0x45a   : > { %3443 = vrot.lane.b32.xlu0 %v5101_v30, %s4149_s17  ;;  %v5824_v46 = vpop.permute.xlu1 %2511  ;;  %v4115_v30 = vld [vmem:[#allocation3 + $0x10] sm:$0xff] }
 0x45c   : > { %v5828_v5 = vpop.permute.xlu0 %2515  ;;  %3655 = vrot.lane.b32.xlu1 %v3601_v56, %s4150_s16 }
 0x45e   : > { %3663 = vrot.lane.b32.xlu0 %v3605_v61, %s4150_s16  ;;  %v2726_v6 = vpop.permute.xlu1 %2725  ;;  %v3597_v61 = vmul.f32 %v5525_v8, %v4991_v40 }
 0x460   : > { %v2730_v11 = vpop.permute.xlu0 %2729  ;;  %3433 = vrot.lane.b32.xlu1 %v4991_v40, %s4149_s17 }
 0x462   : > { %3659 = vrot.lane.b32.xlu0 %v3603_v44, %s4150_s16  ;;  %v3098_v15 = vpop.permute.xlu1 %3097 }
 0x464   : > { %v5841_v56 = vpop.permute.xlu0 %2889  ;;  %3649 = vrot.lane.b32.xlu1 %v3598_v34, %s4150_s16 }
 0x466   : > { %3437 = vrot.lane.b32.xlu0 %v4996_v26, %s4149_s17  ;;  %v2886_v57 = vpop.permute.xlu1 %2885 }
 0x467   : > { %v5850_v48 = vsel %vm1005_vm3, %v5726_v16, %v2886_v57  ;;  %v5853_v44 = vsel %vm1005_vm3, %v2886_v57, %v2888_v54  ;;  %v3600_v54 = vmul.f32 %v5525_v8, %v5021_v2 }
 0x468   : > { %v3102_v43 = vpop.permute.xlu0 %3101  ;;  %3647 = vrot.lane.b32.xlu1 %v3597_v61, %s4150_s16  ;;  %v3599_v61 = vmul.f32 %v4115_v30, %v5522_v38 }
 0x46a   : > { %3657 = vrot.lane.b32.xlu0 %v3602_v31, %s4150_s16  ;;  %v3472_v26 = vpop.permute.xlu1 %3471 }
 0x46b   : > { %v5861_v4 = vsel %vm1563_vm8, %v5762_v47, %v3472_v26  ;;  %v5864_v40 = vsel %vm1563_vm8, %v3472_v26, %v3474_v17  ;;  %v3803_v17 = vld [vmem:[%s6375_s4] sm:$0x7] }
 0x46c   : > { %6560 = vst [vmem:[#allocation90_spill] sm:$0xff] %v5861_v4  ;;  %6561 = vst [vmem:[#allocation91_spill] sm:$0xff] %v5864_v40  ;;  %v3316_v16 = vpop.permute.xlu0 %3315 }
 0x46e   : > { %3653 = vrot.lane.b32.xlu0 %v3600_v54, %s4150_s16  ;;  %v5869_v34 = vpop.permute.xlu1 %2513 }
 0x470   : > { %v3476_v57 = vpop.permute.xlu0 %3475 }
 0x472   : > { %3651 = vrot.lane.b32.xlu0 %v3599_v61, %s4150_s16  ;;  %v2728_v31 = vpop.permute.xlu1 %2727 }
 0x473   : > { %v5874_v47 = vsel %vm825_vm4, %v2726_v6, %v2728_v31  ;;  %v5880_v2 = vsel %vm825_vm4, %v2728_v31, %v2730_v11 }
 0x474   : > { %v3688_v8 = vpop.permute.xlu0 %3687 }
 0x476   : > { %3806 = vperm.xlu0 %4085, %v3803_v17   ;;  %v3100_v26 = vpop.permute.xlu1 %3099 }
 0x477   : > { %v5883_v54 = vsel %vm1194_vm5, %v3098_v15, %v3100_v26  ;;  %v5886_v38 = vsel %vm1194_vm5, %v3100_v26, %v3102_v43 }
 0x478   : > { %v2235_v30 = vpop.permute.xlu0 %2234 }
 0x47a   : > { %v3314_v61 = vpop.permute.xlu1 %3313 }
 0x47b   : > { %v5890_v6 = vsel %vm1383_vm6, %v5778_v9, %v3314_v61  ;;  %v5893_v4 = vsel %vm1383_vm6, %v3314_v61, %v3316_v16  ;;  %v2249_v16 = vsel %vm315_vm13, %v5810_v37, %v5817_v53  ;;  %v2244_v53 = vsel %vm315_vm13, %v5533_v58, %v5637_v49 }
 0x47c   : > { %v5895_v11 = vpop.permute.xlu0 %2517 }
 0x47e   : > { %v3686_v31 = vpop.permute.xlu1 %3685 }
 0x47f   : > { %v5899_v17 = vsel %vm1752_vm9, %v5801_v33, %v3686_v31  ;;  %v5902_v15 = vsel %vm1752_vm9, %v3686_v31, %v3688_v8  ;;  %v2248_v33 = vsel %vm315_vm13, %v5745_v14, %v5810_v37  ;;  %v2245_v14 = vsel %vm315_vm13, %v5637_v49, %v5594_v20 }
 0x480   : > { %v5904_v43 = vpop.permute.xlu0 %2731  ;;  %v2242_v20 = vsel %vm315_vm13, %v5441_v55, %v5553_v22  ;;  %v2241_v49 = vsel %vm315_vm13, %v5432_v35, %v5437_v18  ;;  %v2238_v55 = vsel %vm315_vm13, %v5260_v3, %v5371_v13  ;;  %v2237_v18 = vsel %vm315_vm13, %v5249_v52, %v5254_v7  ;;  %v6563_v7 = vld [vmem:[#allocation4_spill] sm:$0xff] }
 0x481   : > { %v2236_v3 = vsel %vm315_vm13, %v5233_v45, %v5249_v52  ;;  %v6564_v45 = vmov 0.0  }
 0x482   : > { %v2233_v26 = vpop.permute.xlu1 %2232 }
 0x483   : > { %v2250_v40 = vsel %vm315_vm13, %v2231_v59, %v2233_v26  ;;  %v2251_v9 = vsel %vm315_vm13, %v2233_v26, %v2235_v30  ;;  %v2247_v59 = vsel %vm315_vm13, %v5714_v12, %v5675_v60  ;;  %v2151_v26 = vmul.f32 %v6563_v7, %v5559_v1 }
 0x484   : > { %v5908_v32 = vpop.permute.xlu0 %2893  ;;  %2288 = vmatprep.subr.mxu1 %v2251_v9 }
 0x485   : > { %2289 = vmatpush1.msra.mxu1 %v2250_v40  ;;  %v2246_v40 = vsel %vm315_vm13, %v5664_v24, %v5714_v12  ;;  %v2243_v24 = vsel %vm315_vm13, %v5553_v22, %v5488_v10  ;;  %v2239_v10 = vsel %vm315_vm13, %v5371_v13, %v5318_v27  ;;  %v4116_v13 = vld [vmem:[#allocation3 + $0xb0] sm:$0xff]  ;;  %v6562_v22 = vld [vmem:[#allocation5_spill] sm:$0xff] }
 0x486   : > { %2290 = vmatprep.subr.mxu1 %v2249_v16  ;;  %v5916_v8 = vpop.permute.xlu1 %2891  ;;  %v2152_v31 = vmul.f32 %v4116_v13, %v6562_v22  ;;  %v4117_v16 = vld [vmem:[#allocation3 + $0x98] sm:$0xff] }
 0x487   : > { %2291 = vmatpush1.msra.mxu1 %v2248_v33  ;;  %v2150_v33 = vmul.f32 %v4117_v16, %v6562_v22  ;;  %v4125_v16 = vld [vmem:[#allocation3 + $0x8] sm:$0xff] }
 0x488   : > { %v5924_v30 = vpop.permute.xlu0 %3103  ;;  %2292 = vmatprep.subr.mxu1 %v2247_v59  ;;  %v2149_v59 = vmul.f32 %v6563_v7, %v5462_v28  ;;  %v2145_v28 = vmul.f32 %v6563_v7, %v5252_v25 }
 0x489   : > { %2293 = vmatpush1.msra.mxu1 %v2246_v40  ;;  %v4118_v40 = vld [vmem:[#allocation3 + $0x80] sm:$0xff] }
 0x48a   : > { %2294 = vmatprep.subr.mxu1 %v2245_v14  ;;  %v3478_v37 = vpop.permute.xlu1 %3477  ;;  %v2148_v1 = vmul.f32 %v4118_v40, %v6562_v22  ;;  %v2147_v14 = vmul.f32 %v6563_v7, %v5367_v50  ;;  %v2143_v50 = vmul.f32 %v6563_v7, %v5191_v19 }
 0x48b   : > { %v5933_v60 = vsel %vm1563_vm8, %v3476_v57, %v3478_v37  ;;  %2295 = vmatpush1.msra.mxu1 %v2244_v53  ;;  %v2240_v57 = vsel %vm315_vm13, %v5389_v21, %v5432_v35  ;;  %v4038_v35 = vld [vmem:[%s6374_s3 + $0x4] sm:$0x7]  ;;  %v4119_v53 = vld [vmem:[#allocation3 + $0x68] sm:$0xff] }
 0x48c   : > { %v5938_v12 = vpop.permute.xlu0 %3317  ;;  %2296 = vmatprep.subr.mxu1 %v2243_v24  ;;  %v2146_v24 = vmul.f32 %v4119_v53, %v6562_v22 }
 0x48d   : > { %2297 = vmatpush1.msra.mxu1 %v2242_v20 }
 0x48e   : > { %2298 = vmatprep.subr.mxu1 %v2241_v49  ;;  %v5946_v58 = vpop.permute.xlu1 %2521  ;;  %v4120_v49 = vld [vmem:[#allocation3 + $0x50] sm:$0xff] }
 0x48f   : > { %2299 = vmatpush1.msra.mxu1 %v2240_v57  ;;  %v2144_v57 = vmul.f32 %v4120_v49, %v6562_v22  ;;  %v2535_v49 = vsel %vm636_vm2, %v5824_v46, %v5869_v34  ;;  %v2531_v46 = vsel %vm636_vm2, %v5610_v0, %v5682_v42 }
 0x490   : > { %v3480_v61 = vpop.permute.xlu0 %3479  ;;  %2300 = vmatprep.subr.mxu1 %v2239_v10 }
 0x491   : > { %2301 = vmatpush1.msra.mxu1 %v2238_v55  ;;  %v5964_v21 = vsel %vm1563_vm8, %v3478_v37, %v3480_v61  ;;  %v4121_v61 = vld [vmem:[#allocation3 + $0x38] sm:$0xff] }
 0x492   : > { %2302 = vmatprep.subr.mxu1 %v2237_v18  ;;  %v5966_v27 = vpop.permute.xlu1 %2735  ;;  %v2142_v55 = vmul.f32 %v4121_v61, %v6562_v22  ;;  %v4122_v18 = vld [vmem:[#allocation3 + $0x30] sm:$0xff]  ;;  %v6567_v61 = vld [vmem:[#allocation48_spill] sm:$0xff] }
 0x493   : > { %2303 = vmatpush1.msra.mxu1 %v2236_v3  ;;  %v2141_v25 = vmul.f32 %v4122_v18, %v6563_v7  ;;  %v4123_v3 = vld [vmem:[#allocation3 + $0x20] sm:$0xff] }
 0x494   : > { %v5974_v9 = vpop.permute.xlu0 %3689  ;;  %2362 = vmatprep.subr.mxu1 %v2152_v31  ;;  %4039 = vmatmul.mubr.msk.f32.vlgmr.msra.gmra.mxu1 %vm2268_vm7, %v4038_v35  ;;  %v2140_v13 = vmul.f32 %v4123_v3, %v6562_v22  ;;  %v4124_v31 = vld [vmem:[#allocation3 + $0x18] sm:$0xff] }
 0x495   : > { %2363 = vmatpush1.msra.mxu1 %v2151_v26  ;;  %2410 = vmatprep.mubr.f32.mxu1 %v6564_v45  ;;  %v2139_v19 = vmul.f32 %v4124_v31, %v6563_v7 }
 0x496   : > { %2364 = vmatprep.subr.mxu1 %v2150_v33  ;;  %v5981_v52 = vpop.permute.xlu1 %3457  ;;  %v2138_v33 = vmul.f32 %v4125_v16, %v6562_v22  ;;  %v6573_v16 = vld [vmem:[#allocation9_spill] sm:$0xff] }
 0x497   : > { %2365 = vmatpush1.msra.mxu1 %v2149_v59  ;;  %v4126_v59 = vld [vmem:[#allocation3] sm:$0xff] }
 0x498   : > { %v5986_v37 = vpop.permute.xlu0 %3107  ;;  %2366 = vmatprep.subr.mxu1 %v2148_v1  ;;  %v2137_v40 = vmul.f32 %v4126_v59, %v6563_v7  ;;  %v2153_v1 = vld [vmem:[%s6374_s3] sm:$0x7] }
 0x499   : > { %2367 = vmatpush1.msra.mxu1 %v2147_v14 }
 0x49a   : > { %2368 = vmatprep.subr.mxu1 %v2146_v24  ;;  %v5991_v20 = vpop.permute.xlu1 %3453 }
 0x49b   : > { %2369 = vmatpush1.msra.mxu1 %v2145_v28  ;;  %v2536_v28 = vsel %vm636_vm2, %v5869_v34, %v5828_v5  ;;  %v2532_v5 = vsel %vm636_vm2, %v5682_v42, %v5633_v41  ;;  %v6566_v41 = vld [vmem:[#allocation46_spill] sm:$0xff] }
 0x49c   : > { %v5996_v10 = vpop.permute.xlu0 %3321  ;;  %2370 = vmatprep.subr.mxu1 %v2144_v57  ;;  %v2528_v0 = vsel %vm636_vm2, %v6567_v61, %v6566_v41 }
 0x49d   : > { %2371 = vmatpush1.msra.mxu1 %v2143_v50 }
 0x49e   : > { %2372 = vmatprep.subr.mxu1 %v2142_v55  ;;  %v6000_v35 = vpop.permute.xlu1 %3673  ;;  %v6568_v55 = vld [vmem:[#allocation22_spill] sm:$0xff] }
 0x49f   : > { %2373 = vmatpush1.msra.mxu1 %v2141_v25  ;;  %v2527_v18 = vsel %vm636_vm2, %v6568_v55, %v6567_v61  ;;  %v6570_v25 = vld [vmem:[#allocation30_spill] sm:$0xff] }
 0x4a0   : > { %v6004_v26 = vpop.permute.xlu0 %3693  ;;  %2374 = vmatprep.subr.mxu1 %v2140_v13  ;;  %v6585_v55 = vld [vmem:[#allocation62_spill] sm:$0xff] }
 0x4a1   : > { %2375 = vmatpush1.msra.mxu1 %v2139_v19  ;;  %v6572_v19 = vld [vmem:[#allocation14_spill] sm:$0xff] }
 0x4a2   : > { %2376 = vmatprep.subr.mxu1 %v2138_v33  ;;  %v6011_v14 = vpop.permute.xlu1 %3451  ;;  %v2524_v33 = vsel %vm636_vm2, %v6573_v16, %v6572_v19 }
 0x4a3   : > { %2377 = vmatpush1.msra.mxu1 %v2137_v40  ;;  %v6574_v40 = vld [vmem:[#allocation11_spill] sm:$0xff] }
 0x4a4   : > { %v2520_v53 = vpop.permute.xlu0 %2519  ;;  %4040 = vmatmul.mubr.msk.f32.vlgmr.msra.gmra.mxu1 %vm2268_vm7, %v2153_v1  ;;  %v2523_v1 = vsel %vm636_vm2, %v6574_v40, %v6573_v16  ;;  %v6589_v16 = vld [vmem:[#allocation43_spill] sm:$0xff]  ;;  %v6591_v40 = vld [vmem:[#allocation49_spill] sm:$0xff] }
 0x4a5   : > { %v2537_v24 = vsel %vm636_vm2, %v5895_v11, %v2520_v53  ;;  %v2538_v22 = vsel %vm636_vm2, %v2520_v53, %v5946_v58  ;;  %2836 = vmatprep.mubr.f32.mxu1 %v6564_v45  ;;  %v2533_v11 = vsel %vm636_vm2, %v5685_v39, %v5751_v23  ;;  %v2530_v39 = vsel %vm636_vm2, %v5587_v36, %v5573_v62  ;;  %v6569_v62 = vld [vmem:[#allocation6_spill] sm:$0xff]  ;;  %v4041_v53 = vld [vmem:[%s6374_s3 + $0x8] sm:$0x7] }
 0x4a6   : > { %2574 = vmatprep.subr.mxu0 %v2538_v22  ;;  %v6019_v7 = vpop.permute.xlu1 %3447  ;;  %v2526_v3 = vsel %vm636_vm2, %v6570_v25, %v6569_v62  ;;  %v6586_v62 = vld [vmem:[#allocation52_spill] sm:$0xff] }
 0x4a7   : > { %2575 = vmatpush1.msra.mxu0 %v2537_v24 }
 0x4a8   : > { %v6027_v57 = vpop.permute.xlu0 %3681  ;;  %2576 = vmatprep.subr.mxu0 %v2536_v28  ;;  %v2910_v28 = vsel %vm1005_vm3, %v5916_v8, %v5908_v32  ;;  %v6575_v32 = vld [vmem:[#allocation78_spill] sm:$0xff] }
 0x4a9   : > { %2577 = vmatpush1.msra.mxu0 %v2535_v49 }
 0x4aa   : > { %2578 = vmatprep.subr.mxu0 %v5759_v29  ;;  %v6033_v58 = vpop.permute.xlu1 %3667  ;;  %v6565_v29 = vld [vmem:[#allocation50_spill] sm:$0xff] }
 0x4ab   : > { %2579 = vmatpush1.msra.mxu0 %v2533_v11  ;;  %v2529_v50 = vsel %vm636_vm2, %v6565_v29, %v5587_v36  ;;  %v6571_v36 = vld [vmem:[#allocation23_spill] sm:$0xff]  ;;  %v2909_v11 = vsel %vm1005_vm3, %v5841_v56, %v5916_v8  ;;  %v6581_v29 = vld [vmem:[#allocation65_spill] sm:$0xff] }
 0x4ac   : > { %v6041_v34 = vpop.permute.xlu0 %3677  ;;  %2580 = vmatprep.subr.mxu0 %v2532_v5  ;;  %v2525_v31 = vsel %vm636_vm2, %v6571_v36, %v6570_v25  ;;  %v6577_v5 = vld [vmem:[#allocation72_spill] sm:$0xff]  ;;  %v6587_v25 = vld [vmem:[#allocation59_spill] sm:$0xff] }
 0x4ad   : > { %2581 = vmatpush1.msra.mxu0 %v2531_v46 }
 0x4ae   : > { %2582 = vmatprep.subr.mxu0 %v2530_v39  ;;  %v6046_v23 = vpop.permute.xlu1 %3445 }
 0x4af   : > { %2583 = vmatpush1.msra.mxu0 %v2529_v50  ;;  %v6582_v50 = vld [vmem:[#allocation71_spill] sm:$0xff] }
 0x4b0   : > { %v6054_v42 = vpop.permute.xlu0 %3455  ;;  %2584 = vmatprep.subr.mxu0 %v2528_v0  ;;  %v2904_v41 = vsel %vm1005_vm3, %v6582_v50, %v6581_v29  ;;  %v6584_v0 = vld [vmem:[#allocation57_spill] sm:$0xff]  ;;  %v6600_v29 = vld [vmem:[#allocation18_spill] sm:$0xff] }
 0x4b1   : > { %2585 = vmatpush1.msra.mxu0 %v2527_v18  ;;  %v2744_v18 = vsel %vm825_vm4, %v6585_v55, %v6584_v0  ;;  %v6603_v0 = vld [vmem:[#allocation17_spill] sm:$0xff] }
 0x4b2   : > { %2586 = vmatprep.subr.mxu0 %v2526_v3  ;;  %v6062_v13 = vpop.permute.xlu1 %3441  ;;  %v2902_v3 = vsel %vm1005_vm3, %v6587_v25, %v6586_v62  ;;  %v6604_v62 = vld [vmem:[#allocation24_spill] sm:$0xff] }
 0x4b3   : > { %2587 = vmatpush1.msra.mxu0 %v2525_v31  ;;  %v6588_v31 = vld [vmem:[#allocation55_spill] sm:$0xff] }
 0x4b4   : > { %v2734_v59 = vpop.permute.xlu0 %2733  ;;  %2588 = vmatprep.subr.mxu0 %v2524_v33  ;;  %v2743_v19 = vsel %vm825_vm4, %v6588_v31, %v6585_v55  ;;  %v2901_v33 = vsel %vm1005_vm3, %v6589_v16, %v6587_v25  ;;  %v6605_v25 = vld [vmem:[#allocation28_spill] sm:$0xff]  ;;  %v6607_v16 = vld [vmem:[#allocation7_spill] sm:$0xff] }
 0x4b5   : > { %v2751_v24 = vsel %vm825_vm4, %v5904_v43, %v2734_v59  ;;  %2589 = vmatpush1.msra.mxu0 %v2523_v1  ;;  %v2752_v22 = vsel %vm825_vm4, %v2734_v59, %v5966_v27  ;;  %v6576_v27 = vld [vmem:[#allocation82_spill] sm:$0xff]  ;;  %v6590_v59 = vld [vmem:[#allocation41_spill] sm:$0xff]  ;;  %v6606_v31 = vld [vmem:[#allocation20_spill] sm:$0xff] }
 0x4b6   : > { %2788 = vmatprep.subr.mxu1 %v2752_v22  ;;  %2946 = vmatprep.subr.mxu0 %v2910_v28  ;;  %v6083_v49 = vpop.permute.xlu1 %3105  ;;  %v2906_v56 = vsel %vm1005_vm3, %v6576_v27, %v6575_v32  ;;  %v2905_v46 = vsel %vm1005_vm3, %v6577_v5, %v6576_v27  ;;  %v2742_v1 = vsel %vm825_vm4, %v6591_v40, %v6590_v59  ;;  %v6593_v22 = vld [vmem:[#allocation44_spill] sm:$0xff]  ;;  %v6595_v27 = vld [vmem:[#allocation19_spill] sm:$0xff]  ;;  %v6596_v5 = vld [vmem:[#allocation25_spill] sm:$0xff] }
 0x4b7   : > { %4042 = vmatmul.mubr.msk.f32.vlgmr.msra.gmra.mxu0 %vm2268_vm7, %v4041_v53  ;;  %2789 = vmatpush1.msra.mxu1 %v2751_v24  ;;  %v6592_v24 = vld [vmem:[#allocation36_spill] sm:$0xff] }
 0x4b8   : > { %2947 = vmatpush1.msra.mxu0 %v2909_v11  ;;  %v6089_v43 = vpop.permute.xlu0 %3675  ;;  %2790 = vmatprep.subr.mxu1 %v5880_v2  ;;  %v6578_v2 = vld [vmem:[#allocation70_spill] sm:$0xff]  ;;  %v2900_v28 = vsel %vm1005_vm3, %v6593_v22, %v6592_v24  ;;  %v6594_v11 = vld [vmem:[#allocation40_spill] sm:$0xff] }
 0x4b9   : > { %2948 = vmatprep.subr.mxu0 %v5853_v44  ;;  %2791 = vmatpush1.msra.mxu1 %v5874_v47  ;;  %v6579_v44 = vld [vmem:[#allocation77_spill] sm:$0xff]  ;;  %v2741_v32 = vsel %vm825_vm4, %v6594_v11, %v6591_v40  ;;  %v4043_v59 = vld [vmem:[%s6374_s3 + $0xc] sm:$0x7]  ;;  %v4045_v40 = vld [vmem:[%s6374_s3 + $0x10] sm:$0x7] }
 0x4ba   : > { %2949 = vmatpush1.msra.mxu0 %v5850_v48  ;;  %2792 = vmatprep.subr.mxu1 %v5776_v63  ;;  %v3320_v8 = vpop.permute.xlu1 %3319  ;;  %v2746_v47 = vsel %vm825_vm4, %v6579_v44, %v6578_v2  ;;  %v6580_v48 = vld [vmem:[#allocation67_spill] sm:$0xff] }
 0x4bb   : > { %2950 = vmatprep.subr.mxu0 %v2906_v56  ;;  %2793 = vmatpush1.msra.mxu1 %v5773_v51  ;;  %v2745_v63 = vsel %vm825_vm4, %v6580_v48, %v6579_v44  ;;  %v6583_v51 = vld [vmem:[#allocation58_spill] sm:$0xff]  ;;  %v2899_v56 = vsel %vm1005_vm3, %v6595_v27, %v6593_v22  ;;  %v6598_v44 = vld [vmem:[#allocation29_spill] sm:$0xff]  ;;  %v3338_v24 = vsel %vm1383_vm6, %v3320_v8, %v5996_v10 }
 0x4bc   : > { %2951 = vmatpush1.msra.mxu0 %v2905_v46  ;;  %v6109_v39 = vpop.permute.xlu0 %3671  ;;  %2794 = vmatprep.subr.mxu1 %v2746_v47  ;;  %v2903_v61 = vsel %vm1005_vm3, %v6583_v51, %v6582_v50  ;;  %v6597_v46 = vld [vmem:[#allocation35_spill] sm:$0xff]  ;;  %v6599_v47 = vld [vmem:[#allocation34_spill] sm:$0xff]  ;;  %v3123_v22 = vsel %vm1194_vm5, %v5924_v30, %v6083_v49  ;;  %v6612_v27 = vld [vmem:[#allocation85_spill] sm:$0xff] }
 0x4bd   : > { %2952 = vmatprep.subr.mxu0 %v2904_v41  ;;  %2795 = vmatpush1.msra.mxu1 %v2745_v63  ;;  %v2740_v2 = vsel %vm825_vm4, %v6597_v46, %v6596_v5  ;;  %v2898_v48 = vsel %vm1005_vm3, %v6599_v47, %v6598_v44  ;;  %v2739_v50 = vsel %vm825_vm4, %v6600_v29, %v6597_v46  ;;  %v6601_v41 = vld [vmem:[#allocation26_spill] sm:$0xff]  ;;  %v6608_v30 = vld [vmem:[#allocation87_spill] sm:$0xff]  ;;  %v6616_v5 = vld [vmem:[#allocation81_spill] sm:$0xff] }
 0x4be   : > { %2953 = vmatpush1.msra.mxu0 %v2903_v61  ;;  %2796 = vmatprep.subr.mxu1 %v2744_v18  ;;  %v6123_v36 = vpop.permute.xlu1 %3661  ;;  %v2897_v51 = vsel %vm1005_vm3, %v6601_v41, %v6599_v47  ;;  %v6602_v61 = vld [vmem:[#allocation13_spill] sm:$0xff]  ;;  %v6610_v10 = vld [vmem:[#allocation86_spill] sm:$0xff]  ;;  %v6619_v29 = vld [vmem:[#allocation60_spill] sm:$0xff] }
 0x4bf   : > { %2954 = vmatprep.subr.mxu0 %v2902_v3  ;;  %2797 = vmatpush1.msra.mxu1 %v2743_v19  ;;  %v2738_v55 = vsel %vm825_vm4, %v6603_v0, %v6602_v61  ;;  %v2896_v3 = vsel %vm1005_vm3, %v6605_v25, %v6604_v62  ;;  %v2737_v19 = vsel %vm825_vm4, %v6606_v31, %v6603_v0  ;;  %v6617_v46 = vld [vmem:[#allocation69_spill] sm:$0xff]  ;;  %v6618_v44 = vld [vmem:[#allocation66_spill] sm:$0xff]  ;;  %v6622_v61 = vld [vmem:[#allocation64_spill] sm:$0xff] }
 0x4c0   : > { %2955 = vmatpush1.msra.mxu0 %v2901_v33  ;;  %v6134_v53 = vpop.permute.xlu0 %3449  ;;  %2798 = vmatprep.subr.mxu1 %v2742_v1  ;;  %v2895_v33 = vsel %vm1005_vm3, %v6607_v16, %v6605_v25  ;;  %v3124_v1 = vsel %vm1194_vm5, %v6083_v49, %v5986_v37  ;;  %v6611_v49 = vld [vmem:[#allocation88_spill] sm:$0xff]  ;;  %v3331_v47 = vsel %vm1383_vm6, %v6618_v44, %v6616_v5  ;;  %v6624_v25 = vld [vmem:[#allocation54_spill] sm:$0xff]  ;;  %v6626_v16 = vld [vmem:[#allocation51_spill] sm:$0xff] }
 0x4c1   : > { %2956 = vmatprep.subr.mxu0 %v2900_v28  ;;  %2799 = vmatpush1.msra.mxu1 %v2741_v32  ;;  %v3337_v28 = vsel %vm1383_vm6, %v5938_v12, %v3320_v8  ;;  %v6609_v12 = vld [vmem:[#allocation80_spill] sm:$0xff]  ;;  %v6638_v44 = vld [vmem:[#allocation31_spill] sm:$0xff] }
 0x4c2   : > { %2957 = vmatpush1.msra.mxu0 %v2899_v56  ;;  %2800 = vmatprep.subr.mxu1 %v2740_v2  ;;  %v6151_v63 = vpop.permute.xlu1 %3439  ;;  %v3333_v37 = vsel %vm1383_vm6, %v6609_v12, %v6608_v30  ;;  %v6614_v56 = vld [vmem:[#allocation79_spill] sm:$0xff] }
 0x4c3   : > { %2958 = vmatprep.subr.mxu0 %v2898_v48  ;;  %2801 = vmatpush1.msra.mxu1 %v2739_v50  ;;  %v3117_v2 = vsel %vm1194_vm5, %v6617_v46, %v6614_v56  ;;  %v6620_v50 = vld [vmem:[#allocation63_spill] sm:$0xff] }
 0x4c4   : > { %2959 = vmatpush1.msra.mxu0 %v2897_v51  ;;  %v6162_v18 = vpop.permute.xlu0 %3669  ;;  %2802 = vmatprep.subr.mxu1 %v2738_v55  ;;  %v3116_v41 = vsel %vm1194_vm5, %v6620_v50, %v6619_v29  ;;  %v6621_v51 = vld [vmem:[#allocation61_spill] sm:$0xff]  ;;  %v6623_v55 = vld [vmem:[#allocation56_spill] sm:$0xff]  ;;  %v6631_v12 = vld [vmem:[#allocation27_spill] sm:$0xff] }
 0x4c5   : > { %2960 = vmatprep.subr.mxu0 %v2896_v3  ;;  %2803 = vmatpush1.msra.mxu1 %v2737_v19  ;;  %v3330_v0 = vsel %vm1383_vm6, %v6622_v61, %v6621_v51  ;;  %v3115_v62 = vsel %vm1194_vm5, %v6623_v55, %v6620_v50  ;;  %v3329_v3 = vsel %vm1383_vm6, %v6624_v25, %v6622_v61  ;;  %v6625_v19 = vld [vmem:[#allocation45_spill] sm:$0xff]  ;;  %v6640_v50 = vld [vmem:[#allocation10_spill] sm:$0xff]  ;;  %v6641_v61 = vld [vmem:[#allocation8_spill] sm:$0xff] }
 0x4c6   : > { %2961 = vmatpush1.msra.mxu0 %v2895_v33  ;;  %2994 = vmatprep.mubr.f32.mxu0 %v6564_v45  ;;  %v6190_v11 = vpop.permute.xlu1 %3435  ;;  %v3114_v33 = vsel %vm1194_vm5, %v6626_v16, %v6625_v19  ;;  %v6639_v29 = vld [vmem:[#allocation21_spill] sm:$0xff]  ;;  %v6642_v55 = vld [vmem:[#allocation15_spill] sm:$0xff] }
 0x4c7   : > { %3160 = vmatprep.subr.mxu1 %v3124_v1  ;;  %3374 = vmatprep.subr.mxu0 %v3338_v24  ;;  %v6629_v24 = vld [vmem:[#allocation42_spill] sm:$0xff]  ;;  %v4047_v51 = vld [vmem:[%s6374_s3 + $0x14] sm:$0x7]  ;;  %v4049_v25 = vld [vmem:[%s6374_s3 + $0x18] sm:$0x7] }
 0x4c8   : > { %4044 = vmatmul.mubr.msk.f32.vlgmr.msra.gmra.mxu1 %vm2268_vm7, %v4043_v59  ;;  %4046 = vmatmul.mubr.msk.f32.vlgmr.msra.gmra.mxu0 %vm2268_vm7, %v4045_v40  ;;  %v6194_v32 = vpop.permute.xlu0 %3665  ;;  %v6627_v59 = vld [vmem:[#allocation47_spill] sm:$0xff]  ;;  %v6628_v40 = vld [vmem:[#allocation53_spill] sm:$0xff] }
 0x4c9   : > { %3161 = vmatpush1.msra.mxu1 %v3123_v22  ;;  %3375 = vmatpush1.msra.mxu0 %v3337_v28  ;;  %v3328_v1 = vsel %vm1383_vm6, %v6628_v40, %v6627_v59  ;;  %v3113_v22 = vsel %vm1194_vm5, %v6629_v24, %v6626_v16  ;;  %v6630_v28 = vld [vmem:[#allocation38_spill] sm:$0xff]  ;;  %v6643_v59 = vld [vmem:[#allocation91_spill] sm:$0xff] }
 0x4ca   : > { %3162 = vmatprep.subr.mxu1 %v5886_v38  ;;  %3376 = vmatprep.subr.mxu0 %v5893_v4  ;;  %v6613_v38 = vld [vmem:[#allocation74_spill] sm:$0xff]  ;;  %v3692_v48 = vpop.permute.xlu1 %3691  ;;  %v3327_v30 = vsel %vm1383_vm6, %v6630_v28, %v6628_v40  ;;  %v6650_v28 = vld [vmem:[#allocation73_spill] sm:$0xff] }
 0x4cb   : > { %3163 = vmatpush1.msra.mxu1 %v5883_v54  ;;  %3377 = vmatpush1.msra.mxu0 %v5890_v6  ;;  %v3118_v4 = vsel %vm1194_vm5, %v6614_v56, %v6613_v38  ;;  %v6615_v54 = vld [vmem:[#allocation75_spill] sm:$0xff]  ;;  %v3710_v19 = vsel %vm1752_vm9, %v3692_v48, %v6004_v26  ;;  %v3709_v16 = vsel %vm1752_vm9, %v5974_v9, %v3692_v48  ;;  %v6647_v48 = vld [vmem:[#allocation76_spill] sm:$0xff] }
 0x4cc   : > { %3164 = vmatprep.subr.mxu1 %v6610_v10  ;;  %3378 = vmatprep.subr.mxu0 %v6611_v49  ;;  %v6205_v8 = vpop.permute.xlu0 %3443  ;;  %v3332_v6 = vsel %vm1383_vm6, %v6616_v5, %v6615_v54  ;;  %v6633_v49 = vld [vmem:[#allocation33_spill] sm:$0xff]  ;;  %v6636_v5 = vld [vmem:[#allocation16_spill] sm:$0xff]  ;;  %v6646_v26 = vld [vmem:[#allocation83_spill] sm:$0xff] }
 0x4cd   : > { %3165 = vmatpush1.msra.mxu1 %v6612_v27  ;;  %3379 = vmatpush1.msra.mxu0 %v3333_v37  ;;  %v6632_v37 = vld [vmem:[#allocation37_spill] sm:$0xff]  ;;  %v6634_v27 = vld [vmem:[#allocation39_spill] sm:$0xff]  ;;  %v3491_v24 = vsel %vm1563_vm8, %v6647_v48, %v6646_v26 }
 0x4ce   : > { %3166 = vmatprep.subr.mxu1 %v3118_v4  ;;  %3380 = vmatprep.subr.mxu0 %v3332_v6  ;;  %v3112_v10 = vsel %vm1194_vm5, %v6632_v37, %v6631_v12  ;;  %v3326_v38 = vsel %vm1383_vm6, %v6634_v27, %v6633_v49  ;;  %v6252_v56 = vpop.permute.xlu1 %3655  ;;  %v6635_v4 = vld [vmem:[#allocation32_spill] sm:$0xff]  ;;  %v3325_v6 = vsel %vm1383_vm6, %v6636_v5, %v6634_v27 }
 0x4cf   : > { %3167 = vmatpush1.msra.mxu1 %v3117_v2  ;;  %3381 = vmatpush1.msra.mxu0 %v3331_v47  ;;  %v3111_v54 = vsel %vm1194_vm5, %v6635_v4, %v6632_v37  ;;  %v6637_v2 = vld [vmem:[#allocation12_spill] sm:$0xff] }
 0x4d0   : > { %3168 = vmatprep.subr.mxu1 %v3116_v41  ;;  %3382 = vmatprep.subr.mxu0 %v3330_v0  ;;  %v6232_v31 = vpop.permute.xlu0 %3663  ;;  %v3110_v47 = vsel %vm1194_vm5, %v6638_v44, %v6637_v2  ;;  %v3324_v41 = vsel %vm1383_vm6, %v6640_v50, %v6639_v29  ;;  %v3109_v0 = vsel %vm1194_vm5, %v6641_v61, %v6638_v44 }
 0x4d1   : > { %3169 = vmatpush1.msra.mxu1 %v3115_v62  ;;  %3383 = vmatpush1.msra.mxu0 %v3329_v3  ;;  %v3323_v62 = vsel %vm1383_vm6, %v6642_v55, %v6640_v50 }
 0x4d2   : > { %3170 = vmatprep.subr.mxu1 %v3114_v33  ;;  %3384 = vmatprep.subr.mxu0 %v3328_v1  ;;  %v3434_v33 = vpop.permute.xlu1 %3433  ;;  %v6644_v1 = vld [vmem:[#allocation90_spill] sm:$0xff] }
 0x4d3   : > { %3171 = vmatpush1.msra.mxu1 %v3113_v22  ;;  %3385 = vmatpush1.msra.mxu0 %v3327_v30  ;;  %v6648_v22 = vld [vmem:[#allocation84_spill] sm:$0xff]  ;;  %v3489_v30 = vsel %vm1563_vm8, %v5981_v52, %v6650_v28  ;;  %v3487_v52 = vsel %vm1563_vm8, %v6011_v14, %v5991_v20  ;;  %v3481_v49 = vsel %vm1563_vm8, %v3434_v33, %v6190_v11 }
 0x4d4   : > { %3172 = vmatprep.subr.mxu1 %v3112_v10  ;;  %3386 = vmatprep.subr.mxu0 %v3326_v38  ;;  %v3660_v46 = vpop.permute.xlu0 %3659  ;;  %v3488_v10 = vsel %vm1563_vm8, %v5991_v20, %v6054_v42  ;;  %v3486_v42 = vsel %vm1563_vm8, %v6019_v7, %v6134_v53  ;;  %v3485_v20 = vsel %vm1563_vm8, %v6046_v23, %v6019_v7 }
 0x4d5   : > { %3173 = vmatpush1.msra.mxu1 %v3111_v54  ;;  %3387 = vmatpush1.msra.mxu0 %v3325_v6  ;;  %v3699_v14 = vsel %vm1752_vm9, %v3660_v46, %v6123_v36  ;;  %v3484_v53 = vsel %vm1563_vm8, %v6062_v13, %v6205_v8  ;;  %v3483_v7 = vsel %vm1563_vm8, %v6151_v63, %v6062_v13  ;;  %v4051_v8 = vld [vmem:[%s6374_s3 + $0x1c] sm:$0x7]  ;;  %v4053_v63 = vld [vmem:[%s6374_s3 + $0x20] sm:$0x7] }
 0x4d6   : > { %3174 = vmatprep.subr.mxu1 %v3110_v47  ;;  %3388 = vmatprep.subr.mxu0 %v3324_v41  ;;  %v3650_v12 = vpop.permute.xlu1 %3649 }
 0x4d7   : > { %3175 = vmatpush1.msra.mxu1 %v3109_v0  ;;  %3208 = vmatprep.mubr.f32.mxu1 %v6564_v45 }
 0x4d8   : > { %3389 = vmatpush1.msra.mxu0 %v3323_v62  ;;  %4048 = vmatmul.mubr.msk.f32.vlgmr.msra.gmra.mxu1 %vm2268_vm7, %v4047_v51  ;;  %v3438_v3 = vpop.permute.xlu0 %3437 }
 0x4d9   : > { %3422 = vmatprep.mubr.f32.mxu0 %v6564_v45  ;;  %3532 = vmatprep.subr.mxu1 %v5964_v21  ;;  %v6645_v21 = vld [vmem:[#allocation89_spill] sm:$0xff] }
 0x4da   : > { %3746 = vmatprep.subr.mxu0 %v3710_v19  ;;  %4050 = vmatmul.mubr.msk.f32.vlgmr.msra.gmra.mxu0 %vm2268_vm7, %v4049_v25  ;;  %v3706_v9 = vsel %vm1752_vm9, %v6645_v21, %v6027_v57  ;;  %v3704_v57 = vsel %vm1752_vm9, %v6000_v35, %v6089_v43  ;;  %v3702_v43 = vsel %vm1752_vm9, %v6033_v58, %v6162_v18  ;;  %v3648_v23 = vpop.permute.xlu1 %3647 }
 0x4db   : > { %3533 = vmatpush1.msra.mxu1 %v5933_v60  ;;  %3747 = vmatpush1.msra.mxu0 %v3709_v16  ;;  %v3705_v60 = vsel %vm1752_vm9, %v6041_v34, %v6645_v21  ;;  %v3703_v34 = vsel %vm1752_vm9, %v6109_v39, %v6000_v35  ;;  %v3701_v35 = vsel %vm1752_vm9, %v6194_v32, %v6033_v58 }
 0x4dc   : > { %3534 = vmatprep.subr.mxu1 %v6643_v59  ;;  %3748 = vmatprep.subr.mxu0 %v5902_v15  ;;  %v3658_v40 = vpop.permute.xlu0 %3657  ;;  %v6649_v15 = vld [vmem:[#allocation68_spill] sm:$0xff]  ;;  %v3700_v39 = vsel %vm1752_vm9, %v6123_v36, %v6232_v31  ;;  %v3482_v31 = vsel %vm1563_vm8, %v6190_v11, %v3438_v3  ;;  %v3695_v13 = vsel %vm1752_vm9, %v3648_v23, %v3650_v12 }
 0x4dd   : > { %3535 = vmatpush1.msra.mxu1 %v6644_v1  ;;  %3749 = vmatpush1.msra.mxu0 %v5899_v17  ;;  %v3490_v17 = vsel %vm1563_vm8, %v6650_v28, %v6649_v15  ;;  %v3698_v32 = vsel %vm1752_vm9, %v6252_v56, %v3658_v40 }
 0x4de   : > { %3536 = vmatprep.subr.mxu1 %v6648_v22  ;;  %3750 = vmatprep.subr.mxu0 %v3706_v9 }
 0x4df   : > { %3537 = vmatpush1.msra.mxu1 %v3491_v24  ;;  %3751 = vmatpush1.msra.mxu0 %v3705_v60 }
 0x4e0   : > { %3538 = vmatprep.subr.mxu1 %v3490_v17  ;;  %3752 = vmatprep.subr.mxu0 %v3704_v57  ;;  %v3654_v37 = vpop.permute.xlu0 %3653 }
 0x4e1   : > { %3539 = vmatpush1.msra.mxu1 %v3489_v30  ;;  %3753 = vmatpush1.msra.mxu0 %v3703_v34  ;;  %v3697_v58 = vsel %vm1752_vm9, %v3654_v37, %v6252_v56 }
 0x4e2   : > { %3540 = vmatprep.subr.mxu1 %v3488_v10  ;;  %3754 = vmatprep.subr.mxu0 %v3702_v43 }
 0x4e3   : > { %3541 = vmatpush1.msra.mxu1 %v3487_v52  ;;  %3755 = vmatpush1.msra.mxu0 %v3701_v35 }
 0x4e4   : > { %3542 = vmatprep.subr.mxu1 %v3486_v42  ;;  %3756 = vmatprep.subr.mxu0 %v3700_v39  ;;  %v3652_v18 = vpop.permute.xlu0 %3651 }
 0x4e5   : > { %3543 = vmatpush1.msra.mxu1 %v3485_v20  ;;  %3757 = vmatpush1.msra.mxu0 %v3699_v14  ;;  %v3696_v36 = vsel %vm1752_vm9, %v3650_v12, %v3652_v18 }
 0x4e6   : > { %3544 = vmatprep.subr.mxu1 %v3484_v53  ;;  %3758 = vmatprep.subr.mxu0 %v3698_v32 }
 0x4e7   : > { %3545 = vmatpush1.msra.mxu1 %v3483_v7  ;;  %3759 = vmatpush1.msra.mxu0 %v3697_v58 }
 0x4e8   : > { %3546 = vmatprep.subr.mxu1 %v3482_v31  ;;  %3580 = vmatprep.mubr.f32.mxu1 %v6564_v45 }
 0x4e9   : > { %3547 = vmatpush1.msra.mxu1 %v3481_v49  ;;  %3760 = vmatprep.subr.mxu0 %v3696_v36 }
 0x4ea   : > { %4052 = vmatmul.mubr.msk.f32.vlgmr.msra.gmra.mxu1 %vm2268_vm7, %v4051_v8  ;;  %3761 = vmatpush1.msra.mxu0 %v3695_v13 }
 0x4eb   : > { %3794 = vmatprep.mubr.f32.mxu0 %v6564_v45 }
 0x4ec   : > { %4054 = vmatmul.mubr.msk.f32.vlgmr.msra.gmra.mxu0 %vm2268_vm7, %v4053_v63 }
 0x4f1   : > { %v3807_v60 = vpop.permute.xlu0 %3806 }
 0x554   : > { %v2338_v27 = vpop.f32.mrf.mxu1 }
 0x556   : > { %v2340_v11 = vpop.f32.mrf.mxu1 }
 0x564   : > { %v2412_v38 = vpop.f32.mrf.mxu1 }
 0x565   : > { %v2413_v5 = vadd.f32 %v2412_v38, %v2338_v27 }
 0x566   : > { %v2414_v56 = vpop.f32.mrf.mxu1 }
 0x567   : > { %v2415_v46 = vadd.f32 %v2414_v56, %v2340_v11 }
 0x577   : > { %v2624_v4 = vpop.f32.mrf.mxu0 }
 0x578   : > { %v2629_v2 = vadd.f32 %v2624_v4, %v2413_v5 }
 0x579   : > { %v2626_v6 = vpop.f32.mrf.mxu0 }
 0x57a   : > { %v2630_v29 = vadd.f32 %v2626_v6, %v2415_v46 }
 0x588   : > { %v2838_v54 = vpop.f32.mrf.mxu1  ;;  %v2996_v47 = vpop.f32.mrf.mxu0 }
 0x589   : > { %v2843_v50 = vadd.f32 %v2838_v54, %v2629_v2 }
 0x58a   : > { %v2840_v44 = vpop.f32.mrf.mxu1  ;;  %v2998_v61 = vpop.f32.mrf.mxu0 }
 0x58b   : > { %v2844_v51 = vadd.f32 %v2840_v44, %v2630_v29  ;;  %v3001_v45 = vadd.f32 %v2996_v47, %v2843_v50 }
 0x58d   : > { %v3002_v62 = vadd.f32 %v2998_v61, %v2844_v51 }
 0x598   : > { %v3210_v41 = vpop.f32.mrf.mxu1 }
 0x599   : > { %v3215_v25 = vadd.f32 %v3210_v41, %v3001_v45 }
 0x59a   : > { %v3212_v0 = vpop.f32.mrf.mxu1  ;;  %v3424_v55 = vpop.f32.mrf.mxu0 }
 0x59b   : > { %v3216_v3 = vadd.f32 %v3212_v0, %v3002_v62  ;;  %v3429_v16 = vadd.f32 %v3424_v55, %v3215_v25 }
 0x59c   : > { %v3426_v19 = vpop.f32.mrf.mxu0 }
 0x59d   : > { %v3430_v59 = vadd.f32 %v3426_v19, %v3216_v3 }
 0x5aa   : > { %v3582_v33 = vpop.f32.mrf.mxu1 }
 0x5ab   : > { %v3587_v40 = vadd.f32 %v3582_v33, %v3429_v16 }
 0x5ac   : > { %v3584_v1 = vpop.f32.mrf.mxu1  ;;  %v3796_v21 = vpop.f32.mrf.mxu0 }
 0x5ad   : > { %v3588_v9 = vadd.f32 %v3584_v1, %v3430_v59  ;;  %v3801_v26 = vadd.f32 %v3796_v21, %v3587_v40 }
 0x5ae   : > { %v3798_v48 = vpop.f32.mrf.mxu0 }
 0x5af   : > { %v3802_v24 = vadd.f32 %v3798_v48, %v3588_v9  ;;  %v3809_v22 = vadd.f32 %v3807_v60, %v3801_v26 }
 0x5b1   : > { %v3810_v15 = vadd.f32 %v3807_v60, %v3802_v24 }
 0x5b3   : > { %v3813_v28 = vcombine.low %v3809_v22, %v3810_v15 }
 0x5b5   : > { %3815 = vst [vmem:[%s224_s25] sm:$0x77] %v3813_v28 }
 0x5b6 PF: > { %s15_s18 = sadd.s32 1, %s4133_s18  }
 0x5b7   : > { %p12_p4 = scmp.ge.s32.totalorder %s15_s18, 4  }
 0x5b9   :  { %14 = sbr.rel (!%p12_p4) target bundleno = 1 (0x1), region = 86 }

</bundles_post_ra>
